<compile_context>
chip_gen: v7x
topology: tpu7x:2x2x1
jax: 0.10.0
libtpu: 0.0.40
codegen_flags: <defaults>
</compile_context>

<pallas_src>
import jax
import jax.numpy as jnp
import numpy as np
from jax.experimental import pallas as pl
from jax.experimental.pallas import tpu as pltpu


# --------------------------------------------------------------------------
# Pallas kernel: entire MessageGNN forward for one graph (fits VMEM).
# --------------------------------------------------------------------------
def message_gnn_kernel(
    # ---- inputs
    invd_ref,                                  # [C+V, 1] f32: 1/deg for clauses then variables
    ea_ref, ec_ref,                            # [C*V, 1+e], [V*C, 1+e] bf16 (lane 0 = mask)
    ccat_ref, vcat_ref, ucat_ref,              # [feats | emb] concats (bf16)
    vcemb_ref, uemb_ref,                       # [V+C, E] stacked (vars then clauses), [1, E] bf16
    wvce_ref, wcve_ref,                        # [1+e, E] bf16 edge weights (row 0 = 0: mask inert)
    wsrc_ref,                                  # [E, 2E] bf16 = [W_vc_src | W_cv_src]
    bvc_ref, bcv_ref,                          # [1, E] f32 message biases
    wcfe_ref, wvfe_ref,                        # fused [feat | emb] update weights (bf16)
    wh_ref, wctx_ref,                          # [E, 2E] bf16 = [W_c_h|W_v_h], [W_c_ctx|W_v_ctx]
    bc_ref, bv_ref,                            # [1, E] f32 update biases
    wufe_ref, wucv_ref, bu_ref,                # u-update: fused [feat|emb], [W_uc;W_uv], bias
    # ---- outputs
    c_out_ref, v_out_ref, u_out_ref,
    # ---- scratch
    hcv_ref,                                   # [C+V, E] f32 neighbor-mean accumulator
):
    f32 = jnp.float32
    bf16 = jnp.bfloat16
    dot = lambda a, b: jnp.dot(a, b, preferred_element_type=f32)   # MXU, f32 accumulate
    leaky = lambda x: jnp.maximum(x, 0.1 * x)                      # exact LeakyReLU(0.1), 2 VPU ops

    C = c_out_ref.shape[0]
    V = v_out_ref.shape[0]
    E = uemb_ref.shape[1]
    CB = VB = 8                                                    # sublane-tile row blocks

    # ---- step 1: ctx = mean of incoming context messages == u_emb
    #      (single context node connected to every clause / variable).

    # ---- fused source projections (one MXU push for both message layers):
    #      [v_emb; c_emb] @ [W_vc_src | W_cv_src]  -> take the two diagonal blocks.
    src_proj = dot(vcemb_ref[...], wsrc_ref[...])                  # [V+C, 2E] f32
    v_proj = src_proj[:V, :E] + bvc_ref[...]                       # [V, E]
    c_proj = src_proj[V:, E:] + bcv_ref[...]                       # [C, E]

    # ---- step 2a: 'assigns' (variable -> clause) messages, blocked over 8-clause groups:
    #      LeakyReLU(edge_dot + src_proj), exact 0/1 mask, sum over neighbors, * 1/deg.
    for cb in range(C // CB):
        r0 = cb * CB
        blk = ea_ref[r0 * V:(r0 + CB) * V, :]                      # [CB*V, 1+e] bf16
        m = dot(blk, wvce_ref[...])                                # [CB*V, E] f32 (mask col inert)
        m = leaky(m.reshape(CB, V, E) + v_proj[None, :, :])        # broadcast src over the block
        m = m.reshape(CB * V, E) * blk[:, 0:1]                     # exact 0/1 mask (lane 0)
        h = jnp.sum(m.reshape(CB, V, E), axis=1)                   # [CB, E] XLU reduce over vars
        hcv_ref[r0:r0 + CB, :] = h * invd_ref[r0:r0 + CB, :]       # exact f32 1/deg

    # ---- step 2b: 'contains' (clause -> variable) messages, blocked over 8-variable groups.
    for vb in range(V // VB):
        r0 = vb * VB
        blk = ec_ref[r0 * C:(r0 + VB) * C, :]                      # [VB*C, 1+e] bf16
        m = dot(blk, wcve_ref[...])
        m = leaky(m.reshape(VB, C, E) + c_proj[None, :, :])
        m = m.reshape(VB * C, E) * blk[:, 0:1]
        h = jnp.sum(m.reshape(VB, C, E), axis=1)                   # [VB, E]
        hcv_ref[C + r0:C + r0 + VB, :] = h * invd_ref[C + r0:C + r0 + VB, :]

    # ---- step 2c: node updates.  ctx / h projections for clauses and variables are
    #      fused into one MXU push each; the per-node-type block is then sliced out.
    ctx = dot(uemb_ref[...], wctx_ref[...])                        # [1, 2E] f32
    hproj = dot(hcv_ref[...].astype(bf16), wh_ref[...])            # [C+V, 2E] f32
    c_new = leaky(dot(ccat_ref[...], wcfe_ref[...])                # fused [c_feat | c_emb]
                  + hproj[:C, :E] + ctx[:, :E] + bc_ref[...])
    v_new = leaky(dot(vcat_ref[...], wvfe_ref[...])                # fused [v_feat | v_emb]
                  + hproj[C:, E:] + ctx[:, E:] + bv_ref[...])

    # ---- step 3: context receives the mean of the UPDATED clause / variable embeddings.
    c_agg = jnp.mean(c_new, axis=0, keepdims=True)                 # [1, E]
    v_agg = jnp.mean(v_new, axis=0, keepdims=True)                 # [1, E]

    # ---- step 4: context update; c_agg/v_agg dots fused exactly along K:
    #      [c_agg | v_agg] @ [W_uc ; W_uv].
    agg = jnp.concatenate([c_agg, v_agg], axis=1).astype(bf16)     # [1, 2E]
    u_new = leaky(dot(ucat_ref[...], wufe_ref[...])                # fused [u_feat | u_emb]
                  + dot(agg, wucv_ref[...]) + bu_ref[...])

    c_out_ref[...] = c_new
    v_out_ref[...] = v_new
    u_out_ref[...] = u_new


# --------------------------------------------------------------------------
# Glue: parameter init, topology / parameter prep (done ONCE), wrapper, reference.
# --------------------------------------------------------------------------
def init_params(key, emb_dim, c_feats, v_feats, u_feats, e_feats):
    """Deterministic PyTorch-nn.Linear-style init, weights stored [in, out]."""
    def lin(k, fan_in, fan_out):
        kw, kb = jax.random.split(k)
        bound = 1.0 / float(np.sqrt(fan_in))
        w = jax.random.uniform(kw, (fan_in, fan_out), jnp.float32, -bound, bound)
        b = jax.random.uniform(kb, (1, fan_out), jnp.float32, -bound, bound)
        return w, b

    ks = jax.random.split(key, 5)
    W_vc, b_vc = lin(ks[0], e_feats + emb_dim, emb_dim)       # message_vc_layer
    W_cv, b_cv = lin(ks[1], e_feats + emb_dim, emb_dim)       # message_cv_layer
    W_c, b_c = lin(ks[2], c_feats + 3 * emb_dim, emb_dim)     # c_update_layer
    W_v, b_v = lin(ks[3], v_feats + 3 * emb_dim, emb_dim)     # v_update_layer
    W_u, b_u = lin(ks[4], u_feats + 3 * emb_dim, emb_dim)     # u_update_layer
    return dict(W_vc=W_vc, b_vc=b_vc, W_cv=W_cv, b_cv=b_cv,
                W_c=W_c, b_c=b_c, W_v=W_v, b_v=b_v, W_u=W_u, b_u=b_u)


def prepare_topology(mask):
    """Precompute (once per topology) the exact f32 inverse masked degrees, stacked
    [clauses; variables] so a single [C+V,1] column feeds the kernel."""
    m = mask.astype(jnp.float32)
    deg_c = jnp.maximum(jnp.sum(m, axis=1, keepdims=True), 1.0)     # [C,1] (guard isolated nodes)
    deg_v = jnp.maximum(jnp.sum(m, axis=0, keepdims=True).T, 1.0)   # [V,1]
    inv_deg = jnp.concatenate([1.0 / deg_c, 1.0 / deg_v], axis=0)   # [C+V, 1] f32
    return m, inv_deg


def prepare_params(params, c_dim, v_dim, u_dim, e_dim, emb):
    """Split / fuse the Linear weights once; bf16 MXU operands, f32 biases."""
    bf16 = jnp.bfloat16
    W_vc, W_cv = params["W_vc"], params["W_cv"]
    W_c, W_v, W_u = params["W_c"], params["W_v"], params["W_u"]

    zrow = jnp.zeros((1, emb), jnp.float32)   # inert row so the in-lane mask column adds nothing
    kp = dict(
        wvce=jnp.concatenate([zrow, W_vc[:e_dim]], axis=0).astype(bf16),   # [1+e, E]
        wcve=jnp.concatenate([zrow, W_cv[:e_dim]], axis=0).astype(bf16),
        # fused source-embedding projection: one [E,2E] MXU push for both message layers
        wsrc=jnp.concatenate([W_vc[e_dim:], W_cv[e_dim:]], axis=1).astype(bf16),
        bvc=params["b_vc"], bcv=params["b_cv"],
    )
    # c_update cat order: [clause_feats, h, ctx, emb] ; v_update: [var_feats, h, ctx, emb]
    W_c_f, W_c_h = W_c[:c_dim], W_c[c_dim:c_dim + emb]
    W_c_ctx, W_c_e = W_c[c_dim + emb:c_dim + 2 * emb], W_c[c_dim + 2 * emb:]
    W_v_f, W_v_h = W_v[:v_dim], W_v[v_dim:v_dim + emb]
    W_v_ctx, W_v_e = W_v[v_dim + emb:v_dim + 2 * emb], W_v[v_dim + 2 * emb:]
    kp.update(
        wcfe=jnp.concatenate([W_c_f, W_c_e], axis=0).astype(bf16),   # fused [feat | emb]
        wvfe=jnp.concatenate([W_v_f, W_v_e], axis=0).astype(bf16),
        wh=jnp.concatenate([W_c_h, W_v_h], axis=1).astype(bf16),     # [E, 2E]
        wctx=jnp.concatenate([W_c_ctx, W_v_ctx], axis=1).astype(bf16),
        bc=params["b_c"], bv=params["b_v"],
    )
    # u_update cat order: [ctx_feats, c_agg, v_agg, emb]
    W_u_f, W_u_c = W_u[:u_dim], W_u[u_dim:u_dim + emb]
    W_u_v, W_u_e = W_u[u_dim + emb:u_dim + 2 * emb], W_u[u_dim + 2 * emb:]
    kp.update(
        wufe=jnp.concatenate([W_u_f, W_u_e], axis=0).astype(bf16),
        wucv=jnp.concatenate([W_u_c, W_u_v], axis=0).astype(bf16),   # [2E, E]: exact K-fusion
        bu=params["b_u"],
    )
    return kp


def message_gnn_forward(kp, mask, inv_deg, edge_sat_assigns, edge_sat_contains,
                        c_feat, v_feat, u_feat, c_emb, v_emb, u_emb):
    bf16 = jnp.bfloat16
    C, V, e_dim = edge_sat_assigns.shape
    emb = c_emb.shape[1]
    # keep in-kernel un-flattens ([CB*V,E] -> [CB,V,E]) and row-block stores tile aligned
    assert C % 8 == 0 and V % 8 == 0, "C and V must be multiples of 8 (f32 sublane tile)"

    # The binary mask rides as lane 0 of the already lane-padded edge tensors:
    # exact 0/1 in bf16, zero extra VMEM, no 128x-padded [C,V,1] weight tensor.
    ea = jnp.concatenate([mask.reshape(C * V, 1),
                          edge_sat_assigns.reshape(C * V, e_dim)], axis=1).astype(bf16)
    ec = jnp.concatenate([mask.T.reshape(V * C, 1),
                          edge_sat_contains.reshape(V * C, e_dim)], axis=1).astype(bf16)
    ccat = jnp.concatenate([c_feat, c_emb], axis=1).astype(bf16)
    vcat = jnp.concatenate([v_feat, v_emb], axis=1).astype(bf16)
    ucat = jnp.concatenate([u_feat, u_emb], axis=1).astype(bf16)
    vcemb = jnp.concatenate([v_emb, c_emb], axis=0).astype(bf16)     # variables first

    args = (inv_deg, ea, ec, ccat, vcat, ucat, vcemb, u_emb.astype(bf16),
            kp["wvce"], kp["wcve"], kp["wsrc"], kp["bvc"], kp["bcv"],
            kp["wcfe"], kp["wvfe"], kp["wh"], kp["wctx"], kp["bc"], kp["bv"],
            kp["wufe"], kp["wucv"], kp["bu"])

    out_shape = [jax.ShapeDtypeStruct((C, emb), jnp.float32),
                 jax.ShapeDtypeStruct((V, emb), jnp.float32),
                 jax.ShapeDtypeStruct((1, emb), jnp.float32)]

    # whole problem fits VMEM -> grid=() with full-array blocks resident in VMEM
    in_specs = [pl.BlockSpec(memory_space=pltpu.MemorySpace.VMEM) for _ in args]
    out_specs = [pl.BlockSpec(memory_space=pltpu.MemorySpace.VMEM) for _ in out_shape]

    return pl.pallas_call(
        message_gnn_kernel,
        out_shape=out_shape,
        in_specs=in_specs,
        out_specs=out_specs,
        scratch_shapes=[pltpu.VMEM((C + V, emb), jnp.float32)],
        compiler_params=pltpu.CompilerParams(vmem_limit_bytes=32 * 1024 * 1024),
    )(*args)


def reference_forward(params, mask, edge_sat_assigns, edge_sat_contains,
                      c_feat, v_feat, u_feat, c_emb, v_emb, u_emb):
    """Pure-JAX f32 mirror of the PyTorch/DGL forward (torch.cat + Linear + LeakyReLU(0.1))."""
    leaky = lambda x: jnp.where(x >= 0, x, 0.1 * x)
    C, V = mask.shape
    emb = c_emb.shape[1]

    ctx_c = jnp.broadcast_to(u_emb, (C, emb))
    ctx_v = jnp.broadcast_to(u_emb, (V, emb))

    src_a = jnp.broadcast_to(v_emb[None, :, :], (C, V, emb))
    m_a = leaky(jnp.concatenate([edge_sat_assigns, src_a], -1) @ params["W_vc"] + params["b_vc"])
    deg_c = jnp.maximum(mask.sum(1, keepdims=True), 1.0)
    h_c = (m_a * mask[:, :, None]).sum(1) / deg_c

    src_b = jnp.broadcast_to(c_emb[None, :, :], (V, C, emb))
    m_b = leaky(jnp.concatenate([edge_sat_contains, src_b], -1) @ params["W_cv"] + params["b_cv"])
    mask_t = mask.T
    deg_v = jnp.maximum(mask_t.sum(1, keepdims=True), 1.0)
    h_v = (m_b * mask_t[:, :, None]).sum(1) / deg_v

    c_new = leaky(jnp.concatenate([c_feat, h_c, ctx_c, c_emb], 1) @ params["W_c"] + params["b_c"])
    v_new = leaky(jnp.concatenate([v_feat, h_v, ctx_v, v_emb], 1) @ params["W_v"] + params["b_v"])

    c_agg = c_new.mean(0, keepdims=True)
    v_agg = v_new.mean(0, keepdims=True)
    u_new = leaky(jnp.concatenate([u_feat, c_agg, v_agg, u_emb], 1) @ params["W_u"] + params["b_u"])
    return c_new, v_new, u_new


if __name__ == "__main__":
    # emb_dim = 128 -> lane-dense matmuls and stores; C, V multiples of 8.
    EMB, C, V = 128, 16, 24
    C_FEATS, V_FEATS, U_FEATS, E_FEATS = 6, 5, 4, 8

    key = jax.random.PRNGKey(0)
    keys = jax.random.split(key, 9)

    params = init_params(keys[0], EMB, C_FEATS, V_FEATS, U_FEATS, E_FEATS)

    # deterministic bipartite adjacency; every clause / variable has degree >= 1
    cc = jnp.arange(C)[:, None]
    vv = jnp.arange(V)[None, :]
    mask = ((cc + 2 * vv) % 3 != 0).astype(jnp.float32)          # [C, V]

    edge_sat_assigns = jax.random.normal(keys[1], (C, V, E_FEATS), jnp.float32)
    edge_sat_contains = jax.random.normal(keys[2], (V, C, E_FEATS), jnp.float32)
    c_feat = jax.random.normal(keys[3], (C, C_FEATS), jnp.float32)
    v_feat = jax.random.normal(keys[4], (V, V_FEATS), jnp.float32)
    u_feat = jax.random.normal(keys[5], (1, U_FEATS), jnp.float32)
    c_emb = jax.random.normal(keys[6], (C, EMB), jnp.float32)
    v_emb = jax.random.normal(keys[7], (V, EMB), jnp.float32)
    u_emb = jax.random.normal(keys[8], (1, EMB), jnp.float32)

    # topology / parameter prep done ONCE (outside the per-round forward)
    mask_f32, inv_deg = prepare_topology(mask)
    kparams = prepare_params(params, C_FEATS, V_FEATS, U_FEATS, E_FEATS, EMB)

    fwd = jax.jit(message_gnn_forward)
    outs = fwd(kparams, mask_f32, inv_deg, edge_sat_assigns, edge_sat_contains,
               c_feat, v_feat, u_feat, c_emb, v_emb, u_emb)
    outs = jax.block_until_ready(outs)

    refs = reference_forward(params, mask, edge_sat_assigns, edge_sat_contains,
                             c_feat, v_feat, u_feat, c_emb, v_emb, u_emb)
    # bf16 MXU operands with f32 accumulation -> keep the (already loose) tolerance
    for got, want in zip(outs, refs):
        np.testing.assert_allclose(np.asarray(got), np.asarray(want), rtol=2e-2, atol=3e-2)

    print("KERNEL_OK")
</pallas_src>

<mosaic_0001>
module attributes {stable_mosaic.version = 11 : i64} {
  func.func @message_gnn_kernel(%arg0: memref<40x1xf32, #tpu.memory_space<vmem>>, %arg1: memref<384x9xbf16, #tpu.memory_space<vmem>>, %arg2: memref<384x9xbf16, #tpu.memory_space<vmem>>, %arg3: memref<16x134xbf16, #tpu.memory_space<vmem>>, %arg4: memref<24x133xbf16, #tpu.memory_space<vmem>>, %arg5: memref<1x132xbf16, #tpu.memory_space<vmem>>, %arg6: memref<40x128xbf16, #tpu.memory_space<vmem>>, %arg7: memref<1x128xbf16, #tpu.memory_space<vmem>>, %arg8: memref<9x128xbf16, #tpu.memory_space<vmem>>, %arg9: memref<9x128xbf16, #tpu.memory_space<vmem>>, %arg10: memref<128x256xbf16, #tpu.memory_space<vmem>>, %arg11: memref<1x128xf32, #tpu.memory_space<vmem>>, %arg12: memref<1x128xf32, #tpu.memory_space<vmem>>, %arg13: memref<134x128xbf16, #tpu.memory_space<vmem>>, %arg14: memref<133x128xbf16, #tpu.memory_space<vmem>>, %arg15: memref<128x256xbf16, #tpu.memory_space<vmem>>, %arg16: memref<128x256xbf16, #tpu.memory_space<vmem>>, %arg17: memref<1x128xf32, #tpu.memory_space<vmem>>, %arg18: memref<1x128xf32, #tpu.memory_space<vmem>>, %arg19: memref<132x128xbf16, #tpu.memory_space<vmem>>, %arg20: memref<256x128xbf16, #tpu.memory_space<vmem>>, %arg21: memref<1x128xf32, #tpu.memory_space<vmem>>, %arg22: memref<16x128xf32, #tpu.memory_space<vmem>>, %arg23: memref<24x128xf32, #tpu.memory_space<vmem>>, %arg24: memref<1x128xf32, #tpu.memory_space<vmem>>, %arg25: memref<40x128xf32, #tpu.memory_space<vmem>>) attributes {dimension_semantics = [], scalar_prefetch = 0 : i64, scratch_operands = 1 : i64, tpu.core_type = #tpu.core_type<tc>} {
    %c0 = arith.constant 0 : index
    %c0_0 = arith.constant 0 : index
    %0 = vector.load %arg6[%c0, %c0_0] : memref<40x128xbf16, #tpu.memory_space<vmem>>, vector<40x128xbf16>
    %c0_1 = arith.constant 0 : index
    %c0_2 = arith.constant 0 : index
    %1 = vector.load %arg10[%c0_1, %c0_2] : memref<128x256xbf16, #tpu.memory_space<vmem>>, vector<128x256xbf16>
    %cst = arith.constant dense<0.000000e+00> : vector<40x256xf32>
    %2 = tpu.matmul %0, %1, %cst {dimension_numbers = #tpu.dot_dimension_numbers<[1], [0], [0], [1], [0, 0, 1, 1], [], []>} : vector<40x128xbf16>, vector<128x256xbf16>, vector<40x256xf32> -> vector<40x256xf32>
    %3 = vector.extract_strided_slice %2 {offsets = [0, 0], sizes = [24, 128], strides = [1, 1]} : vector<40x256xf32> to vector<24x128xf32>
    %c0_3 = arith.constant 0 : index
    %c0_4 = arith.constant 0 : index
    %4 = vector.load %arg11[%c0_3, %c0_4] : memref<1x128xf32, #tpu.memory_space<vmem>>, vector<1x128xf32>
    %5 = vector.broadcast %4 : vector<1x128xf32> to vector<24x128xf32>
    %6 = arith.addf %3, %5 : vector<24x128xf32>
    %7 = vector.extract_strided_slice %2 {offsets = [24, 128], sizes = [16, 128], strides = [1, 1]} : vector<40x256xf32> to vector<16x128xf32>
    %c0_5 = arith.constant 0 : index
    %c0_6 = arith.constant 0 : index
    %8 = vector.load %arg12[%c0_5, %c0_6] : memref<1x128xf32, #tpu.memory_space<vmem>>, vector<1x128xf32>
    %9 = vector.broadcast %8 : vector<1x128xf32> to vector<16x128xf32>
    %10 = arith.addf %7, %9 : vector<16x128xf32>
    %c0_7 = arith.constant 0 : index
    %c0_8 = arith.constant 0 : index
    %11 = vector.load %arg1[%c0_7, %c0_8] : memref<384x9xbf16, #tpu.memory_space<vmem>>, vector<192x9xbf16>
    %c0_9 = arith.constant 0 : index
    %c0_10 = arith.constant 0 : index
    %12 = vector.load %arg8[%c0_9, %c0_10] : memref<9x128xbf16, #tpu.memory_space<vmem>>, vector<9x128xbf16>
    %cst_11 = arith.constant dense<0.000000e+00> : vector<192x128xf32>
    %13 = tpu.matmul %11, %12, %cst_11 {dimension_numbers = #tpu.dot_dimension_numbers<[1], [0], [0], [1], [0, 0, 1, 1], [], []>} : vector<192x9xbf16>, vector<9x128xbf16>, vector<192x128xf32> -> vector<192x128xf32>
    %14 = vector.shape_cast %13 : vector<192x128xf32> to vector<8x24x128xf32>
    %15 = vector.shape_cast %6 : vector<24x128xf32> to vector<1x24x128xf32>
    %16 = vector.broadcast %15 : vector<1x24x128xf32> to vector<8x24x128xf32>
    %17 = arith.addf %14, %16 : vector<8x24x128xf32>
    %cst_12 = arith.constant 1.000000e-01 : f32
    %18 = vector.broadcast %cst_12 : f32 to vector<8x24x128xf32>
    %19 = arith.mulf %18, %17 : vector<8x24x128xf32>
    %20 = arith.maximumf %17, %19 : vector<8x24x128xf32>
    %21 = vector.shape_cast %20 : vector<8x24x128xf32> to vector<192x128xf32>
    %22 = vector.extract_strided_slice %11 {offsets = [0, 0], sizes = [192, 1], strides = [1, 1]} : vector<192x9xbf16> to vector<192x1xbf16>
    %23 = arith.extf %22 : vector<192x1xbf16> to vector<192x1xf32>
    %24 = vector.broadcast %23 : vector<192x1xf32> to vector<192x128xf32>
    %25 = arith.mulf %21, %24 : vector<192x128xf32>
    %26 = vector.shape_cast %25 : vector<192x128xf32> to vector<8x24x128xf32>
    %cst_13 = arith.constant dense<0.000000e+00> : vector<8x128xf32>
    %27 = vector.multi_reduction <add>, %26, %cst_13 [1] : vector<8x24x128xf32> to vector<8x128xf32>
    %c0_14 = arith.constant 0 : index
    %c0_15 = arith.constant 0 : index
    %28 = vector.load %arg0[%c0_14, %c0_15] : memref<40x1xf32, #tpu.memory_space<vmem>>, vector<8x1xf32>
    %29 = vector.broadcast %28 : vector<8x1xf32> to vector<8x128xf32>
    %30 = arith.mulf %27, %29 : vector<8x128xf32>
    %c0_16 = arith.constant 0 : index
    %c0_17 = arith.constant 0 : index
    %31 = vector.load %arg25[%c0_16, %c0_17] : memref<40x128xf32, #tpu.memory_space<vmem>>, vector<8x128xf32>
    tpu.vector_store %arg25[%c0_16, %c0_17], %30 {strides = array<i32>} : memref<40x128xf32, #tpu.memory_space<vmem>>, vector<8x128xf32>,
    %c192 = arith.constant 192 : index
    %c0_18 = arith.constant 0 : index
    %32 = vector.load %arg1[%c192, %c0_18] : memref<384x9xbf16, #tpu.memory_space<vmem>>, vector<192x9xbf16>
    %c0_19 = arith.constant 0 : index
    %c0_20 = arith.constant 0 : index
    %33 = vector.load %arg8[%c0_19, %c0_20] : memref<9x128xbf16, #tpu.memory_space<vmem>>, vector<9x128xbf16>
    %cst_21 = arith.constant dense<0.000000e+00> : vector<192x128xf32>
    %34 = tpu.matmul %32, %33, %cst_21 {dimension_numbers = #tpu.dot_dimension_numbers<[1], [0], [0], [1], [0, 0, 1, 1], [], []>} : vector<192x9xbf16>, vector<9x128xbf16>, vector<192x128xf32> -> vector<192x128xf32>
    %35 = vector.shape_cast %34 : vector<192x128xf32> to vector<8x24x128xf32>
    %36 = vector.shape_cast %6 : vector<24x128xf32> to vector<1x24x128xf32>
    %37 = vector.broadcast %36 : vector<1x24x128xf32> to vector<8x24x128xf32>
    %38 = arith.addf %35, %37 : vector<8x24x128xf32>
    %cst_22 = arith.constant 1.000000e-01 : f32
    %39 = vector.broadcast %cst_22 : f32 to vector<8x24x128xf32>
    %40 = arith.mulf %39, %38 : vector<8x24x128xf32>
    %41 = arith.maximumf %38, %40 : vector<8x24x128xf32>
    %42 = vector.shape_cast %41 : vector<8x24x128xf32> to vector<192x128xf32>
    %43 = vector.extract_strided_slice %32 {offsets = [0, 0], sizes = [192, 1], strides = [1, 1]} : vector<192x9xbf16> to vector<192x1xbf16>
    %44 = arith.extf %43 : vector<192x1xbf16> to vector<192x1xf32>
    %45 = vector.broadcast %44 : vector<192x1xf32> to vector<192x128xf32>
    %46 = arith.mulf %42, %45 : vector<192x128xf32>
    %47 = vector.shape_cast %46 : vector<192x128xf32> to vector<8x24x128xf32>
    %cst_23 = arith.constant dense<0.000000e+00> : vector<8x128xf32>
    %48 = vector.multi_reduction <add>, %47, %cst_23 [1] : vector<8x24x128xf32> to vector<8x128xf32>
    %c8 = arith.constant 8 : index
    %c0_24 = arith.constant 0 : index
    %49 = vector.load %arg0[%c8, %c0_24] : memref<40x1xf32, #tpu.memory_space<vmem>>, vector<8x1xf32>
    %50 = vector.broadcast %49 : vector<8x1xf32> to vector<8x128xf32>
    %51 = arith.mulf %48, %50 : vector<8x128xf32>
    %c8_25 = arith.constant 8 : index
    %c0_26 = arith.constant 0 : index
    %52 = vector.load %arg25[%c8_25, %c0_26] : memref<40x128xf32, #tpu.memory_space<vmem>>, vector<8x128xf32>
    tpu.vector_store %arg25[%c8_25, %c0_26], %51 {strides = array<i32>} : memref<40x128xf32, #tpu.memory_space<vmem>>, vector<8x128xf32>,
    %c0_27 = arith.constant 0 : index
    %c0_28 = arith.constant 0 : index
    %53 = vector.load %arg2[%c0_27, %c0_28] : memref<384x9xbf16, #tpu.memory_space<vmem>>, vector<128x9xbf16>
    %c0_29 = arith.constant 0 : index
    %c0_30 = arith.constant 0 : index
    %54 = vector.load %arg9[%c0_29, %c0_30] : memref<9x128xbf16, #tpu.memory_space<vmem>>, vector<9x128xbf16>
    %cst_31 = arith.constant dense<0.000000e+00> : vector<128x128xf32>
    %55 = tpu.matmul %53, %54, %cst_31 {dimension_numbers = #tpu.dot_dimension_numbers<[1], [0], [0], [1], [0, 0, 1, 1], [], []>} : vector<128x9xbf16>, vector<9x128xbf16>, vector<128x128xf32> -> vector<128x128xf32>
    %56 = vector.shape_cast %55 : vector<128x128xf32> to vector<8x16x128xf32>
    %57 = vector.shape_cast %10 : vector<16x128xf32> to vector<1x16x128xf32>
    %58 = vector.broadcast %57 : vector<1x16x128xf32> to vector<8x16x128xf32>
    %59 = arith.addf %56, %58 : vector<8x16x128xf32>
    %cst_32 = arith.constant 1.000000e-01 : f32
    %60 = vector.broadcast %cst_32 : f32 to vector<8x16x128xf32>
    %61 = arith.mulf %60, %59 : vector<8x16x128xf32>
    %62 = arith.maximumf %59, %61 : vector<8x16x128xf32>
    %63 = vector.shape_cast %62 : vector<8x16x128xf32> to vector<128x128xf32>
    %64 = vector.extract_strided_slice %53 {offsets = [0, 0], sizes = [128, 1], strides = [1, 1]} : vector<128x9xbf16> to vector<128x1xbf16>
    %65 = arith.extf %64 : vector<128x1xbf16> to vector<128x1xf32>
    %66 = vector.broadcast %65 : vector<128x1xf32> to vector<128x128xf32>
    %67 = arith.mulf %63, %66 : vector<128x128xf32>
    %68 = vector.shape_cast %67 : vector<128x128xf32> to vector<8x16x128xf32>
    %cst_33 = arith.constant dense<0.000000e+00> : vector<8x128xf32>
    %69 = vector.multi_reduction <add>, %68, %cst_33 [1] : vector<8x16x128xf32> to vector<8x128xf32>
    %c16 = arith.constant 16 : index
    %c0_34 = arith.constant 0 : index
    %70 = vector.load %arg0[%c16, %c0_34] : memref<40x1xf32, #tpu.memory_space<vmem>>, vector<8x1xf32>
    %71 = vector.broadcast %70 : vector<8x1xf32> to vector<8x128xf32>
    %72 = arith.mulf %69, %71 : vector<8x128xf32>
    %c16_35 = arith.constant 16 : index
    %c0_36 = arith.constant 0 : index
    %73 = vector.load %arg25[%c16_35, %c0_36] : memref<40x128xf32, #tpu.memory_space<vmem>>, vector<8x128xf32>
    tpu.vector_store %arg25[%c16_35, %c0_36], %72 {strides = array<i32>} : memref<40x128xf32, #tpu.memory_space<vmem>>, vector<8x128xf32>,
    %c128 = arith.constant 128 : index
    %c0_37 = arith.constant 0 : index
    %74 = vector.load %arg2[%c128, %c0_37] : memref<384x9xbf16, #tpu.memory_space<vmem>>, vector<128x9xbf16>
    %c0_38 = arith.constant 0 : index
    %c0_39 = arith.constant 0 : index
    %75 = vector.load %arg9[%c0_38, %c0_39] : memref<9x128xbf16, #tpu.memory_space<vmem>>, vector<9x128xbf16>
    %cst_40 = arith.constant dense<0.000000e+00> : vector<128x128xf32>
    %76 = tpu.matmul %74, %75, %cst_40 {dimension_numbers = #tpu.dot_dimension_numbers<[1], [0], [0], [1], [0, 0, 1, 1], [], []>} : vector<128x9xbf16>, vector<9x128xbf16>, vector<128x128xf32> -> vector<128x128xf32>
    %77 = vector.shape_cast %76 : vector<128x128xf32> to vector<8x16x128xf32>
    %78 = vector.shape_cast %10 : vector<16x128xf32> to vector<1x16x128xf32>
    %79 = vector.broadcast %78 : vector<1x16x128xf32> to vector<8x16x128xf32>
    %80 = arith.addf %77, %79 : vector<8x16x128xf32>
    %cst_41 = arith.constant 1.000000e-01 : f32
    %81 = vector.broadcast %cst_41 : f32 to vector<8x16x128xf32>
    %82 = arith.mulf %81, %80 : vector<8x16x128xf32>
    %83 = arith.maximumf %80, %82 : vector<8x16x128xf32>
    %84 = vector.shape_cast %83 : vector<8x16x128xf32> to vector<128x128xf32>
    %85 = vector.extract_strided_slice %74 {offsets = [0, 0], sizes = [128, 1], strides = [1, 1]} : vector<128x9xbf16> to vector<128x1xbf16>
    %86 = arith.extf %85 : vector<128x1xbf16> to vector<128x1xf32>
    %87 = vector.broadcast %86 : vector<128x1xf32> to vector<128x128xf32>
    %88 = arith.mulf %84, %87 : vector<128x128xf32>
    %89 = vector.shape_cast %88 : vector<128x128xf32> to vector<8x16x128xf32>
    %cst_42 = arith.constant dense<0.000000e+00> : vector<8x128xf32>
    %90 = vector.multi_reduction <add>, %89, %cst_42 [1] : vector<8x16x128xf32> to vector<8x128xf32>
    %c24 = arith.constant 24 : index
    %c0_43 = arith.constant 0 : index
    %91 = vector.load %arg0[%c24, %c0_43] : memref<40x1xf32, #tpu.memory_space<vmem>>, vector<8x1xf32>
    %92 = vector.broadcast %91 : vector<8x1xf32> to vector<8x128xf32>
    %93 = arith.mulf %90, %92 : vector<8x128xf32>
    %c24_44 = arith.constant 24 : index
    %c0_45 = arith.constant 0 : index
    %94 = vector.load %arg25[%c24_44, %c0_45] : memref<40x128xf32, #tpu.memory_space<vmem>>, vector<8x128xf32>
    tpu.vector_store %arg25[%c24_44, %c0_45], %93 {strides = array<i32>} : memref<40x128xf32, #tpu.memory_space<vmem>>, vector<8x128xf32>,
    %c256 = arith.constant 256 : index
    %c0_46 = arith.constant 0 : index
    %95 = vector.load %arg2[%c256, %c0_46] : memref<384x9xbf16, #tpu.memory_space<vmem>>, vector<128x9xbf16>
    %c0_47 = arith.constant 0 : index
    %c0_48 = arith.constant 0 : index
    %96 = vector.load %arg9[%c0_47, %c0_48] : memref<9x128xbf16, #tpu.memory_space<vmem>>, vector<9x128xbf16>
    %cst_49 = arith.constant dense<0.000000e+00> : vector<128x128xf32>
    %97 = tpu.matmul %95, %96, %cst_49 {dimension_numbers = #tpu.dot_dimension_numbers<[1], [0], [0], [1], [0, 0, 1, 1], [], []>} : vector<128x9xbf16>, vector<9x128xbf16>, vector<128x128xf32> -> vector<128x128xf32>
    %98 = vector.shape_cast %97 : vector<128x128xf32> to vector<8x16x128xf32>
    %99 = vector.shape_cast %10 : vector<16x128xf32> to vector<1x16x128xf32>
    %100 = vector.broadcast %99 : vector<1x16x128xf32> to vector<8x16x128xf32>
    %101 = arith.addf %98, %100 : vector<8x16x128xf32>
    %cst_50 = arith.constant 1.000000e-01 : f32
    %102 = vector.broadcast %cst_50 : f32 to vector<8x16x128xf32>
    %103 = arith.mulf %102, %101 : vector<8x16x128xf32>
    %104 = arith.maximumf %101, %103 : vector<8x16x128xf32>
    %105 = vector.shape_cast %104 : vector<8x16x128xf32> to vector<128x128xf32>
    %106 = vector.extract_strided_slice %95 {offsets = [0, 0], sizes = [128, 1], strides = [1, 1]} : vector<128x9xbf16> to vector<128x1xbf16>
    %107 = arith.extf %106 : vector<128x1xbf16> to vector<128x1xf32>
    %108 = vector.broadcast %107 : vector<128x1xf32> to vector<128x128xf32>
    %109 = arith.mulf %105, %108 : vector<128x128xf32>
    %110 = vector.shape_cast %109 : vector<128x128xf32> to vector<8x16x128xf32>
    %cst_51 = arith.constant dense<0.000000e+00> : vector<8x128xf32>
    %111 = vector.multi_reduction <add>, %110, %cst_51 [1] : vector<8x16x128xf32> to vector<8x128xf32>
    %c32 = arith.constant 32 : index
    %c0_52 = arith.constant 0 : index
    %112 = vector.load %arg0[%c32, %c0_52] : memref<40x1xf32, #tpu.memory_space<vmem>>, vector<8x1xf32>
    %113 = vector.broadcast %112 : vector<8x1xf32> to vector<8x128xf32>
    %114 = arith.mulf %111, %113 : vector<8x128xf32>
    %c32_53 = arith.constant 32 : index
    %c0_54 = arith.constant 0 : index
    %115 = vector.load %arg25[%c32_53, %c0_54] : memref<40x128xf32, #tpu.memory_space<vmem>>, vector<8x128xf32>
    tpu.vector_store %arg25[%c32_53, %c0_54], %114 {strides = array<i32>} : memref<40x128xf32, #tpu.memory_space<vmem>>, vector<8x128xf32>,
    %c0_55 = arith.constant 0 : index
    %c0_56 = arith.constant 0 : index
    %116 = vector.load %arg7[%c0_55, %c0_56] : memref<1x128xbf16, #tpu.memory_space<vmem>>, vector<1x128xbf16>
    %c0_57 = arith.constant 0 : index
    %c0_58 = arith.constant 0 : index
    %117 = vector.load %arg16[%c0_57, %c0_58] : memref<128x256xbf16, #tpu.memory_space<vmem>>, vector<128x256xbf16>
    %cst_59 = arith.constant dense<0.000000e+00> : vector<1x256xf32>
    %118 = tpu.matmul %116, %117, %cst_59 {dimension_numbers = #tpu.dot_dimension_numbers<[1], [0], [0], [1], [0, 0, 1, 1], [], []>} : vector<1x128xbf16>, vector<128x256xbf16>, vector<1x256xf32> -> vector<1x256xf32>
    %c0_60 = arith.constant 0 : index
    %c0_61 = arith.constant 0 : index
    %119 = vector.load %arg25[%c0_60, %c0_61] : memref<40x128xf32, #tpu.memory_space<vmem>>, vector<40x128xf32>
    %120 = arith.truncf %119 : vector<40x128xf32> to vector<40x128xbf16>
    %c0_62 = arith.constant 0 : index
    %c0_63 = arith.constant 0 : index
    %121 = vector.load %arg15[%c0_62, %c0_63] : memref<128x256xbf16, #tpu.memory_space<vmem>>, vector<128x256xbf16>
    %cst_64 = arith.constant dense<0.000000e+00> : vector<40x256xf32>
    %122 = tpu.matmul %120, %121, %cst_64 {dimension_numbers = #tpu.dot_dimension_numbers<[1], [0], [0], [1], [0, 0, 1, 1], [], []>} : vector<40x128xbf16>, vector<128x256xbf16>, vector<40x256xf32> -> vector<40x256xf32>
    %c0_65 = arith.constant 0 : index
    %c0_66 = arith.constant 0 : index
    %123 = vector.load %arg3[%c0_65, %c0_66] : memref<16x134xbf16, #tpu.memory_space<vmem>>, vector<16x134xbf16>
    %c0_67 = arith.constant 0 : index
    %c0_68 = arith.constant 0 : index
    %124 = vector.load %arg13[%c0_67, %c0_68] : memref<134x128xbf16, #tpu.memory_space<vmem>>, vector<134x128xbf16>
    %cst_69 = arith.constant dense<0.000000e+00> : vector<16x128xf32>
    %125 = tpu.matmul %123, %124, %cst_69 {dimension_numbers = #tpu.dot_dimension_numbers<[1], [0], [0], [1], [0, 0, 1, 1], [], []>} : vector<16x134xbf16>, vector<134x128xbf16>, vector<16x128xf32> -> vector<16x128xf32>
    %126 = vector.extract_strided_slice %122 {offsets = [0, 0], sizes = [16, 128], strides = [1, 1]} : vector<40x256xf32> to vector<16x128xf32>
    %127 = arith.addf %125, %126 : vector<16x128xf32>
    %128 = vector.extract_strided_slice %118 {offsets = [0, 0], sizes = [1, 128], strides = [1, 1]} : vector<1x256xf32> to vector<1x128xf32>
    %129 = vector.broadcast %128 : vector<1x128xf32> to vector<16x128xf32>
    %130 = arith.addf %127, %129 : vector<16x128xf32>
    %c0_70 = arith.constant 0 : index
    %c0_71 = arith.constant 0 : index
    %131 = vector.load %arg17[%c0_70, %c0_71] : memref<1x128xf32, #tpu.memory_space<vmem>>, vector<1x128xf32>
    %132 = vector.broadcast %131 : vector<1x128xf32> to vector<16x128xf32>
    %133 = arith.addf %130, %132 : vector<16x128xf32>
    %cst_72 = arith.constant 1.000000e-01 : f32
    %134 = vector.broadcast %cst_72 : f32 to vector<16x128xf32>
    %135 = arith.mulf %134, %133 : vector<16x128xf32>
    %136 = arith.maximumf %133, %135 : vector<16x128xf32>
    %c0_73 = arith.constant 0 : index
    %c0_74 = arith.constant 0 : index
    %137 = vector.load %arg4[%c0_73, %c0_74] : memref<24x133xbf16, #tpu.memory_space<vmem>>, vector<24x133xbf16>
    %c0_75 = arith.constant 0 : index
    %c0_76 = arith.constant 0 : index
    %138 = vector.load %arg14[%c0_75, %c0_76] : memref<133x128xbf16, #tpu.memory_space<vmem>>, vector<133x128xbf16>
    %cst_77 = arith.constant dense<0.000000e+00> : vector<24x128xf32>
    %139 = tpu.matmul %137, %138, %cst_77 {dimension_numbers = #tpu.dot_dimension_numbers<[1], [0], [0], [1], [0, 0, 1, 1], [], []>} : vector<24x133xbf16>, vector<133x128xbf16>, vector<24x128xf32> -> vector<24x128xf32>
    %140 = vector.extract_strided_slice %122 {offsets = [16, 128], sizes = [24, 128], strides = [1, 1]} : vector<40x256xf32> to vector<24x128xf32>
    %141 = arith.addf %139, %140 : vector<24x128xf32>
    %142 = vector.extract_strided_slice %118 {offsets = [0, 128], sizes = [1, 128], strides = [1, 1]} : vector<1x256xf32> to vector<1x128xf32>
    %143 = vector.broadcast %142 : vector<1x128xf32> to vector<24x128xf32>
    %144 = arith.addf %141, %143 : vector<24x128xf32>
    %c0_78 = arith.constant 0 : index
    %c0_79 = arith.constant 0 : index
    %145 = vector.load %arg18[%c0_78, %c0_79] : memref<1x128xf32, #tpu.memory_space<vmem>>, vector<1x128xf32>
    %146 = vector.broadcast %145 : vector<1x128xf32> to vector<24x128xf32>
    %147 = arith.addf %144, %146 : vector<24x128xf32>
    %cst_80 = arith.constant 1.000000e-01 : f32
    %148 = vector.broadcast %cst_80 : f32 to vector<24x128xf32>
    %149 = arith.mulf %148, %147 : vector<24x128xf32>
    %150 = arith.maximumf %147, %149 : vector<24x128xf32>
    %cst_81 = arith.constant dense<0.000000e+00> : vector<128xf32>
    %151 = vector.multi_reduction <add>, %136, %cst_81 [0] : vector<16x128xf32> to vector<128xf32>
    %152 = vector.shape_cast %151 : vector<128xf32> to vector<1x128xf32>
    %cst_82 = arith.constant 1.600000e+01 : f32
    %153 = vector.broadcast %cst_82 : f32 to vector<1x128xf32>
    %154 = arith.divf %152, %153 : vector<1x128xf32>
    %cst_83 = arith.constant dense<0.000000e+00> : vector<128xf32>
    %155 = vector.multi_reduction <add>, %150, %cst_83 [0] : vector<24x128xf32> to vector<128xf32>
    %156 = vector.shape_cast %155 : vector<128xf32> to vector<1x128xf32>
    %cst_84 = arith.constant 2.400000e+01 : f32
    %157 = vector.broadcast %cst_84 : f32 to vector<1x128xf32>
    %158 = arith.divf %156, %157 : vector<1x128xf32>
    %159 = tpu.concatenate %154, %158 in 1 : vector<1x128xf32>, vector<1x128xf32> -> vector<1x256xf32>
    %160 = arith.truncf %159 : vector<1x256xf32> to vector<1x256xbf16>
    %c0_85 = arith.constant 0 : index
    %c0_86 = arith.constant 0 : index
    %161 = vector.load %arg5[%c0_85, %c0_86] : memref<1x132xbf16, #tpu.memory_space<vmem>>, vector<1x132xbf16>
    %c0_87 = arith.constant 0 : index
    %c0_88 = arith.constant 0 : index
    %162 = vector.load %arg19[%c0_87, %c0_88] : memref<132x128xbf16, #tpu.memory_space<vmem>>, vector<132x128xbf16>
    %cst_89 = arith.constant dense<0.000000e+00> : vector<1x128xf32>
    %163 = tpu.matmul %161, %162, %cst_89 {dimension_numbers = #tpu.dot_dimension_numbers<[1], [0], [0], [1], [0, 0, 1, 1], [], []>} : vector<1x132xbf16>, vector<132x128xbf16>, vector<1x128xf32> -> vector<1x128xf32>
    %c0_90 = arith.constant 0 : index
    %c0_91 = arith.constant 0 : index
    %164 = vector.load %arg20[%c0_90, %c0_91] : memref<256x128xbf16, #tpu.memory_space<vmem>>, vector<256x128xbf16>
    %cst_92 = arith.constant dense<0.000000e+00> : vector<1x128xf32>
    %165 = tpu.matmul %160, %164, %cst_92 {dimension_numbers = #tpu.dot_dimension_numbers<[1], [0], [0], [1], [0, 0, 1, 1], [], []>} : vector<1x256xbf16>, vector<256x128xbf16>, vector<1x128xf32> -> vector<1x128xf32>
    %166 = arith.addf %163, %165 : vector<1x128xf32>
    %c0_93 = arith.constant 0 : index
    %c0_94 = arith.constant 0 : index
    %167 = vector.load %arg21[%c0_93, %c0_94] : memref<1x128xf32, #tpu.memory_space<vmem>>, vector<1x128xf32>
    %168 = arith.addf %166, %167 : vector<1x128xf32>
    %cst_95 = arith.constant 1.000000e-01 : f32
    %169 = vector.broadcast %cst_95 : f32 to vector<1x128xf32>
    %170 = arith.mulf %169, %168 : vector<1x128xf32>
    %171 = arith.maximumf %168, %170 : vector<1x128xf32>
    %c0_96 = arith.constant 0 : index
    %c0_97 = arith.constant 0 : index
    %172 = vector.load %arg22[%c0_96, %c0_97] : memref<16x128xf32, #tpu.memory_space<vmem>>, vector<16x128xf32>
    tpu.vector_store %arg22[%c0_96, %c0_97], %136 {strides = array<i32>} : memref<16x128xf32, #tpu.memory_space<vmem>>, vector<16x128xf32>,
    %c0_98 = arith.constant 0 : index
    %c0_99 = arith.constant 0 : index
    %173 = vector.load %arg23[%c0_98, %c0_99] : memref<24x128xf32, #tpu.memory_space<vmem>>, vector<24x128xf32>
    tpu.vector_store %arg23[%c0_98, %c0_99], %150 {strides = array<i32>} : memref<24x128xf32, #tpu.memory_space<vmem>>, vector<24x128xf32>,
    %c0_100 = arith.constant 0 : index
    %c0_101 = arith.constant 0 : index
    %174 = vector.load %arg24[%c0_100, %c0_101] : memref<1x128xf32, #tpu.memory_space<vmem>>, vector<1x128xf32>
    tpu.vector_store %arg24[%c0_100, %c0_101], %171 {strides = array<i32>} : memref<1x128xf32, #tpu.memory_space<vmem>>, vector<1x128xf32>,
    return
  }
}

</mosaic_0001>

<bundles_post_ra>
// kernel: message_gnn_forward.1
= control target key start
LH: loop header
LB: loop body
LE: loop exit
PB: predicated region body
PF: predicated region fallthrough
CT: control target
= control target key end

     0   :  { %s6814_s0 = inlined_call_operand.vmem [shape: f32[40,1], index: 0, kind: input, shape index: {}]   ;;  %s6815_s1 = inlined_call_operand.vmem [shape: bf16[384,9], index: 1, kind: input, shape index: {}]   ;;  %s6816_s2 = inlined_call_operand.vmem [shape: bf16[384,9], index: 2, kind: input, shape index: {}]   ;;  %s6817_s3 = inlined_call_operand.vmem [shape: bf16[16,134], index: 3, kind: input, shape index: {}]   ;;  %s6818_s4 = inlined_call_operand.vmem [shape: bf16[24,133], index: 4, kind: input, shape index: {}]   ;;  %s6819_s5 = inlined_call_operand.vmem [shape: bf16[1,132], index: 5, kind: input, shape index: {}]   ;;  %s6820_s6 = inlined_call_operand.vmem [shape: bf16[40,128], index: 6, kind: input, shape index: {}]   ;;  %s6821_s7 = inlined_call_operand.vmem [shape: bf16[1,128], index: 7, kind: input, shape index: {}]   ;;  %s6822_s8 = inlined_call_operand.vmem [shape: bf16[9,128], index: 8, kind: input, shape index: {}]   ;;  %s6823_s9 = inlined_call_operand.vmem [shape: bf16[9,128], index: 9, kind: input, shape index: {}]   ;;  %s6824_s10 = inlined_call_operand.vmem [shape: bf16[128,256], index: 10, kind: input, shape index: {}]   ;;  %s6825_s11 = inlined_call_operand.vmem [shape: f32[1,128], index: 11, kind: input, shape index: {}]   ;;  %s6826_s12 = inlined_call_operand.vmem [shape: f32[1,128], index: 12, kind: input, shape index: {}]   ;;  %s6827_s13 = inlined_call_operand.vmem [shape: bf16[134,128], index: 13, kind: input, shape index: {}]   ;;  %s6828_s14 = inlined_call_operand.vmem [shape: bf16[133,128], index: 14, kind: input, shape index: {}]   ;;  %s6829_s15 = inlined_call_operand.vmem [shape: bf16[128,256], index: 15, kind: input, shape index: {}]   ;;  %s6830_s16 = inlined_call_operand.vmem [shape: bf16[128,256], index: 16, kind: input, shape index: {}]   ;;  %s6831_s17 = inlined_call_operand.vmem [shape: f32[1,128], index: 17, kind: input, shape index: {}]   ;;  %s6832_s18 = inlined_call_operand.vmem [shape: f32[1,128], index: 18, kind: input, shape index: {}]   ;;  %s6833_s19 = inlined_call_operand.vmem [shape: bf16[132,128], index: 19, kind: input, shape index: {}]   ;;  %s6834_s20 = inlined_call_operand.vmem [shape: bf16[256,128], index: 20, kind: input, shape index: {}]   ;;  %s6835_s21 = inlined_call_operand.vmem [shape: f32[1,128], index: 21, kind: input, shape index: {}]   ;;  %s6836_s22 = inlined_call_operand.hbm [shape: f32[16,128], index: 22, kind: output, shape index: {0}]   ;;  %s6837_s23 = inlined_call_operand.hbm [shape: f32[24,128], index: 23, kind: output, shape index: {1}]   ;;  %s6838_s24 = inlined_call_operand.hbm [shape: f32[1,128], index: 24, kind: output, shape index: {2}]  }
   0x1   :  { %6924 = sst [smem:[#allocation66_spill]] %s6814_s0 }
   0x2   :  { %6925 = sst [smem:[#allocation67_spill]] %s6815_s1 }
   0x3   :  { %6926 = sst [smem:[#allocation68_spill]] %s6816_s2 }
   0x4   :  { %6927 = sst [smem:[#allocation69_spill]] %s6817_s3 }
   0x5   :  { %6928 = sst [smem:[#allocation70_spill]] %s6818_s4 }
   0x6   :  { %6929 = sst [smem:[#allocation71_spill]] %s6819_s5 }
   0x7   :  { %6930 = sst [smem:[#allocation72_spill]] %s6820_s6 }
   0x8   :  { %6931 = sst [smem:[#allocation73_spill]] %s6821_s7 }
   0x9   :  { %6932 = sst [smem:[#allocation74_spill]] %s6822_s8 }
   0xa   :  { %30 = vsyncpa [#allocation4], 0  ;;  %v4518_v0 = vld [vmem:[%s6824_s10 + $0x4] ss:$8 sps:$4 sm:$0xff]   ;;  %vm397_vm0 = vcmask 1043456   ;;  %vm398_vm1 = vcmask 1044480  }
   0xb   :  { %v4520_v1 = vld [vmem:[%s6824_s10] ss:$8 sps:$4 sm:$0xff]   ;;  %194 = vmatprep.subr.bf16.mxu0 %v4518_v0  ;;  %s6933_s29 = sld [smem:[#allocation74_spill]]  ;;  %vm360_vm2 = vcmask 72704   ;;  %v6846_v3 = vmov 65535   ;;  %s6934_s4 = sld [smem:[#allocation67_spill]] }
   0xc   :  { %195 = vmatpush1.bf16.msra.mxu0 %v4520_v1  ;;  %v399_v4 = vsel %vm397_vm0, 4294967295, %v6846_v3  ;;  %v4522_v5 = vld [vmem:[%s6824_s10 + $0x14] ss:$8 sps:$4 sm:$0xff]   ;;  %v4524_v6 = vld [vmem:[%s6824_s10 + $0x10] ss:$8 sps:$4 sm:$0xff]   ;;  %v6847_v12 = vmov 0  }
   0xd   :  { %v4969_v8 = vsel %vm398_vm1, %v399_v4, 0  ;;  %196 = vmatprep.subr.bf16.mxu0 %v4522_v5  ;;  %v4527_v11 = vld [vmem:[%s6824_s10 + $0x24] ss:$8 sps:$4 sm:$0xff]   ;;  %4276 = vset.pattern.permute.xlu0 %v6847_v12  ;;  %v4529_v15 = vld [vmem:[%s6824_s10 + $0x20] ss:$8 sps:$4 sm:$0xff]   ;;  %s6935_s0 = sld [smem:[#allocation72_spill]] }
   0xe   :  { %4287 = vset.pattern.permute.xlu1 %v6847_v12  ;;  %v4530_v17 = vld [vmem:[%s6824_s10 + $0x34] ss:$8 sps:$4 sm:$0xff]   ;;  %226 = vmatprep.mubr.bf16.mxu0 %v6847_v12  ;;  %v4532_v22 = vld [vmem:[%s6824_s10 + $0x30] ss:$8 sps:$4 sm:$0xff]   ;;  %v4535_v26 = vld [vmem:[%s6824_s10 + $0x44] ss:$8 sps:$4 sm:$0xff]  }
   0xf   :  { %v4538_v35 = vld [vmem:[%s6824_s10 + $0x40] ss:$8 sps:$4 sm:$0xff]   ;;  %v4540_v39 = vld [vmem:[%s6824_s10 + $0x54] ss:$8 sps:$4 sm:$0xff]   ;;  %v4543_v46 = vld [vmem:[%s6824_s10 + $0x50] ss:$8 sps:$4 sm:$0xff]  }
  0x10   :  { %197 = vmatpush1.bf16.msra.mxu0 %v4524_v6  ;;  %v4546_v48 = vld [vmem:[%s6824_s10 + $0x64] ss:$8 sps:$4 sm:$0xff]   ;;  %v4548_v58 = vld [vmem:[%s6824_s10 + $0x60] ss:$8 sps:$4 sm:$0xff]   ;;  %v4549_v59 = vld [vmem:[%s6824_s10 + $0x74] ss:$8 sps:$4 sm:$0xff]  }
  0x11   :  { %v4521_v2 = vld [vmem:[%s6933_s29] sm:$0x1f]   ;;  %v4967_v7 = vld [vmem:[%s6934_s4 + $0x10] sm:$0xff]   ;;  %v275_v9 = vld [vmem:[%s6934_s4 + $0x18] sm:$0xff]   ;;  %198 = vmatprep.subr.bf16.mxu0 %v4527_v11  ;;  %s6936_s8 = sld [smem:[#allocation68_spill]]  ;;  %s6937_s7 = sld [smem:[#allocation66_spill]] }
  0x12   :  { %v4975_v10 = vand.u32 %v4521_v2, %v4969_v8  ;;  %v611_v13 = vunpack.c.l.bf16 %v275_v9  ;;  %4166 = vmatprep.mubr.msk.bf16.mxu1 %vm360_vm2, %v4967_v7  ;;  %v612_v14 = vunpack.c.h.bf16 %v275_v9  ;;  %v4991_v16 = vld [vmem:[%s6934_s4 + $0x20] sm:$0xff]   ;;  %v609_v20 = vunpack.c.l.bf16 %v4967_v7  ;;  %v5005_v21 = vld [vmem:[%s6934_s4 + $0x8] sm:$0xff]   ;;  %v5031_v28 = vld [vmem:[%s6934_s4 + $0x70] sm:$0xff]  }
  0x13   :  { %v4537_v19 = vld [vmem:[%s6933_s29] sm:$0x1f]   ;;  %v5014_v23 = vld [vmem:[%s6934_s4 + $0x28] sm:$0xff]   ;;  %v608_v25 = vunpack.c.h.bf16 %v5005_v21  ;;  %v5036_v30 = vld [vmem:[%s6934_s4 + $0x30] sm:$0xff]   ;;  %v1231_v32 = vunpack.c.l.bf16 %v5031_v28  ;;  %v610_v38 = vunpack.c.h.bf16 %v4967_v7  ;;  %v614_v40 = vunpack.c.h.bf16 %v4991_v16 }
  0x14   :  { %4266 = vmatprep.subr.bf16.mxu1 %v4975_v10  ;;  %v4288_v18 = vpack.i.bf16 %v612_v14, %v611_v13  ;;  %199 = vmatpush1.bf16.msra.mxu0 %v4529_v15  ;;  %v1024_v24 = vand.u32 %v4537_v19, %v4969_v8  ;;  %v5026_v27 = vld [vmem:[%s6934_s4 + $0x68] sm:$0xff]   ;;  %v5043_v33 = vld [vmem:[%s6934_s4 + $0x78] sm:$0xff]   ;;  %v5048_v34 = vld [vmem:[%s6934_s4] sm:$0xff]   ;;  %v615_v50 = vunpack.c.l.bf16 %v5014_v23  ;;  %v1232_v55 = vunpack.c.h.bf16 %v5031_v28 }
  0x15   :  { %4267 = vmatpush3.bf16.msra.mxu1 %v4975_v10  ;;  %200 = vmatprep.subr.bf16.mxu0 %v4530_v17  ;;  %v4277_v29 = vpack.i.bf16 %v609_v20, %v608_v25  ;;  %v1230_v31 = vunpack.c.h.bf16 %v5026_v27  ;;  %v1233_v36 = vunpack.c.l.bf16 %v5043_v33  ;;  %v1234_v37 = vunpack.c.h.bf16 %v5043_v33  ;;  %v5065_v45 = vld [vmem:[%s6934_s4 + $0x60] sm:$0xff]   ;;  %v5077_v47 = vld [vmem:[%s6934_s4 + $0x38] sm:$0xff]   ;;  %v5099_v57 = vld [vmem:[%s6934_s4 + $0x88] sm:$0xff]  }
  0x16   :  { %4289 = vperm.xlu1 %4287, %v4288_v18   ;;  %4186 = vmatprep.subr.bf16.mxu1 %v1024_v24  ;;  %v605_v43 = vunpack.c.l.bf16 %v5048_v34  ;;  %v606_v44 = vunpack.c.h.bf16 %v5048_v34  ;;  %v4303_v49 = vpack.i.bf16 %v614_v40, %v610_v38  ;;  %v5086_v52 = vld [vmem:[%s6934_s4 + $0x40] sm:$0xff]   ;;  %v1227_v53 = vunpack.c.l.bf16 %v5065_v45  ;;  %v5117_v4 = vld [vmem:[%s6934_s4 + $0x90] sm:$0xff]   ;;  %v5132_v7 = vld [vmem:[%s6934_s4 + $0x48] sm:$0xff]  }
  0x17   :  { %4278 = vperm.xlu0 %4276, %v4277_v29   ;;  %v4282_v41 = vpack.i.bf16 %v1231_v32, %v1230_v31  ;;  %v4293_v42 = vpack.i.bf16 %v1234_v37, %v1233_v36  ;;  %v1228_v54 = vunpack.c.h.bf16 %v5065_v45  ;;  %v5094_v56 = vld [vmem:[%s6934_s4 + $0x80] sm:$0xff]   ;;  %v613_v60 = vunpack.c.l.bf16 %v4991_v16  ;;  %v4552_v6 = vld [vmem:[%s6824_s10 + $0x70] ss:$8 sps:$4 sm:$0xff]  }
  0x18   :  { %4167 = vmatmul.mubr.msk.bf16.vlgmr.msra.gmra.mrb[0].mxu1 %vm360_vm2, %v275_v9  ;;  %201 = vmatpush1.bf16.msra.mxu0 %v4532_v22  ;;  %v4298_v51 = vpack.i.bf16 %v606_v44, %v605_v43  ;;  %v617_v61 = vunpack.c.l.bf16 %v5036_v30  ;;  %v4564_v62 = vld [vmem:[%s6823_s9] sm:$0x1f]   ;;  %v4308_v63 = vpack.i.bf16 %v1227_v53, %v615_v50  ;;  %v1236_v1 = vunpack.c.h.bf16 %v5094_v56  ;;  %v5138_v14 = vld [vmem:[%s6934_s4 + $0x50] sm:$0xff]   ;;  %v5174_v32 = vld [vmem:[%s6934_s4 + $0x58] sm:$0xff]  }
  0x19   :  { %4170 = vmatprep.mubr.msk.bf16.mxu1 %vm360_vm2, %v4991_v16  ;;  %4187 = vmatpush3.bf16.msra.mxu1 %v1024_v24  ;;  %v4313_v0 = vpack.i.bf16 %v1232_v55, %v1228_v54  ;;  %v1237_v2 = vunpack.c.l.bf16 %v5099_v57  ;;  %v5120_v5 = vand.u32 %v4564_v62, %v4969_v8  ;;  %v618_v11 = vunpack.c.h.bf16 %v5036_v30  ;;  %v4554_v18 = vld [vmem:[%s6935_s0] sm:$0xff]   ;;  %v5209_v53 = vld [vmem:[%s6934_s4 + $0xb0] sm:$0xff]   ;;  %v5214_v54 = vld [vmem:[%s6934_s4 + $0xb8] sm:$0xff]  }
  0x1a   :  { %202 = vmatprep.subr.bf16.mxu0 %v4535_v26  ;;  %4294 = vperm.xlu1 %4287, %v4293_v42   ;;  %v4323_v9 = vpack.i.bf16 %v617_v61, %v613_v60  ;;  %v1235_v15 = vunpack.c.l.bf16 %v5094_v56  ;;  %v1239_v16 = vunpack.c.l.bf16 %v5117_v4  ;;  %v1240_v17 = vunpack.c.h.bf16 %v5117_v4  ;;  %v4563_v19 = vld [vmem:[%s6823_s9] sm:$0x1f]  }
  0x1b   :  { %4283 = vperm.xlu0 %4276, %v4282_v41   ;;  %v4318_v13 = vpack.i.bf16 %v1237_v2, %v1236_v1  ;;  %4248 = vmatprep.subr.bf16.mxu1 %v5120_v5  ;;  %v607_v20 = vunpack.c.l.bf16 %v5005_v21  ;;  %v616_v22 = vunpack.c.h.bf16 %v5014_v23  ;;  %v620_v26 = vunpack.c.h.bf16 %v5077_v47  ;;  %v5163_v31 = vld [vmem:[%s6934_s4 + $0xa0] sm:$0xff]   ;;  %v5190_v41 = vld [vmem:[%s6934_s4 + $0xa8] sm:$0xff]  }
  0x1c   :  { %203 = vmatpush1.bf16.msra.mxu0 %v4538_v35  ;;  %v4328_v24 = vpack.i.bf16 %v1235_v15, %v618_v11  ;;  %v4333_v25 = vpack.i.bf16 %v1240_v17, %v1239_v16  ;;  %v621_v29 = vunpack.c.l.bf16 %v5086_v52  ;;  %v4557_v35 = vld [vmem:[%s6935_s0 + $0x8] sm:$0xff]   ;;  %v1229_v37 = vunpack.c.l.bf16 %v5026_v27  ;;  %v4569_v2 = vld [vmem:[%s6823_s9] sm:$0x1f]   ;;  %v1515_v16 = vld [vmem:[%s6936_s8 + $0x10] sm:$0xff]  }
  0x1d   :  { %204 = vmatprep.subr.bf16.mxu0 %v4540_v39  ;;  %v4338_v36 = vpack.i.bf16 %v616_v22, %v607_v20  ;;  %v1238_v38 = vunpack.c.h.bf16 %v5099_v57  ;;  %v1243_v40 = vunpack.c.l.bf16 %v5163_v31  ;;  %v619_v42 = vunpack.c.l.bf16 %v5077_v47  ;;  %v5246_v15 = vld [vmem:[%s6936_s8 + $0x48] sm:$0xff]   ;;  %v1517_v22 = vld [vmem:[%s6936_s8 + $0x18] sm:$0xff]  }
  0x1e   :  { %4304 = vperm.xlu1 %4287, %v4303_v49   ;;  %v623_v43 = vunpack.c.l.bf16 %v5132_v7  ;;  %v1245_v50 = vunpack.c.l.bf16 %v5190_v41  ;;  %v627_v61 = vunpack.c.l.bf16 %v5174_v32  ;;  %v1249_v1 = vunpack.c.l.bf16 %v5214_v54 }
  0x1f   :  { %4299 = vperm.xlu0 %4276, %v4298_v51   ;;  %v4348_v44 = vpack.i.bf16 %v1238_v38, %v1229_v37  ;;  %v1246_v51 = vunpack.c.h.bf16 %v5190_v41  ;;  %v1250_v11 = vunpack.c.h.bf16 %v5214_v54  ;;  %v5294_v38 = vld [vmem:[%s6936_s8 + $0x58] sm:$0xff]  }
  0x20   :  { %4171 = vmatmul.mubr.msk.bf16.gmra.mrb[4].mxu1 %vm360_vm2, %v5014_v23  ;;  %205 = vmatpush1.bf16.msra.mxu0 %v4543_v46  ;;  %v5166_v23 = vand.u32 %v4563_v19, %v4969_v8  ;;  %v2204_v19 = vunpack.c.h.bf16 %v5246_v15 }
  0x21   :  { %4174 = vmatprep.mubr.msk.bf16.mxu1 %vm360_vm2, %v5036_v30  ;;  %206 = vmatprep.subr.bf16.mxu0 %v4546_v48  ;;  %v5158_v30 = vld [vmem:[%s6934_s4 + $0x98] sm:$0xff]   ;;  %v624_v48 = vunpack.c.h.bf16 %v5132_v7  ;;  %v4368_v60 = vpack.i.bf16 %v1246_v51, %v1245_v50 }
  0x22   :  { %4314 = vperm.xlu1 %4287, %v4313_v0   ;;  %v1242_v39 = vunpack.c.h.bf16 %v5158_v30  ;;  %v1241_v49 = vunpack.c.l.bf16 %v5158_v30  ;;  %v1248_v0 = vunpack.c.h.bf16 %v5209_v53 }
  0x23   :  { %4309 = vperm.xlu0 %4276, %v4308_v63   ;;  %v1244_v63 = vunpack.c.h.bf16 %v5163_v31 }
  0x24   :  { %207 = vmatpush1.bf16.msra.mxu0 %v4548_v58  ;;  %v4353_v46 = vpack.i.bf16 %v1243_v40, %v1242_v39  ;;  %v4363_v55 = vpack.i.bf16 %v1241_v49, %v624_v48  ;;  %v622_v58 = vunpack.c.h.bf16 %v5086_v52  ;;  %v1752_v39 = vunpack.c.l.bf16 %v1517_v22 }
  0x25   :  { %208 = vmatprep.subr.bf16.mxu0 %v4549_v59  ;;  %v626_v59 = vunpack.c.h.bf16 %v5138_v14  ;;  %v2207_v49 = vunpack.c.l.bf16 %v5294_v38 }
  0x26   :  { %4324 = vperm.xlu1 %4287, %v4323_v9   ;;  %v628_v9 = vunpack.c.h.bf16 %v5174_v32 }
  0x27   :  { %4319 = vperm.xlu0 %4276, %v4318_v13   ;;  %v4373_v62 = vpack.i.bf16 %v626_v59, %v622_v58 }
  0x28   :  { %4175 = vmatmul.mubr.msk.bf16.gmra.mrb[8].mxu1 %vm360_vm2, %v5077_v47  ;;  %209 = vmatpush1.bf16.msra.mxu0 %v4552_v6  ;;  %v4559_v47 = vld [vmem:[%s6935_s0 + $0x10] ss:$0 sps:$4 sm:$0xff]   ;;  %v4378_v6 = vpack.i.bf16 %v1244_v63, %v627_v61 }
  0x29   :  { %4178 = vmatprep.mubr.msk.bf16.mxu1 %vm360_vm2, %v5086_v52  ;;  %4160 = vmatprep.subr.bf16.mxu0 %v4975_v10  ;;  %v1511_v52 = vld [vmem:[%s6936_s8] sm:$0xff]  }
  0x2a   :  { %4334 = vperm.xlu1 %4287, %v4333_v25   ;;  %v1751_v25 = vunpack.c.h.bf16 %v1515_v16  ;;  %v1746_v37 = vunpack.c.l.bf16 %v1511_v52 }
  0x2b   :  { %227 = vmatmul.mubr.bf16.vlgmr.msra.gmra.mrb[0].mxu0 %v4554_v18  ;;  %4329 = vperm.xlu0 %4276, %v4328_v24   ;;  %v5268_v18 = vld [vmem:[%s6936_s8 + $0x50] sm:$0xff]   ;;  %v1750_v24 = vunpack.c.l.bf16 %v1515_v16 }
  0x2c   :  { %4161 = vmatpush3.bf16.msra.mxu0 %v4975_v10  ;;  %234 = vmatprep.mubr.bf16.mxu0 %v6847_v12  ;;  %v4343_v10 = vpack.i.bf16 %v621_v29, %v620_v26  ;;  %v2205_v29 = vunpack.c.l.bf16 %v5268_v18 }
  0x2d   :  { %4212 = vmatprep.subr.bf16.mxu0 %v5166_v23 }
  0x2e   :  { %4344 = vperm.xlu1 %4287, %v4343_v10   ;;  %v1747_v10 = vunpack.c.h.bf16 %v1511_v52 }
  0x2f   :  { %4339 = vperm.xlu0 %4276, %v4338_v36   ;;  %v4408_v36 = vpack.i.bf16 %v1751_v25, %v1750_v24 }
  0x30   :  { %4179 = vmatmul.mubr.msk.bf16.gmra.mrb[12].mxu1 %vm360_vm2, %v5132_v7  ;;  %v625_v7 = vunpack.c.l.bf16 %v5138_v14  ;;  %v4418_v40 = vpack.i.bf16 %v1747_v10, %v1746_v37 }
  0x31   :  { %4182 = vmatprep.mubr.msk.bf16.mxu1 %vm360_vm2, %v5138_v14  ;;  %v4393_v14 = vpack.i.bf16 %v1250_v11, %v628_v9 }
  0x32   :  { %4354 = vperm.xlu1 %4287, %v4353_v46   ;;  %v5304_v46 = vld [vmem:[%s6936_s8 + $0x60] sm:$0xff]  }
  0x33   :  { %235 = vmatmul.mubr.bf16.gmra.mrb[4].mxu0 %v4557_v35  ;;  %4349 = vperm.xlu0 %4276, %v4348_v44   ;;  %v5289_v35 = vld [vmem:[%s6936_s8 + $0x40] sm:$0xff]  }
  0x34   :  { %242 = vmatprep.mubr.bf16.mxu0 %v6847_v12  ;;  %v2202_v44 = vunpack.c.h.bf16 %v5289_v35 }
  0x36   :  { %4364 = vperm.xlu1 %4287, %v4363_v55  }
  0x38   :  { %4183 = vmatmul.mubr.msk.bf16.gmra.mrb[16].mxu1 %vm360_vm2, %v5174_v32  ;;  %v1519_v32 = vld [vmem:[%s6936_s8 + $0x20] sm:$0xff]  }
  0x39   :  { %4188 = vmatprep.mubr.msk.bf16.mxu1 %vm360_vm2, %v5065_v45  ;;  %v4358_v45 = vpack.i.bf16 %v623_v43, %v619_v42  ;;  %v1521_v42 = vld [vmem:[%s6936_s8 + $0x28] sm:$0xff]   ;;  %v2201_v43 = vunpack.c.l.bf16 %v5289_v35 }
  0x3a   :  { %4374 = vperm.xlu1 %4287, %v4373_v62  }
  0x3b   :  { %4359 = vperm.xlu0 %4276, %v4358_v45   ;;  %243 = vmatmul.mubr.bf16.gmra.mrb[8].mxu0 %v4559_v47  ;;  %v2208_v47 = vunpack.c.h.bf16 %v5294_v38 }
  0x3c   :  { %4162 = vmatprep.mubr.msk.bf16.mxu0 %vm360_vm2, %v5048_v34  ;;  %v1247_v34 = vunpack.c.l.bf16 %v5209_v53 }
  0x3e   :  { %v4388_v13 = vpack.i.bf16 %v1247_v34, %v625_v7 }
  0x3f   :  { %4369 = vperm.xlu0 %4276, %v4368_v60  }
  0x40   :  { %4189 = vmatmul.mubr.msk.bf16.vlgmr.msra.gmra.mrb[20].mxu1 %vm360_vm2, %v5026_v27  ;;  %v4383_v27 = vpack.i.bf16 %v1249_v1, %v1248_v0 }
  0x41   :  { %4192 = vmatprep.mubr.msk.bf16.mxu1 %vm360_vm2, %v5031_v28  ;;  %4249 = vmatpush3.bf16.msra.mxu1 %v5120_v5  ;;  %v1513_v28 = vld [vmem:[%s6936_s8 + $0x8] sm:$0xff]   ;;  %v2054_v5 = vand.u32 %v4569_v2, %v4969_v8  ;;  %v837_v8 = vld [vmem:[%s6937_s7] sm:$0xff] }
  0x42   :  { %4384 = vperm.xlu1 %4287, %v4383_v27   ;;  %v1749_v17 = vunpack.c.h.bf16 %v1513_v28 }
  0x43   :  { %4379 = vperm.xlu0 %4276, %v4378_v6   ;;  %4163 = vmatmul.mubr.msk.bf16.vlgmr.msra.gmra.mrb[12].mxu0 %vm360_vm2, %v5005_v21  ;;  %v1459_v21 = vld [vmem:[%s6937_s7 + $0x8] sm:$0xff] }
  0x44   :  { %4213 = vmatpush3.bf16.msra.mxu0 %v5166_v23  ;;  %4214 = vmatprep.mubr.msk.bf16.mxu0 %vm360_vm2, %v1511_v52  ;;  %v2206_v23 = vunpack.c.h.bf16 %v5268_v18 }
  0x45   :  { %4230 = vmatprep.subr.bf16.mxu0 %v2054_v5 }
  0x46   :  { %4394 = vperm.xlu1 %4287, %v4393_v14  }
  0x47   :  { %4389 = vperm.xlu0 %4276, %v4388_v13  }
  0x48   :  { %4193 = vmatmul.mubr.msk.bf16.gmra.mrb[24].mxu1 %vm360_vm2, %v5043_v33  ;;  %v1748_v33 = vunpack.c.l.bf16 %v1513_v28 }
  0x49   :  { %4196 = vmatprep.mubr.msk.bf16.mxu1 %vm360_vm2, %v5094_v56  ;;  %v2203_v56 = vunpack.c.l.bf16 %v5246_v15 }
  0x4a   :  { %v4398_v20 = vpack.i.bf16 %v1749_v17, %v1748_v33  ;;  %1462 = vperm.xlu1 %4287, %v1459_v21  }
  0x4b   :  { %840 = vperm.xlu0 %4276, %v837_v8   ;;  %4215 = vmatmul.mubr.msk.bf16.vlgmr.msra.gmra.mrb[16].mxu0 %vm360_vm2, %v1513_v28  ;;  %v4403_v26 = vpack.i.bf16 %v2204_v19, %v2203_v56 }
  0x4c   :  { %4231 = vmatpush3.bf16.msra.mxu0 %v2054_v5  ;;  %4218 = vmatprep.mubr.msk.bf16.mxu0 %vm360_vm2, %v1515_v16 }
  0x4e   :  { %4404 = vperm.xlu1 %4287, %v4403_v26  }
  0x4f   :  { %4399 = vperm.xlu0 %4276, %v4398_v20  }
  0x50   :  { %4197 = vmatmul.mubr.msk.bf16.gmra.mrb[28].mxu1 %vm360_vm2, %v5099_v57  ;;  %v4413_v57 = vpack.i.bf16 %v2206_v23, %v2205_v29 }
  0x51   :  { %4200 = vmatprep.mubr.msk.bf16.mxu1 %vm360_vm2, %v5117_v4  ;;  %v1753_v4 = vunpack.c.h.bf16 %v1517_v22 }
  0x52   :  { %4414 = vperm.xlu1 %4287, %v4413_v57  }
  0x53   :  { %4409 = vperm.xlu0 %4276, %v4408_v36   ;;  %4219 = vmatmul.mubr.msk.bf16.gmra.mrb[20].mxu0 %vm360_vm2, %v1517_v22  ;;  %v4423_v48 = vpack.i.bf16 %v1753_v4, %v1752_v39 }
  0x54   :  { %4222 = vmatprep.mubr.msk.bf16.mxu0 %vm360_vm2, %v1519_v32 }
  0x58   :  { %4201 = vmatmul.mubr.msk.bf16.gmra.mrb[32].mxu1 %vm360_vm2, %v5158_v30 }
  0x59   :  { %31 = vsyncpa [#allocation6], 0  ;;  %4204 = vmatprep.mubr.msk.bf16.mxu1 %vm360_vm2, %v5163_v31  ;;  %v1523_v50 = vld [vmem:[%s6936_s8 + $0x30] sm:$0xff]   ;;  %4419 = vperm.xlu0 %4276, %v4418_v40   ;;  %v4428_v51 = vpack.i.bf16 %v2202_v44, %v2201_v43  ;;  %v1754_v45 = vunpack.c.l.bf16 %v1519_v32  ;;  %v1755_v55 = vunpack.c.h.bf16 %v1519_v32  ;;  %v4433_v58 = vpack.i.bf16 %v2208_v47, %v2207_v49  ;;  %v5322_v60 = vld [vmem:[%s6936_s8 + $0x68] sm:$0xff]   ;;  %s6953_s4 = sld [smem:[#allocation73_spill]]  ;;  %s7210_s10 = sld [smem:[#allocation70_spill]] }
  0x5a   :  { %4424 = vperm.xlu1 %4287, %v4423_v48   ;;  %v2209_v59 = vunpack.c.l.bf16 %v5304_v46  ;;  %v2210_v30 = vunpack.c.h.bf16 %v5304_v46  ;;  %v1756_v61 = vunpack.c.l.bf16 %v1521_v42  ;;  %v1757_v62 = vunpack.c.h.bf16 %v1521_v42  ;;  %v1525_v52 = vld [vmem:[%s6936_s8 + $0x38] sm:$0xff]   ;;  %v5336_v2 = vld [vmem:[%s6936_s8 + $0x70] sm:$0xff]   ;;  %v2423_v33 = vld [vmem:[%s6936_s8 + $0x88] sm:$0xff]   ;;  %s7212_s2 = sld [smem:[#allocation71_spill]]  ;;  %s4819_s6 = smov [#allocation3]  }
  0x5b   :  { %v4438_v31 = vpack.i.bf16 %v1755_v55, %v1754_v45  ;;  %4223 = vmatmul.mubr.msk.bf16.gmra.mrb[24].mxu0 %vm360_vm2, %v1521_v42  ;;  %v2211_v0 = vunpack.c.l.bf16 %v5322_v60  ;;  %v2212_v1 = vunpack.c.h.bf16 %v5322_v60  ;;  %v1758_v27 = vunpack.c.l.bf16 %v1523_v50  ;;  %v5348_v13 = vld [vmem:[%s6936_s8 + $0x78] sm:$0xff]   ;;  %v2425_v21 = vld [vmem:[%s6936_s8 + $0x90] sm:$0xff]   ;;  %v2429_v32 = vld [vmem:[%s6936_s8 + $0xa0] sm:$0xff]  }
  0x5c   :  { %v4443_v63 = vpack.i.bf16 %v2210_v30, %v2209_v59  ;;  %4226 = vmatprep.mubr.msk.bf16.mxu0 %vm360_vm2, %v1523_v50  ;;  %v4448_v6 = vpack.i.bf16 %v1757_v62, %v1756_v61  ;;  %v1759_v7 = vunpack.c.h.bf16 %v1523_v50  ;;  %v2213_v9 = vunpack.c.l.bf16 %v5336_v2  ;;  %v2427_v24 = vld [vmem:[%s6936_s8 + $0x98] sm:$0xff]   ;;  %v2431_v37 = vld [vmem:[%s6936_s8 + $0xa8] sm:$0xff]   ;;  %v2433_v42 = vld [vmem:[%s6936_s8 + $0xb0] sm:$0xff]  }
  0x5d   :  { %4429 = vperm.xlu0 %4276, %v4428_v51   ;;  %v4453_v34 = vpack.i.bf16 %v2212_v1, %v2211_v0  ;;  %v2214_v11 = vunpack.c.h.bf16 %v5336_v2  ;;  %v1760_v28 = vunpack.c.l.bf16 %v1525_v52  ;;  %v1761_v5 = vunpack.c.h.bf16 %v1525_v52  ;;  %v2435_v49 = vld [vmem:[%s6936_s8 + $0xb8] sm:$0xff]   ;;  %v2824_v55 = vld [vmem:[%s6937_s7 + $0x20] sm:$0xff] }
  0x5e   :  { %4434 = vperm.xlu1 %4287, %v4433_v58   ;;  %v2215_v16 = vunpack.c.l.bf16 %v5348_v13  ;;  %v2216_v8 = vunpack.c.h.bf16 %v5348_v13  ;;  %v2658_v56 = vunpack.c.l.bf16 %v2423_v33  ;;  %v2659_v19 = vunpack.c.h.bf16 %v2423_v33  ;;  %v4600_v58 = vld [vmem:[%s6830_s16 + $0x4] ss:$8 sps:$4 sm:$0xff]   ;;  %v4598_v59 = vld [vmem:[%s6830_s16] ss:$8 sps:$4 sm:$0xff]   ;;  %v4601_v61 = vld [vmem:[%s6830_s16 + $0x10] ss:$8 sps:$4 sm:$0xff]  }
  0x5f   :  { %v4463_v14 = vpack.i.bf16 %v2214_v11, %v2213_v9  ;;  %v4468_v17 = vpack.i.bf16 %v1761_v5, %v1760_v28  ;;  %v2661_v22 = vunpack.c.h.bf16 %v2425_v21  ;;  %v2663_v36 = vunpack.c.h.bf16 %v2427_v24  ;;  %2973 = vmatprep.subr.bf16.mxu0 %v4600_v58  ;;  %v4612_v5 = vld [vmem:[%s6830_s16 + $0x44] ss:$8 sps:$4 sm:$0xff]  }
  0x60   :  { %4205 = vmatmul.mubr.msk.bf16.gmra.mrb[36].mxu1 %vm360_vm2, %v5190_v41  ;;  %v2421_v41 = vld [vmem:[%s6936_s8 + $0x80] sm:$0xff]   ;;  %v4473_v20 = vpack.i.bf16 %v2216_v8, %v2215_v16  ;;  %v4478_v25 = vpack.i.bf16 %v2659_v19, %v2658_v56  ;;  %v2664_v10 = vunpack.c.l.bf16 %v2429_v32  ;;  %v2665_v57 = vunpack.c.h.bf16 %v2429_v32  ;;  %v4615_v19 = vld [vmem:[%s6830_s16 + $0x54] ss:$8 sps:$4 sm:$0xff]  }
  0x61   :  { %4208 = vmatprep.mubr.msk.bf16.mxu1 %vm360_vm2, %v5209_v53  ;;  %4439 = vperm.xlu0 %4276, %v4438_v31   ;;  %v4458_v53 = vpack.i.bf16 %v1759_v7, %v1758_v27  ;;  %v2656_v26 = vunpack.c.l.bf16 %v2421_v41  ;;  %v2657_v29 = vunpack.c.h.bf16 %v2421_v41  ;;  %v2666_v4 = vunpack.c.l.bf16 %v2431_v37  ;;  %v4603_v31 = vld [vmem:[%s6830_s16 + $0x14] ss:$8 sps:$4 sm:$0xff]  }
  0x62   :  { %4444 = vperm.xlu1 %4287, %v4443_v63   ;;  %v2667_v40 = vunpack.c.h.bf16 %v2431_v37  ;;  %v2668_v43 = vunpack.c.l.bf16 %v2433_v42  ;;  %v2669_v44 = vunpack.c.h.bf16 %v2433_v42  ;;  %v2670_v50 = vunpack.c.l.bf16 %v2435_v49 }
  0x63   :  { %4227 = vmatmul.mubr.msk.bf16.gmra.mrb[28].mxu0 %vm360_vm2, %v1525_v52  ;;  %v2671_v51 = vunpack.c.h.bf16 %v2435_v49  ;;  %vm3257_vm3 = vcmask 1042432   ;;  %vm874_vm4 = vcmask 1041409   ;;  %vm877_vm5 = vcmask 1042434  }
  0x64   :  { %4232 = vmatprep.mubr.msk.bf16.mxu0 %vm360_vm2, %v5289_v35  ;;  %v2662_v35 = vunpack.c.l.bf16 %v2427_v24  ;;  %v4503_v48 = vpack.i.bf16 %v2667_v40, %v2666_v4  ;;  %v4508_v47 = vpack.i.bf16 %v2669_v44, %v2668_v43  ;;  %v2876_v40 = vld [vmem:[%s6953_s4] sm:$0x1]  ;;  %v4625_v44 = vld [vmem:[%s6829_s15 + $0x4] ss:$8 sps:$4 sm:$0xff]   ;;  %vm880_vm6 = vcmask 1043459  }
  0x65   :  { %4449 = vperm.xlu0 %4276, %v4448_v6   ;;  %v4513_v45 = vpack.i.bf16 %v2671_v51, %v2670_v50  ;;  %v4606_v6 = vld [vmem:[%s6830_s16 + $0x24] ss:$8 sps:$4 sm:$0xff]   ;;  %3118 = vmatprep.subr.bf16.mxu1 %v4625_v44  ;;  %vm3253_vm7 = vcmask 48128   ;;  %vm883_vm8 = vcmask 1044484   ;;  %vm886_vm9 = vcmask 1045509  }
  0x66   :  { %4454 = vperm.xlu1 %4287, %v4453_v34   ;;  %v4493_v39 = vpack.i.bf16 %v2663_v36, %v2662_v35  ;;  %v4609_v34 = vld [vmem:[%s6830_s16 + $0x34] ss:$8 sps:$4 sm:$0xff]   ;;  %v4619_v36 = vld [vmem:[%s6830_s16 + $0x70] ss:$8 sps:$4 sm:$0xff]   ;;  %v4626_v50 = vld [vmem:[%s6827_s13 + $0x8] sm:$0xff]   ;;  %vm889_vm10 = vcmask 1046534  }
  0x67   :  { %v4621_v35 = vld [vmem:[%s6830_s16 + $0x74] ss:$8 sps:$4 sm:$0xff]   ;;  %vm892_vm11 = vcmask 1047559   ;;  %vm3407_vm12 = vcmask 39936   ;;  %vm3414_vm13 = vcmask 1041408   ;;  %vm3773_vm14 = vcmask 31744  }
  0x68   :  { %4209 = vmatmul.mubr.msk.bf16.gmra.mrb[40].mxu1 %vm360_vm2, %v5214_v54  ;;  %v2660_v54 = vunpack.c.l.bf16 %v2425_v21 }
  0x69   :  { %4250 = vmatprep.mubr.msk.bf16.mxu1 %vm360_vm2, %v2421_v41  ;;  %4459 = vperm.xlu0 %4276, %v4458_v53   ;;  %v4604_v41 = vld [vmem:[%s6830_s16 + $0x20] ss:$8 sps:$4 sm:$0xff]  }
  0x6a   :  { %4464 = vperm.xlu1 %4287, %v4463_v14   ;;  %v4483_v23 = vpack.i.bf16 %v2661_v22, %v2660_v54  ;;  %v4610_v14 = vld [vmem:[%s6830_s16 + $0x40] ss:$8 sps:$4 sm:$0xff]  }
  0x6b   :  { %4233 = vmatmul.mubr.msk.bf16.vlgmr.msra.gmra.mrb[32].mxu0 %vm360_vm2, %v5246_v15  ;;  %v4488_v15 = vpack.i.bf16 %v2657_v29, %v2656_v26 }
  0x6c   :  { %4236 = vmatprep.mubr.msk.bf16.mxu0 %vm360_vm2, %v5268_v18  ;;  %v4498_v18 = vpack.i.bf16 %v2665_v57, %v2664_v10  ;;  %2974 = vmatpush1.bf16.msra.mxu0 %v4598_v59 }
  0x6d   :  { %4469 = vperm.xlu0 %4276, %v4468_v17   ;;  %2975 = vmatprep.subr.bf16.mxu0 %v4603_v31 }
  0x6e   :  { %4474 = vperm.xlu1 %4287, %v4473_v20   ;;  %v4613_v20 = vld [vmem:[%s6830_s16 + $0x50] ss:$8 sps:$4 sm:$0xff]  }
  0x70   :  { %4251 = vmatmul.mubr.msk.bf16.vlgmr.msra.gmra.mrb[44].mxu1 %vm360_vm2, %v2423_v33  ;;  %2976 = vmatpush1.bf16.msra.mxu0 %v4601_v61  ;;  %v4638_v61 = vld [vmem:[%s6827_s13 + $0x20] sm:$0xff]  }
  0x71   :  { %4254 = vmatprep.mubr.msk.bf16.mxu1 %vm360_vm2, %v2425_v21  ;;  %4479 = vperm.xlu0 %4276, %v4478_v25   ;;  %v4616_v25 = vld [vmem:[%s6830_s16 + $0x60] ss:$8 sps:$4 sm:$0xff]  }
  0x72   :  { %4484 = vperm.xlu1 %4287, %v4483_v23   ;;  %2977 = vmatprep.subr.bf16.mxu0 %v4606_v6 }
  0x73   :  { %4237 = vmatmul.mubr.msk.bf16.gmra.mrb[36].mxu0 %vm360_vm2, %v5294_v38  ;;  %v1914_v38 = vld [vmem:[%s6937_s7 + $0x10] sm:$0xff] }
  0x74   :  { %4240 = vmatprep.mubr.msk.bf16.mxu0 %vm360_vm2, %v5304_v46  ;;  %v2369_v46 = vld [vmem:[%s6937_s7 + $0x18] sm:$0xff]  ;;  %2978 = vmatpush1.bf16.msra.mxu0 %v4604_v41 }
  0x75   :  { %4489 = vperm.xlu0 %4276, %v4488_v15   ;;  %2979 = vmatprep.subr.bf16.mxu0 %v4609_v34 }
  0x76   :  { %4494 = vperm.xlu1 %4287, %v4493_v39   ;;  %v4622_v39 = vld [vmem:[%s6827_s13] sm:$0xff]  }
  0x78   :  { %4255 = vmatmul.mubr.msk.bf16.gmra.mrb[48].mxu1 %vm360_vm2, %v2427_v24  ;;  %v4618_v24 = vld [vmem:[%s6830_s16 + $0x64] ss:$8 sps:$4 sm:$0xff]  }
  0x79   :  { %4258 = vmatprep.mubr.msk.bf16.mxu1 %vm360_vm2, %v2429_v32  ;;  %4499 = vperm.xlu0 %4276, %v4498_v18  }
  0x7a   :  { %4504 = vperm.xlu1 %4287, %v4503_v48   ;;  %v4623_v48 = vld [vmem:[%s6829_s15] ss:$8 sps:$4 sm:$0xff]  }
  0x7b   :  { %4241 = vmatmul.mubr.msk.bf16.gmra.mrb[40].mxu0 %vm360_vm2, %v5322_v60  ;;  %3119 = vmatpush1.bf16.msra.mxu1 %v4623_v48 }
  0x7c   :  { %4244 = vmatprep.mubr.msk.bf16.mxu0 %vm360_vm2, %v5336_v2 }
  0x7d   :  { %4509 = vperm.xlu0 %4276, %v4508_v47  }
  0x7e   :  { %1917 = vperm.xlu1 %4287, %v1914_v38  }
  0x80   :  { %4259 = vmatmul.mubr.msk.bf16.gmra.mrb[52].mxu1 %vm360_vm2, %v2431_v37 }
  0x81   :  { %4262 = vmatprep.mubr.msk.bf16.mxu1 %vm360_vm2, %v2433_v42  ;;  %2372 = vperm.xlu0 %4276, %v2369_v46   ;;  %v4629_v46 = vld [vmem:[%s6829_s15 + $0x14] ss:$8 sps:$4 sm:$0xff]  }
  0x82   :  { %4514 = vperm.xlu1 %4287, %v4513_v45   ;;  %v4627_v45 = vld [vmem:[%s6829_s15 + $0x10] ss:$8 sps:$4 sm:$0xff]   ;;  %3120 = vmatprep.subr.bf16.mxu1 %v4629_v46  ;;  %v4639_v46 = vld [vmem:[%s6829_s15 + $0x40] ss:$8 sps:$4 sm:$0xff]  }
  0x83   :  { %4245 = vmatmul.mubr.msk.bf16.gmra.mrb[44].mxu0 %vm360_vm2, %v5348_v13  ;;  %v4607_v13 = vld [vmem:[%s6830_s16 + $0x30] ss:$8 sps:$4 sm:$0xff]   ;;  %3121 = vmatpush1.bf16.msra.mxu1 %v4627_v45  ;;  %v4631_v45 = vld [vmem:[%s6829_s15 + $0x20] ss:$8 sps:$4 sm:$0xff]  }
  0x84   :  { %3005 = vmatprep.mubr.bf16.mxu0 %v6847_v12  ;;  %2980 = vmatpush1.bf16.msra.mxu0 %v4607_v13 }
  0x85   :  { %2827 = vperm.xlu0 %4276, %v2824_v55   ;;  %2981 = vmatprep.subr.bf16.mxu0 %v4612_v5  ;;  %v4630_v55 = vld [vmem:[%s6827_s13 + $0x10] sm:$0xff]  }
  0x88   :  { %4263 = vmatmul.mubr.msk.bf16.gmra.mrb[56].mxu1 %vm360_vm2, %v2435_v49  ;;  %2982 = vmatpush1.bf16.msra.mxu0 %v4610_v14 }
  0x89   :  { %3150 = vmatprep.mubr.bf16.mxu1 %v6847_v12  ;;  %2983 = vmatprep.subr.bf16.mxu0 %v4615_v19  ;;  %v4633_v19 = vld [vmem:[%s6829_s15 + $0x24] ss:$8 sps:$4 sm:$0xff]  }
  0x8a   :  { %3122 = vmatprep.subr.bf16.mxu1 %v4633_v19 }
  0x8b   :  { %3123 = vmatpush1.bf16.msra.mxu1 %v4631_v45 }
  0x8c   :  { %2984 = vmatpush1.bf16.msra.mxu0 %v4613_v20 }
  0x8d   :  { %2985 = vmatprep.subr.bf16.mxu0 %v4618_v24 }
  0x90   :  { %2986 = vmatpush1.bf16.msra.mxu0 %v4616_v25 }
  0x91   :  { %2987 = vmatprep.subr.bf16.mxu0 %v4621_v35 }
  0x94   :  { %2988 = vmatpush1.bf16.msra.mxu0 %v4619_v36  ;;  %v4637_v36 = vld [vmem:[%s6829_s15 + $0x34] ss:$8 sps:$4 sm:$0xff]  }
  0x95   :  { %v5419_v60 = vpop.permute.xlu1 %4289  ;;  %3261 = vmatprep.subr.bf16.mxu0 %v6847_v12  ;;  %3124 = vmatprep.subr.bf16.mxu1 %v4637_v36 }
  0x96   :  { %v5417_v30 = vpop.permute.xlu0 %4278 }
  0x97   :  { %3006 = vmatmul.mubr.bf16.vlgmr.msra.gmra.mrb[48].mxu0 %v2876_v40  ;;  %v4635_v40 = vld [vmem:[%s6829_s15 + $0x30] ss:$8 sps:$4 sm:$0xff]  }
  0x98   :  { %3262 = vmatpush1.bf16.msra.mxu0 %v4622_v39  ;;  %v4634_v39 = vld [vmem:[%s6827_s13 + $0x18] sm:$0xff]   ;;  %3125 = vmatpush1.bf16.msra.mxu1 %v4635_v40  ;;  %v6969_v40 = vmov 0  }
  0x99   :  { %v5429_v63 = vpop.permute.xlu1 %4294  ;;  %3263 = vmatprep.subr.bf16.mxu0 %v6847_v12 }
  0x9a   :  { %v5427_v62 = vpop.permute.xlu0 %4283 }
  0x9c   :  { %3264 = vmatpush1.bf16.msra.mxu0 %v4626_v50 }
  0x9d   :  { %v5433_v1 = vpop.permute.xlu1 %4304  ;;  %3265 = vmatprep.subr.bf16.mxu0 %v6847_v12 }
  0x9e   :  { %v5431_v0 = vpop.permute.xlu0 %4299  ;;  %6938 = vst [vmem:[#allocation10_spill] sm:$0xff] %v5433_v1 }
  0xa0   :  { %3266 = vmatpush1.bf16.msra.mxu0 %v4630_v55 }
  0xa1   :  { %v5437_v2 = vpop.permute.xlu1 %4314  ;;  %3267 = vmatprep.subr.bf16.mxu0 %v6847_v12 }
  0xa2   :  { %v5435_v52 = vpop.permute.xlu0 %4309 }
  0xa3   :  { %6939 = vst [vmem:[#allocation11_spill] sm:$0xff] %v5435_v52 }
  0xa4   :  { %3268 = vmatpush1.bf16.msra.mxu0 %v4634_v39 }
  0xa5   :  { %v5447_v7 = vpop.permute.xlu1 %4324  ;;  %3269 = vmatprep.subr.bf16.mxu0 %v6847_v12  ;;  %v4641_v12 = vld [vmem:[%s6829_s15 + $0x44] ss:$8 sps:$4 sm:$0xff]  }
  0xa6   :  { %v5445_v27 = vpop.permute.xlu0 %4319  ;;  %6940 = vst [vmem:[#allocation12_spill] sm:$0xff] %v5447_v7  ;;  %3126 = vmatprep.subr.bf16.mxu1 %v4641_v12 }
  0xa7   :  { %3127 = vmatpush1.bf16.msra.mxu1 %v4639_v46 }
  0xa8   :  { %3270 = vmatpush1.bf16.msra.mxu0 %v4638_v61 }
  0xa9   :  { %v5454_v11 = vpop.permute.xlu1 %4334  ;;  %3271 = vmatprep.subr.bf16.mxu0 %v6969_v40 }
  0xaa   :  { %v5452_v9 = vpop.permute.xlu0 %4329 }
  0xab   :  { %6941 = vst [vmem:[#allocation13_spill] sm:$0xff] %v5452_v9 }
  0xad   :  { %v5461_v28 = vpop.permute.xlu1 %4344 }
  0xae   :  { %v5459_v53 = vpop.permute.xlu0 %4339 }
  0xaf   :  { %6942 = vst [vmem:[#allocation14_spill] sm:$0xff] %v5459_v53 }
  0xb1   :  { %v5471_v8 = vpop.permute.xlu1 %4354 }
  0xb2   :  { %v5469_v16 = vpop.permute.xlu0 %4349 }
  0xb5   :  { %v5475_v33 = vpop.permute.xlu1 %4364 }
  0xb9   :  { %v5479_v56 = vpop.permute.xlu1 %4374 }
  0xba   :  { %v5473_v21 = vpop.permute.xlu0 %4359  ;;  %6945 = vst [vmem:[#allocation17_spill] sm:$0xff] %v5479_v56 }
  0xbb   :  { %6943 = vst [vmem:[#allocation15_spill] sm:$0xff] %v5473_v21  ;;  %v6979_v39 = vunpack.i.h.bf16 %v5473_v21 }
  0xbe   :  { %v5477_v17 = vpop.permute.xlu0 %4369 }
  0xbf   :  { %6944 = vst [vmem:[#allocation16_spill] sm:$0xff] %v5477_v17 }
  0xc1   :  { %v5489_v22 = vpop.permute.xlu1 %4384 }
  0xc2   :  { %v5487_v54 = vpop.permute.xlu0 %4379  ;;  %6946 = vst [vmem:[#allocation18_spill] sm:$0xff] %v5489_v22  ;;  %v5729_v22 = vld [vmem:[%s6825_s11] ss:$0 sm:$0xff] }
  0xc5   :  { %v5499_v29 = vpop.permute.xlu1 %4394 }
  0xc6   :  { %v5497_v26 = vpop.permute.xlu0 %4389  ;;  %6948 = vst [vmem:[#allocation20_spill] sm:$0xff] %v5499_v29 }
  0xc7   :  { %6947 = vst [vmem:[#allocation19_spill] sm:$0xff] %v5497_v26 }
  0xc9   :  { %v5503_v32 = vpop.permute.xlu1 %1462 }
  0xca   :  { %v5501_v23 = vpop.permute.xlu0 %840 }
  0xcb   :  { %6949 = vst [vmem:[#allocation21_spill] sm:$0xff] %v5501_v23 }
  0xcd   :  { %v5513_v15 = vpop.permute.xlu1 %4404 }
  0xce   :  { %v5511_v37 = vpop.permute.xlu0 %4399  ;;  %6950 = vst [vmem:[#allocation22_spill] sm:$0xff] %v5513_v15 }
  0xd1   :  { %v5518_v57 = vpop.permute.xlu1 %4414 }
  0xd2   :  { %v5516_v10 = vpop.permute.xlu0 %4409  ;;  %6952 = vst [vmem:[#allocation24_spill] sm:$0xff] %v5518_v57 }
  0xd3   :  { %6951 = vst [vmem:[#allocation23_spill] sm:$0xff] %v5516_v10 }
  0xd8   :  { %v5523_v4 = vpop.permute.xlu0 %4419 }
  0xd9   :  { %v5528_v42 = vpop.permute.xlu1 %4424 }
  0xdc   :  { %v5531_v18 = vpop.permute.xlu0 %4429 }
  0xdd   :  { %6954 = vst [vmem:[#allocation25_spill] sm:$0xff] %v5531_v18  ;;  %v5533_v43 = vpop.permute.xlu1 %4434 }
  0xde   :  { %6955 = vst [vmem:[#allocation26_spill] sm:$0xff] %v5533_v43 }
  0xe0   :  { %v5541_v49 = vpop.permute.xlu0 %4439 }
  0xe1   :  { %6956 = vst [vmem:[#allocation27_spill] sm:$0xff] %v5541_v49  ;;  %v5543_v47 = vpop.permute.xlu1 %4444 }
  0xe2   :  { %6957 = vst [vmem:[#allocation28_spill] sm:$0xff] %v5543_v47 }
  0xe4   :  { %v5548_v51 = vpop.permute.xlu0 %4449 }
  0xe5   :  { %6958 = vst [vmem:[#allocation29_spill] sm:$0xff] %v5548_v51  ;;  %v5550_v38 = vpop.permute.xlu1 %4454 }
  0xe6   :  { %6959 = vst [vmem:[#allocation30_spill] sm:$0xff] %v5550_v38  ;;  %v4642_v38 = vld [vmem:[%s6827_s13 + $0x28] sm:$0xff]  }
  0xe7   :  { %3272 = vmatpush1.bf16.msra.mxu0 %v4642_v38 }
  0xe8   :  { %v5566_v6 = vpop.permute.xlu0 %4459  ;;  %3273 = vmatprep.subr.bf16.mxu0 %v6969_v40 }
  0xe9   :  { %6960 = vst [vmem:[#allocation31_spill] sm:$0xff] %v5566_v6  ;;  %v5572_v14 = vpop.permute.xlu1 %4464 }
  0xea   :  { %6961 = vst [vmem:[#allocation32_spill] sm:$0xff] %v5572_v14 }
  0xeb   :  { %v5578_v35 = vpop.f32.mrb[0].mxu1 }
  0xec   :  { %v5585_v48 = vpop.f32.mrb[1].mxu1  ;;  %v5591_v3 = vpop.permute.xlu0 %4469 }
  0xed   :  { %6962 = vst [vmem:[#allocation33_spill] sm:$0xff] %v5591_v3  ;;  %v5593_v24 = vpop.f32.mrb[2].mxu1  ;;  %v5601_v50 = vpop.permute.xlu1 %4474 }
  0xee   :  { %v5599_v13 = vpop.f32.mrb[3].mxu1  ;;  %6963 = vst [vmem:[#allocation34_spill] sm:$0xff] %v5601_v50 }
  0xf0   :  { %v5621_v55 = vpop.permute.xlu0 %4479 }
  0xf1   :  { %6964 = vst [vmem:[#allocation35_spill] sm:$0xff] %v5621_v55  ;;  %v5630_v44 = vpop.permute.xlu1 %4484 }
  0xf2   :  { %6965 = vst [vmem:[#allocation36_spill] sm:$0xff] %v5630_v44 }
  0xf3   :  { %v5636_v58 = vpop.f32.mrb[4].mxu1 }
  0xf4   :  { %v5642_v45 = vpop.f32.mrb[5].mxu1  ;;  %v5652_v5 = vpop.permute.xlu0 %4489 }
  0xf5   :  { %6966 = vst [vmem:[#allocation37_spill] sm:$0xff] %v5652_v5  ;;  %v5654_v25 = vpop.f32.mrb[6].mxu1  ;;  %v5662_v41 = vpop.permute.xlu1 %4494 }
  0xf6   :  { %v5660_v34 = vpop.f32.mrb[7].mxu1  ;;  %6967 = vst [vmem:[#allocation38_spill] sm:$0xff] %v5662_v41 }
  0xf8   :  { %v5682_v26 = vpop.permute.xlu0 %4499 }
  0xf9   :  { %6968 = vst [vmem:[#allocation39_spill] sm:$0xff] %v5682_v26  ;;  %v5689_v36 = vpop.permute.xlu1 %4504 }
  0xfa   :  { %6970 = vst [vmem:[#allocation40_spill] sm:$0xff] %v5689_v36 }
  0xfb   :  { %v5695_v19 = vpop.f32.mrb[8].mxu1 }
  0xfc   :  { %v486_v57 = vpop.f32.mrb[9].mxu1  ;;  %v5705_v31 = vpop.permute.xlu0 %4509 }
  0xfd   :  { %6971 = vst [vmem:[#allocation41_spill] sm:$0xff] %v5705_v31  ;;  %v4177_v18 = vpop.f32.mrb[10].mxu1  ;;  %v5713_v15 = vpop.permute.xlu1 %1917 }
  0xfe   :  { %v5711_v43 = vpop.f32.mrb[11].mxu1  ;;  %6972 = vst [vmem:[#allocation42_spill] sm:$0xff] %v5713_v15  ;;  %v228_v47 = vpop.f32.mrb[0].mxu0 }
  0xff   :  { %v5753_v5 = vadd.f32 %v5729_v22, %v228_v47  ;;  %v230_v14 = vpop.f32.mrb[1].mxu0 }
 0x100   :  { %v5738_v61 = vpop.permute.xlu0 %2372  ;;  %v231_v50 = vpop.f32.mrb[2].mxu0 }
 0x101   :  { %6973 = vst [vmem:[#allocation43_spill] sm:$0xff] %v5738_v61  ;;  %v5747_v44 = vpop.permute.xlu1 %4514  ;;  %v548_v59 = vadd.f32 %v4177_v18, %v5753_v5  ;;  %v5762_v47 = vadd.f32 %v5729_v22, %v231_v50  ;;  %v233_v38 = vpop.f32.mrb[3].mxu0  ;;  %v5767_v55 = vadd.f32 %v5578_v35, %v5753_v5  ;;  %v5775_v18 = vadd.f32 %v5660_v34, %v5753_v5 }
 0x102   :  { %6974 = vst [vmem:[#allocation44_spill] sm:$0xff] %v5747_v44  ;;  %v5778_v50 = vadd.f32 %v486_v57, %v5753_v5  ;;  %v4645_v57 = vld [vmem:[%s6829_s15 + $0x54] ss:$8 sps:$4 sm:$0xff]  }
 0x103   :  { %v4180_v6 = vpop.f32.mrb[12].mxu1  ;;  %6975 = vst [vmem:[#allocation45_spill] sm:$0xff] %v5775_v18  ;;  %v537_v36 = vadd.f32 %v5585_v48, %v5762_v47  ;;  %v540_v46 = vadd.f32 %v5593_v24, %v5762_v47  ;;  %3128 = vmatprep.subr.bf16.mxu1 %v4645_v57  ;;  %v4646_v24 = vld [vmem:[%s6827_s13 + $0x30] sm:$0xff]   ;;  %v4650_v57 = vld [vmem:[%s6827_s13 + $0x38] sm:$0xff]  }
 0x104   :  { %v502_v20 = vpop.f32.mrb[13].mxu1  ;;  %v551_v14 = vadd.f32 %v4180_v6, %v5753_v5  ;;  %6976 = vst [vmem:[#allocation46_spill] sm:$0xff] %v5778_v50  ;;  %v572_v6 = vmul.f32 0.1, %v548_v59  ;;  %v5790_v50 = vpop.permute.xlu0 %2827  ;;  %3274 = vmatpush1.bf16.msra.mxu0 %v4646_v24 }
 0x105   :  { %v4181_v12 = vpop.f32.mrb[14].mxu1  ;;  %v549_v31 = vadd.f32 %v502_v20, %v5762_v47  ;;  %6977 = vst [vmem:[#allocation47_spill] sm:$0xff] %v5790_v50  ;;  %v564_v21 = vmul.f32 0.1, %v540_v46  ;;  %3275 = vmatprep.subr.bf16.mxu0 %v6969_v40 }
 0x106   :  { %v5769_v26 = vpop.f32.mrb[15].mxu1  ;;  %v575_v38 = vmul.f32 0.1, %v551_v14  ;;  %v552_v35 = vadd.f32 %v4181_v12, %v5762_v47  ;;  %v596_v3 = vmax.f32 %v548_v59, %v572_v6  ;;  %v236_v12 = vpop.f32.mrb[4].mxu0  ;;  %v563_v59 = vmul.f32 0.1, %v5767_v55 }
 0x107   :  { %v573_v49 = vmul.f32 0.1, %v549_v31  ;;  %v6978_v6 = vunpack.i.l.bf16 %v5461_v28  ;;  %v238_v15 = vpop.f32.mrb[5].mxu0  ;;  %v5811_v10 = vadd.f32 %v5729_v22, %v236_v12  ;;  %v5822_v22 = vadd.f32 %v5636_v58, %v5762_v47  ;;  %v4649_v58 = vld [vmem:[%s6829_s15 + $0x64] ss:$8 sps:$4 sm:$0xff]  }
 0x108   :  { %v599_v34 = vmax.f32 %v551_v14, %v575_v38  ;;  %v576_v51 = vmul.f32 0.1, %v552_v35  ;;  %v4643_v14 = vld [vmem:[%s6829_s15 + $0x50] ss:$8 sps:$4 sm:$0xff]   ;;  %v6981_v15 = vunpack.i.l.bf16 %v5475_v33  ;;  %3276 = vmatpush1.bf16.msra.mxu0 %v4650_v57 }
 0x109   :  { %v764_v38 = vmul.f32 %v6978_v6, %v596_v3  ;;  %v597_v41 = vmax.f32 %v549_v31, %v573_v49  ;;  %v239_v3 = vpop.f32.mrb[6].mxu0  ;;  %v561_v6 = vmul.f32 0.1, %v537_v36  ;;  %3129 = vmatpush1.bf16.msra.mxu1 %v4643_v14  ;;  %v6980_v49 = vunpack.i.h.bf16 %v5461_v28  ;;  %6982 = vst [vmem:[#allocation48_spill] sm:$0xff] %v5822_v22  ;;  %3277 = vmatprep.subr.bf16.mxu0 %v6969_v40 }
 0x10a   :  { %v767_v20 = vmul.f32 %v6979_v39, %v599_v34  ;;  %v600_v44 = vmax.f32 %v552_v35, %v576_v51  ;;  %v5817_v35 = vpop.f32.mrb[7].mxu0  ;;  %3130 = vmatprep.subr.bf16.mxu1 %v4649_v58  ;;  %v5883_v57 = vadd.f32 %v5695_v19, %v5811_v10  ;;  %v4651_v19 = vld [vmem:[%s6829_s15 + $0x70] ss:$8 sps:$4 sm:$0xff]  }
 0x10b   :  { %v4184_v61 = vpop.f32.mrb[16].mxu1  ;;  %v765_v51 = vmul.f32 %v6980_v49, %v597_v41  ;;  %v538_v41 = vadd.f32 %v5599_v13, %v5811_v10  ;;  %v4647_v13 = vld [vmem:[%s6829_s15 + $0x60] ss:$8 sps:$4 sm:$0xff]  }
 0x10c   :  { %v555_v48 = vadd.f32 %v4184_v61, %v5762_v47  ;;  %v5808_v17 = vpop.f32.mrb[17].mxu1  ;;  %v768_v31 = vmul.f32 %v6981_v15, %v600_v44  ;;  %v587_v61 = vmax.f32 %v5767_v55, %v563_v59  ;;  %v585_v59 = vmax.f32 %v537_v36, %v561_v6  ;;  %6994 = vst [vmem:[#allocation53_spill] sm:$0xff] %v5883_v57 }
 0x10d   :  { %v4185_v39 = vpop.f32.mrb[18].mxu1  ;;  %v5829_v44 = vadd.f32 %v765_v51, %v764_v38  ;;  %v562_v49 = vmul.f32 0.1, %v538_v41  ;;  %v541_v15 = vadd.f32 %v5642_v45, %v5811_v10  ;;  %v588_v36 = vmax.f32 %v540_v46, %v564_v21  ;;  %3131 = vmatpush1.bf16.msra.mxu1 %v4647_v13 }
 0x10e   :  { %v579_v34 = vmul.f32 0.1, %v555_v48  ;;  %v556_v12 = vadd.f32 %v4185_v39, %v5811_v10  ;;  %v521_v28 = vpop.f32.mrb[19].mxu1  ;;  %v5831_v14 = vadd.f32 %v768_v31, %v767_v20  ;;  %v6985_v20 = vunpack.i.h.bf16 %v5417_v30 }
 0x10f   :  { %6983 = vst [vmem:[#allocation49_spill] sm:$0xff] %v5829_v44  ;;  %v554_v55 = vadd.f32 %v521_v28, %v5753_v5  ;;  %v6986_v6 = vunpack.i.l.bf16 %v5419_v60  ;;  %v586_v28 = vmax.f32 %v538_v41, %v562_v49  ;;  %v565_v45 = vmul.f32 0.1, %v541_v15 }
 0x110   :  { %6984 = vst [vmem:[#allocation50_spill] sm:$0xff] %v5831_v14  ;;  %v603_v24 = vmax.f32 %v555_v48, %v579_v34  ;;  %v580_v3 = vmul.f32 0.1, %v556_v12  ;;  %v5844_v51 = vmul.f32 %v6985_v20, %v585_v59  ;;  %v244_v34 = vpop.f32.mrb[8].mxu0  ;;  %v6987_v21 = vunpack.i.h.bf16 %v5419_v60 }
 0x111   :  { %v578_v38 = vmul.f32 0.1, %v554_v55  ;;  %v755_v31 = vmul.f32 %v6986_v6, %v587_v61  ;;  %v5852_v59 = vpop.f32.mrb[9].mxu0  ;;  %v5858_v61 = vadd.f32 %v5654_v25, %v5811_v10  ;;  %v6990_v41 = vunpack.i.l.bf16 %v5487_v54 }
 0x112   :  { %v604_v39 = vmax.f32 %v556_v12, %v580_v3  ;;  %v756_v46 = vmul.f32 %v6987_v21, %v588_v36  ;;  %v5862_v12 = vadd.f32 %v5711_v43, %v5762_v47  ;;  %v6991_v3 = vunpack.i.l.bf16 %v5499_v29 }
 0x113   :  { %v602_v14 = vmax.f32 %v554_v55, %v578_v38  ;;  %v4190_v44 = vpop.f32.mrb[20].mxu1  ;;  %6988 = vst [vmem:[#allocation51_spill] sm:$0xff] %v5858_v61  ;;  %v771_v58 = vmul.f32 %v6990_v41, %v603_v24  ;;  %v247_v38 = vpop.f32.mrb[10].mxu0  ;;  %v6992_v60 = vunpack.i.l.bf16 %v5433_v1  ;;  %v6993_v25 = vunpack.i.h.bf16 %v5479_v56 }
 0x114   :  { %6989 = vst [vmem:[#allocation52_spill] sm:$0xff] %v5862_v12  ;;  %v772_v55 = vmul.f32 %v6991_v3, %v604_v39  ;;  %v1157_v49 = vadd.f32 %v4190_v44, %v5811_v10  ;;  %v1060_v13 = vpop.f32.mrb[21].mxu1  ;;  %v248_v34 = vpop.f32.mrb[11].mxu0  ;;  %v589_v24 = vmax.f32 %v541_v15, %v565_v45  ;;  %v789_v21 = vadd.f32 %v756_v46, %v755_v31  ;;  %v3895_v31 = vld [vmem:[%s6826_s12] ss:$0 sm:$0xff] }
 0x115   :  { %v5871_v20 = vmul.f32 %v6992_v60, %v586_v28  ;;  %v770_v36 = vmul.f32 %v6993_v25, %v602_v14  ;;  %v1155_v43 = vadd.f32 %v1060_v13, %v5753_v5  ;;  %v4191_v6 = vpop.f32.mrb[22].mxu1  ;;  %v4653_v28 = vld [vmem:[%s6829_s15 + $0x74] ss:$8 sps:$4 sm:$0xff]   ;;  %v5887_v14 = vadd.f32 %v5769_v26, %v5811_v10  ;;  %v4654_v26 = vld [vmem:[%s6827_s13 + $0x40] ss:$0 sps:$4 sm:$0x77]  }
 0x116   :  { %v1181_v39 = vmul.f32 0.1, %v1157_v49  ;;  %v1158_v44 = vadd.f32 %v4191_v6, %v5753_v5  ;;  %v1063_v41 = vpop.f32.mrb[23].mxu1  ;;  %v6996_v3 = vunpack.i.l.bf16 %v5447_v7  ;;  %3132 = vmatprep.subr.bf16.mxu1 %v4653_v28  ;;  %v3259_v28 = vsel %vm3257_vm3, %v4654_v26, 0  ;;  %s7136_s15 = sld [smem:[#allocation69_spill]] }
 0x117   :  { %6995 = vst [vmem:[#allocation54_spill] sm:$0xff] %v5887_v14  ;;  %v829_v15 = vadd.f32 %v771_v58, %v770_v36  ;;  %v1179_v45 = vmul.f32 0.1, %v1155_v43  ;;  %v1156_v46 = vadd.f32 %v1063_v41, %v5762_v47  ;;  %v5903_v58 = vadd.f32 %v5808_v17, %v5811_v10  ;;  %3133 = vmatpush1.bf16.msra.mxu1 %v4651_v19  ;;  %v4164_v41 = vpop.f32.mrb[12].mxu0 }
 0x118   :  { %v757_v13 = vmul.f32 %v6996_v3, %v589_v24  ;;  %v1205_v38 = vmax.f32 %v1157_v49, %v1181_v39  ;;  %v1182_v60 = vmul.f32 0.1, %v1158_v44  ;;  %3420 = vmatprep.subr.bf16.mxu1 %v6969_v40  ;;  %v5910_v48 = vadd.f32 %v3895_v31, %v5817_v35  ;;  %3278 = vmatpush1.bf16.msra.mxu0 %v3259_v28 }
 0x119   :  { %6997 = vst [vmem:[#allocation55_spill] sm:$0xff] %v5903_v58  ;;  %v830_v25 = vadd.f32 %v829_v15, %v772_v55  ;;  %v1203_v36 = vmax.f32 %v1155_v43, %v1179_v45  ;;  %v1180_v6 = vmul.f32 0.1, %v1156_v46  ;;  %v535_v43 = vadd.f32 %v4164_v41, %v5811_v10 }
 0x11a   :  { %v790_v34 = vadd.f32 %v789_v21, %v757_v13  ;;  %v1206_v39 = vmax.f32 %v1158_v44, %v1182_v60  ;;  %v438_v21 = vpop.f32.mrb[13].mxu0  ;;  %v6998_v15 = vunpack.i.l.bf16 %v5469_v16  ;;  %v6999_v44 = vunpack.i.l.bf16 %v5427_v62 }
 0x11b   :  { %v831_v3 = vrot.slane %v830_v25, 4  ;;  %v1204_v17 = vmax.f32 %v1156_v46, %v1180_v6  ;;  %v4194_v55 = vpop.f32.mrb[24].mxu1  ;;  %v533_v26 = vadd.f32 %v438_v21, %v5753_v5  ;;  %v4165_v49 = vpop.f32.mrb[14].mxu0  ;;  %v7000_v46 = vunpack.i.h.bf16 %v5435_v52 }
 0x11c   :  { %v1373_v45 = vmul.f32 %v6998_v15, %v1205_v38  ;;  %v1374_v13 = vmul.f32 %v6999_v44, %v1206_v39  ;;  %v1161_v19 = vadd.f32 %v4194_v55, %v5753_v5  ;;  %v1076_v60 = vpop.f32.mrb[25].mxu1  ;;  %v7001_v41 = vunpack.i.l.bf16 %v5437_v2  ;;  %v441_v38 = vpop.f32.mrb[15].mxu0 }
 0x11d   :  { %v832_v35 = vadd.f32 %v831_v3, %v830_v25  ;;  %v1371_v6 = vmul.f32 %v7000_v46, %v1203_v36  ;;  %v1159_v28 = vadd.f32 %v1076_v60, %v5762_v47  ;;  %v4195_v40 = vpop.f32.mrb[26].mxu1  ;;  %v557_v44 = vmul.f32 0.1, %v533_v26 }
 0x11e   :  { %v1372_v24 = vmul.f32 %v7001_v41, %v1204_v17  ;;  %v1185_v15 = vmul.f32 0.1, %v1161_v19  ;;  %v1162_v39 = vadd.f32 %v4195_v40, %v5762_v47  ;;  %v1079_v55 = vpop.f32.mrb[27].mxu1  ;;  %v536_v56 = vadd.f32 %v4165_v49, %v5753_v5  ;;  %v5934_v12 = vpop.f32.mrb[16].mxu0 }
 0x11f   :  { %v1183_v7 = vmul.f32 0.1, %v1159_v28  ;;  %v559_v25 = vmul.f32 0.1, %v535_v43  ;;  %v791_v3 = vrot.slane %v790_v34, 4  ;;  %v581_v46 = vmax.f32 %v533_v26, %v557_v44 }
 0x120   :  { %v1395_v21 = vadd.f32 %v1372_v24, %v1371_v6  ;;  %v1209_v52 = vmax.f32 %v1161_v19, %v1185_v15  ;;  %v1186_v36 = vmul.f32 0.1, %v1162_v39  ;;  %v1160_v17 = vadd.f32 %v1079_v55, %v5811_v10 }
 0x121   :  { %v833_v41 = vrot.slane %v832_v35, 2  ;;  %v5928_v60 = vadd.f32 %v3895_v31, %v5852_v59  ;;  %v1207_v58 = vmax.f32 %v1159_v28, %v1183_v7  ;;  %v7002_v40 = vunpack.i.l.bf16 %v5429_v63  ;;  %v5938_v31 = vpop.f32.mrb[17].mxu0 }
 0x122   :  { %v1396_v1 = vadd.f32 %v1395_v21, %v1373_v45  ;;  %v1210_v57 = vmax.f32 %v1162_v39, %v1186_v36  ;;  %v7003_v24 = vunpack.i.l.bf16 %v5431_v0  ;;  %v1184_v6 = vmul.f32 0.1, %v1160_v17  ;;  %v5943_v36 = vpop.f32.mrb[18].mxu0 }
 0x123   :  { %v1377_v14 = vmul.f32 %v7002_v40, %v1209_v52  ;;  %v7004_v26 = vunpack.i.h.bf16 %v5427_v62  ;;  %v583_v44 = vmax.f32 %v535_v43, %v559_v25  ;;  %v560_v55 = vmul.f32 0.1, %v536_v56  ;;  %v4198_v59 = vpop.f32.mrb[28].mxu1  ;;  %v5945_v43 = vpop.f32.mrb[19].mxu0 }
 0x124   :  { %v749_v49 = vmul.f32 %v7003_v24, %v581_v46  ;;  %v1397_v19 = vrot.slane %v1396_v1, 4  ;;  %v7005_v7 = vunpack.i.h.bf16 %v5429_v63  ;;  %v1208_v52 = vmax.f32 %v1160_v17, %v1184_v6  ;;  %v1092_v21 = vpop.f32.mrb[29].mxu1 }
 0x125   :  { %v1375_v15 = vmul.f32 %v7004_v26, %v1207_v58  ;;  %v534_v28 = vadd.f32 %v441_v38, %v5762_v47  ;;  %v792_v39 = vadd.f32 %v791_v3, %v790_v34  ;;  %v834_v46 = vadd.f32 %v833_v41, %v832_v35  ;;  %v4199_v58 = vpop.f32.mrb[30].mxu1 }
 0x126   :  { %v1378_v45 = vmul.f32 %v7005_v7, %v1210_v57  ;;  %v1398_v40 = vadd.f32 %v1397_v19, %v1396_v1  ;;  %v584_v62 = vmax.f32 %v536_v56, %v560_v55  ;;  %v7006_v26 = vunpack.i.h.bf16 %v5437_v2  ;;  %v1095_v17 = vpop.f32.mrb[31].mxu1 }
 0x127   :  { %v1403_v24 = vadd.f32 %v1375_v15, %v1374_v13  ;;  %v558_v63 = vmul.f32 0.1, %v534_v28  ;;  %v793_v57 = vrot.slane %v792_v39, 2  ;;  %v7007_v34 = vunpack.i.l.bf16 %v5459_v53 }
 0x128   :  { %v1411_v25 = vadd.f32 %v1378_v45, %v1377_v14  ;;  %v1376_v61 = vmul.f32 %v7006_v26, %v1208_v52  ;;  %v1399_v6 = vrot.slane %v1398_v40, 2  ;;  %v7008_v3 = vunpack.i.l.bf16 %v5417_v30  ;;  %v5958_v30 = vpop.f32.mrb[20].mxu0 }
 0x129   :  { %v751_v38 = vmul.f32 %v7007_v34, %v583_v44  ;;  %v1165_v1 = vadd.f32 %v4198_v59, %v5762_v47  ;;  %v582_v13 = vmax.f32 %v534_v28, %v558_v63  ;;  %v794_v41 = vadd.f32 %v793_v57, %v792_v39 }
 0x12a   :  { %v752_v35 = vmul.f32 %v7008_v3, %v584_v62  ;;  %v1404_v56 = vadd.f32 %v1403_v24, %v1376_v61  ;;  %v1163_v14 = vadd.f32 %v1092_v21, %v5811_v10  ;;  %v835_v19 = vrot.slane %v834_v46, 1  ;;  %v5964_v21 = vpop.f32.mrb[21].mxu0 }
 0x12b   :  { %v1400_v2 = vadd.f32 %v1399_v6, %v1398_v40  ;;  %v1189_v55 = vmul.f32 0.1, %v1165_v1  ;;  %v7009_v45 = vunpack.i.h.bf16 %v5431_v0  ;;  %v795_v44 = vrot.slane %v794_v41, 1  ;;  %v5962_v39 = vpop.f32.mrb[32].mxu1  ;;  %v5968_v57 = vpop.f32.mrb[22].mxu0 }
 0x12c   :  { %v781_v15 = vadd.f32 %v5844_v51, %v752_v35  ;;  %v1405_v7 = vrot.slane %v1404_v56, 4  ;;  %v1187_v26 = vmul.f32 0.1, %v1163_v14  ;;  %v1166_v28 = vadd.f32 %v4199_v58, %v5811_v10  ;;  %v5966_v0 = vpop.f32.mrb[33].mxu1  ;;  %v5974_v58 = vpop.f32.mrb[23].mxu0 }
 0x12d   :  { %v750_v52 = vmul.f32 %v7009_v45, %v582_v13  ;;  %v1401_v62 = vrot.slane %v1400_v2, 1  ;;  %v1213_v59 = vmax.f32 %v1165_v1, %v1189_v55  ;;  %v796_v24 = vadd.f32 %v795_v44, %v794_v41  ;;  %v5972_v35 = vpop.f32.mrb[34].mxu1 }
 0x12e   :  { %v782_v61 = vadd.f32 %v781_v15, %v5871_v20  ;;  %v1406_v51 = vadd.f32 %v1405_v7, %v1404_v56  ;;  %v1211_v63 = vmax.f32 %v1163_v14, %v1187_v26  ;;  %v5970_v6 = vadd.f32 %v835_v19, %v834_v46  ;;  %v5982_v15 = vpop.f32.mrb[35].mxu1 }
 0x12f   :  { %v773_v40 = vadd.f32 %v750_v52, %v749_v49  ;;  %v1402_v34 = vadd.f32 %v1401_v62, %v1400_v2  ;;  %v1190_v20 = vmul.f32 0.1, %v1166_v28  ;;  %v7010_v56 = vrot.slane %v5501_v23, 2 }
 0x130   :  { %v783_v3 = vrot.slane %v782_v61, 4  ;;  %v1407_v1 = vrot.slane %v1406_v51, 2  ;;  %v7011_v41 = vunpack.i.h.bf16 %v5452_v9  ;;  %v7012_v2 = vunpack.i.h.bf16 %v5445_v27 }
 0x131   :  { %v774_v13 = vadd.f32 %v773_v40, %v751_v38  ;;  %v5978_v49 = vmul.f32 %v7010_v56, %v796_v24  ;;  %v1479_v46 = vmul.f32 %v5503_v32, %v1402_v34  ;;  %v1700_v7 = vadd.f32 %v5934_v12, %v5910_v48 }
 0x132   :  { %v1379_v14 = vmul.f32 %v7011_v41, %v1211_v63  ;;  %v784_v19 = vadd.f32 %v783_v3, %v782_v61  ;;  %v1381_v55 = vmul.f32 %v7012_v2, %v1213_v59  ;;  %v1408_v38 = vadd.f32 %v1407_v1, %v1406_v51  ;;  %v5993_v59 = vpop.f32.mrb[24].mxu0 }
 0x133   :  { %v775_v45 = vrot.slane %v774_v13, 4  ;;  %v1214_v44 = vmax.f32 %v1166_v28, %v1190_v20  ;;  %v1716_v40 = vmul.f32 0.1, %v1700_v7  ;;  %v1164_v24 = vadd.f32 %v1095_v17, %v5753_v5  ;;  %v5997_v28 = vpop.f32.mrb[36].mxu1  ;;  %v5999_v20 = vpop.f32.mrb[25].mxu0 }
 0x134   :  { %v1412_v52 = vadd.f32 %v1411_v25, %v1379_v14  ;;  %v785_v26 = vrot.slane %v784_v19, 2  ;;  %v1409_v63 = vrot.slane %v1408_v38, 1  ;;  %v1698_v61 = vadd.f32 %v5938_v31, %v5910_v48  ;;  %v6001_v14 = vpop.f32.mrb[37].mxu1  ;;  %v6003_v31 = vpop.f32.mrb[26].mxu0 }
 0x135   :  { %v776_v34 = vadd.f32 %v775_v45, %v774_v13  ;;  %v1732_v12 = vmax.f32 %v1700_v7, %v1716_v40  ;;  %v1188_v51 = vmul.f32 0.1, %v1164_v24  ;;  %v1701_v25 = vadd.f32 %v5943_v36, %v5928_v60  ;;  %7013 = vst [vmem:[#allocation56_spill] sm:$0xff] %v6003_v31  ;;  %v6007_v36 = vpop.f32.mrb[38].mxu1  ;;  %v6009_v40 = vpop.f32.mrb[27].mxu0 }
 0x136   :  { %v1413_v56 = vrot.slane %v1412_v52, 4  ;;  %v786_v3 = vadd.f32 %v785_v26, %v784_v19  ;;  %v1410_v1 = vadd.f32 %v1409_v63, %v1408_v38  ;;  %v1714_v41 = vmul.f32 0.1, %v1698_v61  ;;  %7015 = vst [vmem:[#allocation57_spill] sm:$0xff] %v6009_v40  ;;  %v6015_v53 = vpop.f32.mrb[39].mxu1 }
 0x137   :  { %v777_v17 = vrot.slane %v776_v34, 2  ;;  %v7014_v19 = vunpack.i.h.bf16 %v5469_v16  ;;  %v1212_v45 = vmax.f32 %v1164_v24, %v1188_v51  ;;  %v1717_v26 = vmul.f32 0.1, %v1701_v25 }
 0x138   :  { %v1414_v13 = vadd.f32 %v1413_v56, %v1412_v52  ;;  %v787_v2 = vrot.slane %v786_v3, 1  ;;  %v7016_v38 = vrot.slane %v5503_v32, 1  ;;  %v7017_v56 = vunpack.i.l.bf16 %v5511_v37 }
 0x139   :  { %v1382_v7 = vmul.f32 %v7014_v19, %v1214_v44  ;;  %v778_v62 = vadd.f32 %v777_v17, %v776_v34  ;;  %v7018_v16 = vunpack.i.l.bf16 %v5445_v27  ;;  %v1733_v24 = vmax.f32 %v1701_v25, %v1717_v26 }
 0x13a   :  { %v1480_v63 = vmul.f32 %v7016_v38, %v1410_v1  ;;  %v1415_v52 = vrot.slane %v1414_v13, 2  ;;  %v1844_v9 = vmul.f32 %v7017_v56, %v1732_v12  ;;  %v788_v22 = vadd.f32 %v787_v2, %v786_v3 }
 0x13b   :  { %v1380_v44 = vmul.f32 %v7018_v16, %v1212_v45  ;;  %v1699_v51 = vadd.f32 %v5945_v43, %v5928_v60  ;;  %v779_v29 = vrot.slane %v778_v62, 1  ;;  %v1730_v31 = vmax.f32 %v1698_v61, %v1714_v41  ;;  %v6030_v43 = vpop.f32.mrb[28].mxu0 }
 0x13c   :  { %v1495_v19 = vrot.slane %v1480_v63, 7  ;;  %v1416_v40 = vadd.f32 %v1415_v52, %v1414_v13  ;;  %v7019_v34 = vrot.slane %v5501_v23, 1  ;;  %v7020_v12 = vunpack.i.h.bf16 %v5511_v37 }
 0x13d   :  { %v1419_v17 = vadd.f32 %v1381_v55, %v1380_v44  ;;  %v1715_v56 = vmul.f32 0.1, %v1699_v51  ;;  %v780_v27 = vadd.f32 %v779_v29, %v778_v62  ;;  %v6028_v25 = vadd.f32 %v5962_v39, %v5811_v10  ;;  %v6034_v55 = vpop.f32.mrb[29].mxu0 }
 0x13e   :  { %v858_v1 = vmul.f32 %v7019_v34, %v788_v22  ;;  %v1845_v38 = vmul.f32 %v7020_v12, %v1733_v24  ;;  %v1496_v3 = vsel %vm874_vm4, %v1495_v19, %v1479_v46  ;;  %v1417_v2 = vrot.slane %v1416_v40, 1  ;;  %v6032_v22 = vpop.f32.mrb[40].mxu1  ;;  %v6043_v63 = vpop.f32.mrb[30].mxu0 }
 0x13f   :  { %v1420_v61 = vadd.f32 %v1419_v17, %v1382_v7  ;;  %v1731_v45 = vmax.f32 %v1699_v51, %v1715_v56  ;;  %v857_v37 = vmul.f32 %v5501_v23, %v780_v27  ;;  %v7021_v29 = vunpack.i.l.bf16 %v5523_v4  ;;  %v6041_v62 = vpop.f32.mrb[41].mxu1 }
 0x140   :  { %v873_v13 = vrot.slane %v858_v1, 7  ;;  %v1865_v41 = vadd.f32 %v1845_v38, %v1844_v9  ;;  %v1418_v26 = vadd.f32 %v1417_v2, %v1416_v40  ;;  %v1167_v39 = vadd.f32 %v5966_v0, %v5753_v5  ;;  %v6049_v24 = vpop.f32.mrb[42].mxu1  ;;  %v6051_v40 = vpop.f32.mrb[31].mxu0 }
 0x141   :  { %v1842_v46 = vmul.f32 %v7021_v29, %v1730_v31  ;;  %v1421_v7 = vrot.slane %v1420_v61, 4  ;;  %v7022_v52 = vunpack.i.h.bf16 %v5523_v4  ;;  %v1170_v44 = vadd.f32 %v5972_v35, %v5753_v5  ;;  %v6057_v1 = vpop.f32.mrb[43].mxu1 }
 0x142   :  { %v1866_v9 = vrot.slane %v1865_v41, 4  ;;  %v875_v31 = vsel %vm874_vm4, %v873_v13, %v857_v37  ;;  %v7023_v0 = vrot.slane %v5503_v32, 2  ;;  %v1193_v19 = vmul.f32 0.1, %v6028_v25 }
 0x143   :  { %v1843_v16 = vmul.f32 %v7022_v52, %v1731_v45  ;;  %v1191_v34 = vmul.f32 0.1, %v1167_v39  ;;  %v7024_v4 = vrot.slane %v5978_v49, 6  ;;  %v1422_v35 = vadd.f32 %v1421_v7, %v1420_v61 }
 0x144   :  { %v1481_v51 = vmul.f32 %v7023_v0, %v1418_v26  ;;  %v1867_v12 = vadd.f32 %v1866_v9, %v1865_v41  ;;  %v7026_v27 = vrot.slane %v5501_v23, 7  ;;  %v1194_v45 = vmul.f32 0.1, %v1170_v44  ;;  %v6081_v0 = vpop.f32.mrb[44].mxu1 }
 0x145   :  { %v6062_v17 = vsel %vm877_vm5, %v7024_v4, %v875_v31  ;;  %v1858_v38 = vadd.f32 %v1843_v16, %v1842_v46  ;;  %v1423_v37 = vrot.slane %v1422_v35, 2  ;;  %v1704_v49 = vadd.f32 %v5958_v30, %v5910_v48  ;;  %v6076_v46 = vpop.f32.mrb[32].mxu0 }
 0x146   :  { %7025 = vst [vmem:[#allocation58_spill] sm:$0xff] %v6062_v17  ;;  %v6068_v2 = vmul.f32 %v7026_v27, %v5970_v6  ;;  %v1497_v13 = vrot.slane %v1481_v51, 6  ;;  %v1868_v26 = vrot.slane %v1867_v12, 2  ;;  %v1217_v61 = vmax.f32 %v6028_v25, %v1193_v19  ;;  %v6083_v51 = vpop.f32.mrb[33].mxu0  ;;  %v6090_v19 = vpop.f32.mrb[45].mxu1 }
 0x147   :  { %v1859_v29 = vrot.slane %v1858_v38, 4  ;;  %v1168_v41 = vadd.f32 %v5982_v15, %v5762_v47  ;;  %v6079_v6 = vmul.f32 0.1, %v5775_v18  ;;  %v1424_v7 = vadd.f32 %v1423_v37, %v1422_v35  ;;  %v6092_v4 = vpop.f32.mrb[34].mxu0  ;;  %v6094_v27 = vpop.f32.mrb[46].mxu1 }
 0x148   :  { %7027 = vst [vmem:[#allocation59_spill] sm:$0xff] %v6068_v2  ;;  %v1498_v52 = vsel %vm877_vm5, %v1497_v13, %v1496_v3  ;;  %v1215_v16 = vmax.f32 %v1167_v39, %v1191_v34  ;;  %v1720_v31 = vmul.f32 0.1, %v1704_v49  ;;  %v1702_v15 = vadd.f32 %v5964_v21, %v5910_v48  ;;  %v6096_v13 = vpop.f32.mrb[35].mxu0  ;;  %v6100_v30 = vpop.f32.mrb[47].mxu1 }
 0x149   :  { %7028 = vst [vmem:[#allocation60_spill] sm:$0xff] %v6079_v6  ;;  %v1860_v9 = vadd.f32 %v1859_v29, %v1858_v38  ;;  %v1192_v3 = vmul.f32 0.1, %v1168_v41  ;;  %v1705_v25 = vadd.f32 %v5968_v57, %v5928_v60  ;;  %v1425_v39 = vrot.slane %v1424_v7, 1 }
 0x14a   :  { %v1869_v34 = vadd.f32 %v1868_v26, %v1867_v12  ;;  %v1218_v35 = vmax.f32 %v1170_v44, %v1194_v45  ;;  %v1736_v38 = vmax.f32 %v1704_v49, %v1720_v31  ;;  %v1718_v29 = vmul.f32 0.1, %v1702_v15 }
 0x14b   :  { %v1216_v37 = vmax.f32 %v1168_v41, %v1192_v3  ;;  %v1721_v56 = vmul.f32 0.1, %v1705_v25  ;;  %v1703_v21 = vadd.f32 %v5974_v58, %v5928_v60  ;;  %v1426_v57 = vadd.f32 %v1425_v39, %v1424_v7 }
 0x14c   :  { %v1861_v2 = vrot.slane %v1860_v9, 2  ;;  %v7029_v17 = vunpack.i.h.bf16 %v5475_v33  ;;  %v7030_v44 = vunpack.i.l.bf16 %v5454_v11  ;;  %v7031_v45 = vunpack.i.h.bf16 %v5454_v11 }
 0x14d   :  { %v1734_v49 = vmax.f32 %v1702_v15, %v1718_v29  ;;  %v1737_v41 = vmax.f32 %v1705_v25, %v1721_v56  ;;  %v1719_v31 = vmul.f32 0.1, %v1703_v21  ;;  %v7032_v3 = vrot.slane %v5503_v32, 3  ;;  %v6118_v56 = vpop.f32.mrb[36].mxu0  ;;  %v7036_v29 = vld [vmem:[#allocation23_spill] sm:$0xff] }
 0x14e   :  { %v1385_v23 = vmul.f32 %v7029_v17, %v1217_v61  ;;  %v1383_v12 = vmul.f32 %v7030_v44, %v1215_v16  ;;  %v1384_v26 = vmul.f32 %v7031_v45, %v1216_v37  ;;  %v1870_v58 = vrot.slane %v1869_v34, 1 }
 0x14f   :  { %v1482_v18 = vmul.f32 %v7032_v3, %v1426_v57  ;;  %v7033_v6 = vunpack.i.l.bf16 %v5471_v8  ;;  %v1173_v33 = vadd.f32 %v5997_v28, %v5753_v5  ;;  %v7034_v17 = vunpack.i.l.bf16 %v5528_v42 }
 0x150   :  { %v1427_v16 = vadd.f32 %v1384_v26, %v1383_v12  ;;  %v7035_v11 = vunpack.i.h.bf16 %v5528_v42  ;;  %v1735_v15 = vmax.f32 %v1703_v21, %v1719_v31  ;;  %v1862_v37 = vadd.f32 %v1861_v2, %v1860_v9 }
 0x151   :  { %v1386_v7 = vmul.f32 %v7033_v6, %v1218_v35  ;;  %v1848_v61 = vmul.f32 %v7034_v17, %v1736_v38  ;;  %v1499_v25 = vrot.slane %v1482_v18, 5  ;;  %v7037_v57 = vunpack.i.l.bf16 %v7036_v29  ;;  %v6122_v6 = vpop.f32.mrb[48].mxu1  ;;  %v6124_v35 = vpop.f32.mrb[37].mxu0 }
 0x152   :  { %v1849_v39 = vmul.f32 %v7035_v11, %v1737_v41  ;;  %v1197_v45 = vmul.f32 0.1, %v1173_v33  ;;  %v1428_v28 = vadd.f32 %v1427_v16, %v1385_v23  ;;  %v7038_v38 = vunpack.i.h.bf16 %v7036_v29  ;;  %v6130_v21 = vpop.f32.mrb[49].mxu1  ;;  %v6132_v18 = vpop.f32.mrb[38].mxu0 }
 0x153   :  { %v1846_v44 = vmul.f32 %v7037_v57, %v1734_v49  ;;  %v1171_v42 = vadd.f32 %v6001_v14, %v5762_v47  ;;  %7039 = vst [vmem:[#allocation23_spill] sm:$0xff] %v6132_v18  ;;  %v6135_v2 = vsel %vm880_vm6, %v1499_v25, %v1498_v52  ;;  %v1871_v9 = vadd.f32 %v1870_v58, %v1869_v34  ;;  %v6139_v23 = vpop.f32.mrb[50].mxu1  ;;  %v6141_v41 = vpop.f32.mrb[39].mxu0  ;;  %v7042_v25 = vld [vmem:[#allocation16_spill] sm:$0xff] }
 0x154   :  { %v1879_v3 = vadd.f32 %v1849_v39, %v1848_v61  ;;  %v1847_v12 = vmul.f32 %v7038_v38, %v1735_v15  ;;  %7040 = vst [vmem:[#allocation61_spill] sm:$0xff] %v6135_v2  ;;  %v1221_v26 = vmax.f32 %v1173_v33, %v1197_v45  ;;  %v1174_v49 = vadd.f32 %v6007_v36, %v5762_v47  ;;  %v6143_v16 = vpop.f32.mrb[51].mxu1  ;;  %v6155_v18 = vpop.f32.mrb[40].mxu0 }
 0x155   :  { %7041 = vst [vmem:[#allocation62_spill] sm:$0xff] %v6141_v41  ;;  %v1429_v31 = vrot.slane %v1428_v28, 4  ;;  %v1195_v14 = vmul.f32 0.1, %v1171_v42  ;;  %v1863_v11 = vrot.slane %v1862_v37, 1  ;;  %v1708_v52 = vadd.f32 %v5993_v59, %v5910_v48 }
 0x156   :  { %v1880_v17 = vrot.slane %v1879_v3, 4  ;;  %v1872_v61 = vadd.f32 %v1847_v12, %v1846_v44  ;;  %v1198_v39 = vmul.f32 0.1, %v1174_v49  ;;  %v1172_v34 = vadd.f32 %v6015_v53, %v5811_v10 }
 0x157   :  { %v1430_v58 = vadd.f32 %v1429_v31, %v1428_v28  ;;  %v1219_v15 = vmax.f32 %v1171_v42, %v1195_v14  ;;  %v7043_v29 = vunpack.i.l.bf16 %v7042_v25  ;;  %v1706_v38 = vadd.f32 %v5999_v20, %v5910_v48 }
 0x158   :  { %v1881_v36 = vadd.f32 %v1880_v17, %v1879_v3  ;;  %v1873_v33 = vrot.slane %v1872_v61, 4  ;;  %v1222_v45 = vmax.f32 %v1174_v49, %v1198_v39  ;;  %v1196_v44 = vmul.f32 0.1, %v1172_v34  ;;  %v6161_v49 = vpop.f32.mrb[41].mxu0 }
 0x159   :  { %v1389_v57 = vmul.f32 %v7043_v29, %v1221_v26  ;;  %v1431_v12 = vrot.slane %v1430_v58, 2  ;;  %v7044_v59 = vunpack.i.h.bf16 %v5471_v8  ;;  %v7045_v53 = vunpack.i.h.bf16 %v7042_v25  ;;  %v6159_v26 = vpop.f32.mrb[52].mxu1  ;;  %v6165_v8 = vpop.f32.mrb[42].mxu0 }
 0x15a   :  { %v1882_v2 = vrot.slane %v1881_v36, 2  ;;  %v1874_v41 = vadd.f32 %v1873_v33, %v1872_v61  ;;  %v1724_v3 = vmul.f32 0.1, %v1708_v52  ;;  %v1220_v42 = vmax.f32 %v1172_v34, %v1196_v44  ;;  %v6163_v61 = vpop.f32.mrb[53].mxu1  ;;  %7046 = vst [vmem:[#allocation16_spill] sm:$0xff] %v6165_v8  ;;  %v7047_v33 = vld [vmem:[#allocation42_spill] sm:$0xff] }
 0x15b   :  { %v1387_v50 = vmul.f32 %v7044_v59, %v1219_v15  ;;  %v1390_v28 = vmul.f32 %v7045_v53, %v1222_v45  ;;  %v1722_v31 = vmul.f32 0.1, %v1706_v38  ;;  %v1432_v17 = vadd.f32 %v1431_v12, %v1430_v58  ;;  %v6173_v59 = vpop.f32.mrb[54].mxu1  ;;  %v6175_v53 = vpop.f32.mrb[43].mxu0 }
 0x15c   :  { %v1883_v20 = vadd.f32 %v1882_v2, %v1881_v36  ;;  %v1875_v14 = vrot.slane %v1874_v41, 2  ;;  %v7048_v15 = vrot.slane %v7047_v33, 1  ;;  %v1864_v25 = vadd.f32 %v1863_v11, %v1862_v37  ;;  %7051 = vst [vmem:[#allocation63_spill] sm:$0xff] %v6175_v53  ;;  %v6179_v12 = vpop.f32.mrb[55].mxu1  ;;  %v7053_v37 = vld [vmem:[#allocation57_spill] sm:$0xff] }
 0x15d   :  { %v1435_v39 = vadd.f32 %v1387_v50, %v1386_v7  ;;  %v1443_v45 = vadd.f32 %v1390_v28, %v1389_v57  ;;  %v7050_v34 = vunpack.i.h.bf16 %v5487_v54  ;;  %v1433_v2 = vrot.slane %v1432_v17, 1  ;;  %v7052_v7 = vld [vmem:[#allocation56_spill] sm:$0xff] }
 0x15e   :  { %v6169_v29 = vmul.f32 %v7048_v15, %v1871_v9  ;;  %v1884_v58 = vrot.slane %v1883_v20, 1  ;;  %v1876_v50 = vadd.f32 %v1875_v14, %v1874_v41  ;;  %v1709_v36 = vadd.f32 %v7052_v7, %v5928_v60 }
 0x15f   :  { %v1388_v44 = vmul.f32 %v7050_v34, %v1220_v42  ;;  %v1740_v8 = vmax.f32 %v1708_v52, %v1724_v3  ;;  %v1707_v11 = vadd.f32 %v7053_v37, %v5928_v60  ;;  %v1177_v54 = vadd.f32 %v6032_v22, %v5762_v47  ;;  %v7056_v47 = vld [vmem:[#allocation29_spill] sm:$0xff] }
 0x160   :  { %7049 = vst [vmem:[#allocation42_spill] sm:$0xff] %v6169_v29  ;;  %v1434_v57 = vadd.f32 %v1433_v2, %v1432_v17  ;;  %v1885_v28 = vadd.f32 %v1884_v58, %v1883_v20  ;;  %v1738_v42 = vmax.f32 %v1706_v38, %v1722_v31  ;;  %v1725_v15 = vmul.f32 0.1, %v1709_v36  ;;  %v6195_v2 = vpop.f32.mrb[56].mxu1 }
 0x161   :  { %v1436_v9 = vadd.f32 %v1435_v39, %v1388_v44  ;;  %v1877_v34 = vrot.slane %v1876_v50, 1  ;;  %v1723_v41 = vmul.f32 0.1, %v1707_v11  ;;  %v1175_v14 = vadd.f32 %v6041_v62, %v5811_v10  ;;  %v6191_v44 = vpop.f32.mrb[44].mxu0 }
 0x162   :  { %v6189_v52 = vmul.f32 %v7047_v33, %v1864_v25  ;;  %v1741_v3 = vmax.f32 %v1709_v36, %v1725_v15  ;;  %v1201_v39 = vmul.f32 0.1, %v1177_v54  ;;  %7055 = vst [vmem:[#allocation57_spill] sm:$0xff] %v6191_v44  ;;  %v7057_v22 = vunpack.i.l.bf16 %v7056_v47  ;;  %v6197_v58 = vpop.f32.mrb[45].mxu0  ;;  %v7061_v15 = vld [vmem:[#allocation27_spill] sm:$0xff] }
 0x163   :  { %v1437_v53 = vrot.slane %v1436_v9, 4  ;;  %v1739_v31 = vmax.f32 %v1707_v11, %v1723_v41  ;;  %v1199_v20 = vmul.f32 0.1, %v1175_v14  ;;  %7058 = vst [vmem:[#allocation29_spill] sm:$0xff] %v6197_v58  ;;  %v7059_v62 = vrot.slane %v5503_v32, 4  ;;  %v6213_v11 = vpop.f32.mrb[46].mxu0 }
 0x164   :  { %7054 = vst [vmem:[#allocation56_spill] sm:$0xff] %v6189_v52  ;;  %v1852_v17 = vmul.f32 %v7057_v22, %v1740_v8  ;;  %v7060_v25 = vrot.slane %v7047_v33, 3  ;;  %v7062_v7 = vunpack.i.l.bf16 %v7061_v15  ;;  %v7063_v8 = vunpack.i.h.bf16 %v7056_v47  ;;  %7064 = vst [vmem:[#allocation27_spill] sm:$0xff] %v6213_v11  ;;  %v7068_v47 = vld [vmem:[#allocation19_spill] sm:$0xff] }
 0x165   :  { %v1438_v38 = vadd.f32 %v1437_v53, %v1436_v9  ;;  %v6201_v37 = vmul.f32 %v7059_v62, %v1434_v57  ;;  %v6211_v9 = vpop.f32.mrb[57].mxu1  ;;  %v1878_v41 = vadd.f32 %v1877_v34, %v1876_v50  ;;  %v7065_v52 = vunpack.i.h.bf16 %v7061_v15 }
 0x166   :  { %v6205_v36 = vmul.f32 %v7060_v25, %v1885_v28  ;;  %v1850_v29 = vmul.f32 %v7062_v7, %v1738_v42  ;;  %v1853_v53 = vmul.f32 %v7063_v8, %v1741_v3  ;;  %v1223_v62 = vmax.f32 %v1175_v14, %v1199_v20  ;;  %v6217_v58 = vpop.f32.mrb[58].mxu1  ;;  %v6219_v28 = vpop.f32.mrb[47].mxu0 }
 0x167   :  { %v1439_v22 = vrot.slane %v1438_v38, 2  ;;  %v1851_v57 = vmul.f32 %v7065_v52, %v1739_v31  ;;  %7066 = vst [vmem:[#allocation64_spill] sm:$0xff] %v6219_v28  ;;  %v1225_v44 = vmax.f32 %v1177_v54, %v1201_v39  ;;  %v1178_v42 = vadd.f32 %v6049_v24, %v5811_v10  ;;  %v6225_v3 = vpop.f32.mrb[59].mxu1 }
 0x168   :  { %v1893_v25 = vadd.f32 %v1853_v53, %v1852_v17  ;;  %v1712_v7 = vadd.f32 %v6030_v43, %v5910_v48  ;;  %7067 = vst [vmem:[#allocation65_spill] sm:$0xff] %v6225_v3  ;;  %v7069_v15 = vunpack.i.h.bf16 %v7068_v47  ;;  %v1176_v14 = vadd.f32 %v6057_v1, %v5753_v5 }
 0x169   :  { %v1440_v50 = vadd.f32 %v1439_v22, %v1438_v38  ;;  %v1886_v34 = vadd.f32 %v1851_v57, %v1850_v29  ;;  %v1202_v20 = vmul.f32 0.1, %v1178_v42  ;;  %v1710_v54 = vadd.f32 %v6034_v55, %v5910_v48  ;;  %v7071_v55 = vld [vmem:[#allocation18_spill] sm:$0xff] }
 0x16a   :  { %v1391_v52 = vmul.f32 %v7069_v15, %v1223_v62  ;;  %v1894_v31 = vrot.slane %v1893_v25, 4  ;;  %v1728_v17 = vmul.f32 0.1, %v1712_v7  ;;  %v1200_v43 = vmul.f32 0.1, %v1176_v14 }
 0x16b   :  { %v1441_v10 = vrot.slane %v1440_v50, 1  ;;  %v1887_v24 = vrot.slane %v1886_v34, 4  ;;  %v1226_v53 = vmax.f32 %v1178_v42, %v1202_v20  ;;  %v1726_v29 = vmul.f32 0.1, %v1710_v54 }
 0x16c   :  { %v1444_v39 = vadd.f32 %v1443_v45, %v1391_v52  ;;  %v1895_v8 = vadd.f32 %v1894_v31, %v1893_v25  ;;  %v1744_v38 = vmax.f32 %v1712_v7, %v1728_v17  ;;  %v1224_v15 = vmax.f32 %v1176_v14, %v1200_v43  ;;  %v7073_v25 = vld [vmem:[#allocation20_spill] sm:$0xff] }
 0x16d   :  { %v1888_v57 = vadd.f32 %v1887_v24, %v1886_v34  ;;  %v7070_v5 = vrot.slane %v7047_v33, 2  ;;  %v1442_v28 = vadd.f32 %v1441_v10, %v1440_v50  ;;  %v7072_v47 = vunpack.i.h.bf16 %v7071_v55  ;;  %v7076_v34 = vld [vmem:[#allocation33_spill] sm:$0xff] }
 0x16e   :  { %v1445_v62 = vrot.slane %v1444_v39, 4  ;;  %v1896_v11 = vrot.slane %v1895_v8, 2  ;;  %v7074_v42 = vunpack.i.h.bf16 %v7073_v25  ;;  %v7075_v31 = vunpack.i.l.bf16 %v7071_v55 }
 0x16f   :  { %v6236_v1 = vmul.f32 %v7070_v5, %v1878_v41  ;;  %v1393_v3 = vmul.f32 %v7072_v47, %v1225_v44  ;;  %v1889_v45 = vrot.slane %v1888_v57, 2  ;;  %v7077_v17 = vunpack.i.l.bf16 %v7076_v34 }
 0x170   :  { %v1446_v52 = vadd.f32 %v1445_v62, %v1444_v39  ;;  %v1394_v7 = vmul.f32 %v7074_v42, %v1226_v53  ;;  %v1392_v20 = vmul.f32 %v7075_v31, %v1224_v15  ;;  %v1742_v24 = vmax.f32 %v1710_v54, %v1726_v29 }
 0x171   :  { %v1856_v14 = vmul.f32 %v7077_v17, %v1744_v38  ;;  %v1713_v41 = vadd.f32 %v6043_v63, %v5928_v60  ;;  %v1711_v50 = vadd.f32 %v6051_v40, %v5928_v60  ;;  %v1897_v10 = vadd.f32 %v1896_v11, %v1895_v8  ;;  %v7079_v40 = vld [vmem:[#allocation31_spill] sm:$0xff] }
 0x172   :  { %v1890_v44 = vadd.f32 %v1889_v45, %v1888_v57  ;;  %v1447_v47 = vrot.slane %v1446_v52, 2  ;;  %v1451_v39 = vadd.f32 %v1393_v3, %v1392_v20  ;;  %v7078_v43 = vrot.slane %v5503_v32, 5 }
 0x173   :  { %v1729_v62 = vmul.f32 0.1, %v1713_v41  ;;  %v1727_v15 = vmul.f32 0.1, %v1711_v50  ;;  %v2610_v38 = vadd.f32 %v6081_v0, %v5910_v48  ;;  %v2608_v63 = vadd.f32 %v6090_v19, %v5910_v48 }
 0x174   :  { %v6252_v53 = vmul.f32 %v7078_v43, %v1442_v28  ;;  %v1891_v54 = vrot.slane %v1890_v44, 1  ;;  %v1448_v29 = vadd.f32 %v1447_v47, %v1446_v52  ;;  %v1452_v5 = vadd.f32 %v1451_v39, %v1394_v7 }
 0x175   :  { %v7080_v11 = vunpack.i.l.bf16 %v7079_v40  ;;  %v1745_v57 = vmax.f32 %v1713_v41, %v1729_v62  ;;  %v1743_v3 = vmax.f32 %v1711_v50, %v1727_v15  ;;  %v2626_v55 = vmul.f32 0.1, %v2610_v38 }
 0x176   :  { %v1898_v45 = vrot.slane %v1897_v10, 1  ;;  %v1892_v28 = vadd.f32 %v1891_v54, %v1890_v44  ;;  %v1449_v25 = vrot.slane %v1448_v29, 1  ;;  %v1453_v42 = vrot.slane %v1452_v5, 4 }
 0x177   :  { %v1854_v8 = vmul.f32 %v7080_v11, %v1742_v24  ;;  %v7081_v31 = vunpack.i.h.bf16 %v7076_v34  ;;  %v7082_v0 = vunpack.i.h.bf16 %v7079_v40  ;;  %v2624_v7 = vmul.f32 0.1, %v2608_v63 }
 0x178   :  { %v2155_v19 = vadd.f32 %v6076_v46, %v5910_v48  ;;  %v1454_v41 = vadd.f32 %v1453_v42, %v1452_v5  ;;  %v2642_v50 = vmax.f32 %v2610_v38, %v2626_v55  ;;  %v1450_v47 = vadd.f32 %v1449_v25, %v1448_v29 }
 0x179   :  { %v1857_v20 = vmul.f32 %v7081_v31, %v1745_v57  ;;  %v1855_v52 = vmul.f32 %v7082_v0, %v1743_v3  ;;  %v6269_v34 = vadd.f32 %v1898_v45, %v1897_v10  ;;  %v7083_v62 = vrot.slane %v7047_v33, 4  ;;  %v7084_v3 = vld [vmem:[#allocation35_spill] sm:$0xff] }
 0x17a   :  { %v1455_v54 = vrot.slane %v1454_v41, 2  ;;  %v2171_v40 = vmul.f32 0.1, %v2155_v19  ;;  %v2640_v57 = vmax.f32 %v2608_v63, %v2624_v7  ;;  %v2611_v5 = vadd.f32 %v6094_v27, %v5928_v60 }
 0x17b   :  { %v1907_v39 = vadd.f32 %v1857_v20, %v1856_v14  ;;  %v1900_v43 = vadd.f32 %v1855_v52, %v1854_v8  ;;  %v6273_v15 = vmul.f32 %v7083_v62, %v1892_v28  ;;  %v7085_v55 = vunpack.i.l.bf16 %v7084_v3 }
 0x17c   :  { %v1456_v38 = vadd.f32 %v1455_v54, %v1454_v41  ;;  %v2153_v14 = vadd.f32 %v6083_v51, %v5910_v48  ;;  %v2609_v10 = vadd.f32 %v6100_v30, %v5928_v60  ;;  %v7086_v8 = vrot.slane %v5503_v32, 6 }
 0x17d   :  { %v1908_v46 = vrot.slane %v1907_v39, 4  ;;  %v1901_v11 = vrot.slane %v1900_v43, 4  ;;  %v2754_v29 = vmul.f32 %v7085_v55, %v2642_v50  ;;  %v2627_v63 = vmul.f32 0.1, %v2611_v5 }
 0x17e   :  { %v6285_v45 = vmul.f32 %v7086_v8, %v1450_v47  ;;  %v2187_v42 = vmax.f32 %v2155_v19, %v2171_v40  ;;  %v2169_v31 = vmul.f32 0.1, %v2153_v14  ;;  %v2625_v27 = vmul.f32 0.1, %v2609_v10 }
 0x17f   :  { %v1909_v28 = vadd.f32 %v1908_v46, %v1907_v39  ;;  %v1902_v25 = vadd.f32 %v1901_v11, %v1900_v43  ;;  %v2156_v20 = vadd.f32 %v6092_v4, %v5928_v60  ;;  %v1457_v0 = vrot.slane %v1456_v38, 1  ;;  %v7087_v39 = vld [vmem:[#allocation37_spill] sm:$0xff]  ;;  %v7090_v11 = vld [vmem:[#allocation22_spill] sm:$0xff] }
 0x180   :  { %v2643_v7 = vmax.f32 %v2611_v5, %v2627_v63  ;;  %v2154_v51 = vadd.f32 %v6096_v13, %v5928_v60  ;;  %v2641_v50 = vmax.f32 %v2609_v10, %v2625_v27  ;;  %v7088_v43 = vunpack.i.l.bf16 %v7087_v39 }
 0x181   :  { %v1910_v52 = vrot.slane %v1909_v28, 2  ;;  %v1903_v41 = vrot.slane %v1902_v25, 2  ;;  %v2172_v47 = vmul.f32 0.1, %v2156_v20  ;;  %v7089_v19 = vunpack.i.h.bf16 %v7084_v3 }
 0x182   :  { %v2752_v62 = vmul.f32 %v7088_v43, %v2640_v57  ;;  %v2185_v40 = vmax.f32 %v2153_v14, %v2169_v31  ;;  %v2170_v46 = vmul.f32 0.1, %v2154_v51  ;;  %v7091_v5 = vunpack.i.l.bf16 %v7090_v11 }
 0x183   :  { %v2755_v54 = vmul.f32 %v7089_v19, %v2643_v7  ;;  %v7092_v13 = vunpack.i.h.bf16 %v7087_v39  ;;  %v2188_v63 = vmax.f32 %v2156_v20, %v2172_v47  ;;  %v1458_v30 = vadd.f32 %v1457_v0, %v1456_v38  ;;  %v7094_v19 = vld [vmem:[#allocation25_spill] sm:$0xff] }
 0x184   :  { %v2299_v55 = vmul.f32 %v7091_v5, %v2187_v42  ;;  %v6301_v10 = vadd.f32 %v1910_v52, %v1909_v28  ;;  %v2186_v17 = vmax.f32 %v2154_v51, %v2170_v46  ;;  %v1904_v57 = vadd.f32 %v1903_v41, %v1902_v25 }
 0x185   :  { %v2753_v8 = vmul.f32 %v7092_v13, %v2641_v50  ;;  %v2775_v27 = vadd.f32 %v2755_v54, %v2754_v29  ;;  %v7093_v3 = vunpack.i.h.bf16 %v7090_v11  ;;  %v2614_v31 = vadd.f32 %v6122_v6, %v5910_v48 }
 0x186   :  { %v7095_v42 = vunpack.i.l.bf16 %v7094_v19  ;;  %v7096_v50 = vunpack.i.h.bf16 %v7094_v19  ;;  %v2612_v38 = vadd.f32 %v6130_v21, %v5910_v48  ;;  %v2159_v0 = vadd.f32 %v6118_v56, %v5910_v48 }
 0x187   :  { %v2768_v43 = vadd.f32 %v2753_v8, %v2752_v62  ;;  %v2300_v14 = vmul.f32 %v7093_v3, %v2188_v63  ;;  %v2776_v7 = vrot.slane %v2775_v27, 4  ;;  %v2630_v25 = vmul.f32 0.1, %v2614_v31 }
 0x188   :  { %v2297_v5 = vmul.f32 %v7095_v42, %v2185_v40  ;;  %v2298_v20 = vmul.f32 %v7096_v50, %v2186_v17  ;;  %v2628_v41 = vmul.f32 0.1, %v2612_v38  ;;  %v2615_v6 = vadd.f32 %v6139_v23, %v5928_v60 }
 0x189   :  { %v2769_v29 = vrot.slane %v2768_v43, 4  ;;  %v2320_v28 = vadd.f32 %v2300_v14, %v2299_v55  ;;  %v2777_v52 = vadd.f32 %v2776_v7, %v2775_v27  ;;  %v7097_v47 = vrot.slane %v5503_v32, 7 }
 0x18a   :  { %v2313_v51 = vadd.f32 %v2298_v20, %v2297_v5  ;;  %v2646_v54 = vmax.f32 %v2614_v31, %v2630_v25  ;;  %v2631_v11 = vmul.f32 0.1, %v2615_v6  ;;  %v1905_v55 = vrot.slane %v1904_v57, 1  ;;  %v7101_v25 = vld [vmem:[#allocation23_spill] sm:$0xff] }
 0x18b   :  { %v6319_v39 = vmul.f32 %v7097_v47, %v1458_v30  ;;  %v2770_v17 = vadd.f32 %v2769_v29, %v2768_v43  ;;  %v2321_v62 = vrot.slane %v2320_v28, 4  ;;  %v2778_v40 = vrot.slane %v2777_v52, 2  ;;  %v7098_v30 = vld [vmem:[#allocation38_spill] sm:$0xff] }
 0x18c   :  { %v2314_v46 = vrot.slane %v2313_v51, 4  ;;  %v2175_v8 = vmul.f32 0.1, %v2159_v0  ;;  %v2644_v3 = vmax.f32 %v2612_v38, %v2628_v41  ;;  %v2647_v23 = vmax.f32 %v2615_v6, %v2631_v11 }
 0x18d   :  { %v2771_v56 = vrot.slane %v2770_v17, 2  ;;  %v2322_v13 = vadd.f32 %v2321_v62, %v2320_v28  ;;  %v2779_v63 = vadd.f32 %v2778_v40, %v2777_v52  ;;  %v7099_v7 = vunpack.i.l.bf16 %v7098_v30 }
 0x18e   :  { %v2315_v27 = vadd.f32 %v2314_v46, %v2313_v51  ;;  %v2157_v31 = vadd.f32 %v6124_v35, %v5910_v48  ;;  %v7100_v5 = vunpack.i.h.bf16 %v7098_v30  ;;  %v2613_v20 = vadd.f32 %v6143_v16, %v5928_v60 }
 0x18f   :  { %v2772_v14 = vadd.f32 %v2771_v56, %v2770_v17  ;;  %v2323_v32 = vrot.slane %v2322_v13, 2  ;;  %v2758_v43 = vmul.f32 %v7099_v7, %v2646_v54  ;;  %v2780_v19 = vrot.slane %v2779_v63, 1 }
 0x190   :  { %v2316_v42 = vrot.slane %v2315_v27, 2  ;;  %v2759_v50 = vmul.f32 %v7100_v5, %v2647_v23  ;;  %v2191_v38 = vmax.f32 %v2159_v0, %v2175_v8  ;;  %v2160_v52 = vadd.f32 %v7101_v25, %v5928_v60  ;;  %v7104_v23 = vld [vmem:[#allocation26_spill] sm:$0xff]  ;;  %v7107_v5 = vld [vmem:[#allocation47_spill] sm:$0xff] }
 0x191   :  { %v2773_v29 = vrot.slane %v2772_v14, 1  ;;  %v2324_v28 = vadd.f32 %v2323_v32, %v2322_v13  ;;  %v2173_v6 = vmul.f32 0.1, %v2157_v31  ;;  %v2629_v47 = vmul.f32 0.1, %v2613_v20  ;;  %v7102_v13 = vld [vmem:[#allocation36_spill] sm:$0xff] }
 0x192   :  { %v2317_v51 = vadd.f32 %v2316_v42, %v2315_v27  ;;  %v2789_v41 = vadd.f32 %v2759_v50, %v2758_v43  ;;  %v2781_v17 = vadd.f32 %v2780_v19, %v2779_v63  ;;  %v2176_v54 = vmul.f32 0.1, %v2160_v52 }
 0x193   :  { %v2325_v62 = vrot.slane %v2324_v28, 1  ;;  %v6333_v40 = vadd.f32 %v1905_v55, %v1904_v57  ;;  %v2774_v46 = vadd.f32 %v2773_v29, %v2772_v14  ;;  %v2645_v16 = vmax.f32 %v2613_v20, %v2629_v47  ;;  %v7110_v20 = vld [vmem:[#allocation62_spill] sm:$0xff] }
 0x194   :  { %v2790_v11 = vrot.slane %v2789_v41, 4  ;;  %v2318_v56 = vrot.slane %v2317_v51, 1  ;;  %v7103_v0 = vunpack.i.l.bf16 %v7102_v13  ;;  %v7105_v32 = vunpack.i.l.bf16 %v7104_v23 }
 0x195   :  { %v2192_v30 = vmax.f32 %v2160_v52, %v2176_v54  ;;  %v2326_v7 = vadd.f32 %v2325_v62, %v2324_v28  ;;  %v2189_v42 = vmax.f32 %v2157_v31, %v2173_v6  ;;  %v7106_v63 = vunpack.i.h.bf16 %v7102_v13 }
 0x196   :  { %v2756_v8 = vmul.f32 %v7103_v0, %v2644_v3  ;;  %v2303_v27 = vmul.f32 %v7105_v32, %v2191_v38  ;;  %v2791_v43 = vadd.f32 %v2790_v11, %v2789_v41  ;;  %v7108_v57 = vrot.slane %v7107_v5, 1 }
 0x197   :  { %v2757_v19 = vmul.f32 %v7106_v63, %v2645_v16  ;;  %v7109_v14 = vunpack.i.h.bf16 %v7104_v23  ;;  %v2158_v3 = vadd.f32 %v7110_v20, %v5928_v60  ;;  %v2618_v29 = vadd.f32 %v6159_v26, %v5910_v48 }
 0x198   :  { %v6343_v55 = vmul.f32 %v7108_v57, %v2781_v17  ;;  %v6352_v28 = vmul.f32 %v7107_v5, %v2774_v46  ;;  %v2792_v31 = vrot.slane %v2791_v43, 2  ;;  %v2616_v25 = vadd.f32 %v6163_v61, %v5910_v48  ;;  %v7111_v17 = vld [vmem:[#allocation43_spill] sm:$0xff]  ;;  %v7113_v46 = vld [vmem:[#allocation24_spill] sm:$0xff] }
 0x199   :  { %v2304_v50 = vmul.f32 %v7109_v14, %v2192_v30  ;;  %v2782_v38 = vadd.f32 %v2757_v19, %v2756_v8  ;;  %v2319_v52 = vadd.f32 %v2318_v56, %v2317_v51  ;;  %v2174_v6 = vmul.f32 0.1, %v2158_v3 }
 0x19a   :  { %v2634_v47 = vmul.f32 0.1, %v2618_v29  ;;  %v7112_v62 = vrot.slane %v7111_v17, 1  ;;  %v2793_v11 = vadd.f32 %v2792_v31, %v2791_v43  ;;  %v2163_v26 = vadd.f32 %v6155_v18, %v5910_v48  ;;  %v7116_v31 = vld [vmem:[#allocation40_spill] sm:$0xff] }
 0x19b   :  { %v2334_v41 = vadd.f32 %v2304_v50, %v2303_v27  ;;  %v2783_v16 = vrot.slane %v2782_v38, 4  ;;  %v7114_v13 = vunpack.i.l.bf16 %v7113_v46  ;;  %v2190_v23 = vmax.f32 %v2158_v3, %v2174_v6 }
 0x19c   :  { %v6358_v54 = vmul.f32 %v7112_v62, %v2326_v7  ;;  %v2619_v61 = vadd.f32 %v6173_v59, %v5928_v60  ;;  %v2650_v32 = vmax.f32 %v2618_v29, %v2634_v47  ;;  %v2632_v27 = vmul.f32 0.1, %v2616_v25 }
 0x19d   :  { %v2301_v0 = vmul.f32 %v7114_v13, %v2189_v42  ;;  %v2335_v8 = vrot.slane %v2334_v41, 4  ;;  %v2784_v56 = vadd.f32 %v2783_v16, %v2782_v38  ;;  %v2794_v30 = vrot.slane %v2793_v11, 1 }
 0x19e   :  { %v7115_v43 = vunpack.i.h.bf16 %v7113_v46  ;;  %v2635_v19 = vmul.f32 0.1, %v2619_v61  ;;  %v6371_v42 = vmul.f32 %v7111_v17, %v2319_v52  ;;  %v2179_v14 = vmul.f32 0.1, %v2163_v26 }
 0x19f   :  { %v2336_v7 = vadd.f32 %v2335_v8, %v2334_v41  ;;  %v2785_v57 = vrot.slane %v2784_v56, 2  ;;  %v2161_v3 = vadd.f32 %v6161_v49, %v5910_v48  ;;  %v7117_v38 = vunpack.i.l.bf16 %v7116_v31 }
 0x1a0   :  { %v2302_v63 = vmul.f32 %v7115_v43, %v2190_v23  ;;  %v2651_v20 = vmax.f32 %v2619_v61, %v2635_v19  ;;  %v2648_v6 = vmax.f32 %v2616_v25, %v2632_v27  ;;  %v2617_v47 = vadd.f32 %v6179_v12, %v5928_v60  ;;  %v7119_v61 = vld [vmem:[#allocation16_spill] sm:$0xff]  ;;  %v7120_v12 = vld [vmem:[#allocation63_spill] sm:$0xff] }
 0x1a1   :  { %v2337_v50 = vrot.slane %v2336_v7, 2  ;;  %v2786_v29 = vadd.f32 %v2785_v57, %v2784_v56  ;;  %v2762_v41 = vmul.f32 %v7117_v38, %v2650_v32  ;;  %v2795_v62 = vadd.f32 %v2794_v30, %v2793_v11  ;;  %v7121_v57 = vld [vmem:[#allocation39_spill] sm:$0xff] }
 0x1a2   :  { %v2327_v59 = vadd.f32 %v2302_v63, %v2301_v0  ;;  %v7118_v46 = vunpack.i.h.bf16 %v7116_v31  ;;  %v2177_v0 = vmul.f32 0.1, %v2161_v3  ;;  %v2633_v23 = vmul.f32 0.1, %v2617_v47 }
 0x1a3   :  { %v2338_v16 = vadd.f32 %v2337_v50, %v2336_v7  ;;  %v2787_v8 = vrot.slane %v2786_v29, 1  ;;  %v2164_v49 = vadd.f32 %v7119_v61, %v5928_v60  ;;  %v2195_v63 = vmax.f32 %v2163_v26, %v2179_v14  ;;  %v7124_v14 = vld [vmem:[#allocation30_spill] sm:$0xff] }
 0x1a4   :  { %v2328_v52 = vrot.slane %v2327_v59, 4  ;;  %v2763_v13 = vmul.f32 %v7118_v46, %v2651_v20  ;;  %v2649_v27 = vmax.f32 %v2617_v47, %v2633_v23  ;;  %v2162_v11 = vadd.f32 %v7120_v12, %v5928_v60 }
 0x1a5   :  { %v2339_v56 = vrot.slane %v2338_v16, 1  ;;  %v2788_v25 = vadd.f32 %v2787_v8, %v2786_v29  ;;  %v2180_v19 = vmul.f32 0.1, %v2164_v49  ;;  %v7122_v50 = vunpack.i.l.bf16 %v7121_v57 }
 0x1a6   :  { %v2329_v43 = vadd.f32 %v2328_v52, %v2327_v59  ;;  %v2803_v32 = vadd.f32 %v2763_v13, %v2762_v41  ;;  %v2193_v38 = vmax.f32 %v2161_v3, %v2177_v0  ;;  %v7123_v46 = vunpack.i.h.bf16 %v7121_v57 }
 0x1a7   :  { %v2340_v30 = vadd.f32 %v2339_v56, %v2338_v16  ;;  %v2760_v20 = vmul.f32 %v7122_v50, %v2648_v6  ;;  %v2196_v51 = vmax.f32 %v2164_v49, %v2180_v19  ;;  %v2178_v59 = vmul.f32 0.1, %v2162_v11 }
 0x1a8   :  { %v2330_v7 = vrot.slane %v2329_v43, 2  ;;  %v2804_v31 = vrot.slane %v2803_v32, 4  ;;  %v2761_v61 = vmul.f32 %v7123_v46, %v2649_v27  ;;  %v7125_v29 = vunpack.i.l.bf16 %v7124_v14 }
 0x1a9   :  { %v2622_v52 = vadd.f32 %v6195_v2, %v5910_v48  ;;  %v7126_v16 = vrot.slane %v7107_v5, 2  ;;  %v7127_v3 = vunpack.i.h.bf16 %v7124_v14  ;;  %v2194_v0 = vmax.f32 %v2162_v11, %v2178_v59  ;;  %v7142_v59 = vld [vmem:[#allocation34_spill] sm:$0xff] }
 0x1aa   :  { %v2331_v26 = vadd.f32 %v2330_v7, %v2329_v43  ;;  %v2307_v41 = vmul.f32 %v7125_v29, %v2195_v63  ;;  %v2805_v47 = vadd.f32 %v2804_v31, %v2803_v32  ;;  %v2796_v6 = vadd.f32 %v2761_v61, %v2760_v20  ;;  %v7129_v32 = vld [vmem:[#allocation28_spill] sm:$0xff] }
 0x1ab   :  { %v6395_v13 = vmul.f32 %v7126_v16, %v2788_v25  ;;  %v2308_v8 = vmul.f32 %v7127_v3, %v2196_v51  ;;  %v7128_v23 = vrot.slane %v7111_v17, 3  ;;  %v2638_v63 = vmul.f32 0.1, %v2622_v52 }
 0x1ac   :  { %v2332_v56 = vrot.slane %v2331_v26, 1  ;;  %v2806_v43 = vrot.slane %v2805_v47, 2  ;;  %v7130_v27 = vunpack.i.l.bf16 %v7129_v32  ;;  %v2797_v2 = vrot.slane %v2796_v6, 4 }
 0x1ad   :  { %v6401_v49 = vmul.f32 %v7128_v23, %v2340_v30  ;;  %v2348_v12 = vadd.f32 %v2308_v8, %v2307_v41  ;;  %v7131_v25 = vunpack.i.h.bf16 %v7129_v32  ;;  %v7132_v57 = vrot.slane %v7107_v5, 3  ;;  %v7134_v41 = vld [vmem:[#allocation44_spill] sm:$0xff]  ;;  %v7137_v23 = vld [vmem:[#allocation57_spill] sm:$0xff] }
 0x1ae   :  { %v2305_v19 = vmul.f32 %v7130_v27, %v2193_v38  ;;  %v2333_v51 = vadd.f32 %v2332_v56, %v2331_v26  ;;  %v2807_v11 = vadd.f32 %v2806_v43, %v2805_v47  ;;  %v2654_v20 = vmax.f32 %v2622_v52, %v2638_v63  ;;  %v4656_v52 = vld [vmem:[%s7136_s15 + $0x4] ss:$8 sps:$4 sm:$0xff]   ;;  %v4658_v63 = vld [vmem:[%s7136_s15] ss:$8 sps:$4 sm:$0xff]  }
 0x1af   :  { %v2306_v7 = vmul.f32 %v7131_v25, %v2194_v0  ;;  %v6409_v50 = vmul.f32 %v7132_v57, %v2795_v62  ;;  %v2798_v31 = vadd.f32 %v2797_v2, %v2796_v6  ;;  %v2349_v46 = vrot.slane %v2348_v12, 4  ;;  %v7138_v25 = vld [vmem:[#allocation29_spill] sm:$0xff]  ;;  %4040 = vmatprep.mubr.msk.bf16.mxu0 %vm3253_vm7, %v4656_v52 }
 0x1b0   :  { %v7133_v38 = vrot.slane %v7111_v17, 2  ;;  %v2808_v29 = vrot.slane %v2807_v11, 1  ;;  %v7135_v16 = vunpack.i.l.bf16 %v7134_v41  ;;  %v2620_v47 = vadd.f32 %v6211_v9, %v5910_v48  ;;  %3294 = vmatmul.mubr.bf16.vlgmr.msra.gmra.mrb[52].mxu0 %v4658_v63 }
 0x1b1   :  { %v2341_v61 = vadd.f32 %v2306_v7, %v2305_v19  ;;  %v2799_v62 = vrot.slane %v2798_v31, 2  ;;  %v2350_v8 = vadd.f32 %v2349_v46, %v2348_v12  ;;  %v2167_v56 = vadd.f32 %v7137_v23, %v5910_v48 }
 0x1b2   :  { %v6415_v14 = vmul.f32 %v7133_v38, %v2333_v51  ;;  %v2766_v3 = vmul.f32 %v7135_v16, %v2654_v20  ;;  %v6425_v0 = vadd.f32 %v2808_v29, %v2807_v11  ;;  %v2623_v43 = vadd.f32 %v6217_v58, %v5928_v60  ;;  %v7139_v29 = vld [vmem:[#allocation65_spill] sm:$0xff] }
 0x1b3   :  { %v2342_v26 = vrot.slane %v2341_v61, 4  ;;  %v2800_v32 = vadd.f32 %v2799_v62, %v2798_v31  ;;  %v2351_v9 = vrot.slane %v2350_v8, 2  ;;  %v2636_v19 = vmul.f32 0.1, %v2620_v47 }
 0x1b4   :  { %v2183_v2 = vmul.f32 0.1, %v2167_v56  ;;  %v2639_v12 = vmul.f32 0.1, %v2623_v43  ;;  %v2165_v7 = vadd.f32 %v7138_v25, %v5910_v48  ;;  %v2621_v31 = vadd.f32 %v7139_v29, %v5928_v60 }
 0x1b5   :  { %v2343_v27 = vadd.f32 %v2342_v26, %v2341_v61  ;;  %v2801_v57 = vrot.slane %v2800_v32, 1  ;;  %v2352_v51 = vadd.f32 %v2351_v9, %v2350_v8  ;;  %v2652_v20 = vmax.f32 %v2620_v47, %v2636_v19  ;;  %v7140_v26 = vld [vmem:[#allocation41_spill] sm:$0xff] }
 0x1b6   :  { %v2199_v58 = vmax.f32 %v2167_v56, %v2183_v2  ;;  %v2655_v46 = vmax.f32 %v2623_v43, %v2639_v12  ;;  %v2181_v38 = vmul.f32 0.1, %v2165_v7  ;;  %v7141_v23 = vunpack.i.l.bf16 %v7140_v26  ;;  %v7147_v12 = vld [vmem:[#allocation32_spill] sm:$0xff] }
 0x1b7   :  { %v2344_v11 = vrot.slane %v2343_v27, 2  ;;  %v2802_v61 = vadd.f32 %v2801_v57, %v2800_v32  ;;  %v2353_v16 = vrot.slane %v2352_v51, 1  ;;  %v7143_v48 = vunpack.i.l.bf16 %v7142_v59 }
 0x1b8   :  { %v2764_v30 = vmul.f32 %v7141_v23, %v2652_v20  ;;  %v7144_v8 = vunpack.i.h.bf16 %v7134_v41  ;;  %v2197_v52 = vmax.f32 %v2165_v7, %v2181_v38  ;;  %v2637_v56 = vmul.f32 0.1, %v2621_v31  ;;  %v7150_v38 = vld [vmem:[#allocation46_spill] sm:$0xff]  ;;  %v7157_v7 = vld [vmem:[#allocation60_spill] sm:$0xff] }
 0x1b9   :  { %v2345_v62 = vadd.f32 %v2344_v11, %v2343_v27  ;;  %v6442_v25 = vmul.f32 %v7143_v48, %v2199_v58  ;;  %v7145_v43 = vrot.slane %v7107_v5, 4  ;;  %v6450_v63 = vadd.f32 %v2353_v16, %v2352_v51  ;;  %v7146_v27 = vld [vmem:[#allocation48_spill] sm:$0xff]  ;;  %v7149_v58 = vld [vmem:[#allocation51_spill] sm:$0xff] }
 0x1ba   :  { %v2767_v47 = vmul.f32 %v7144_v8, %v2655_v46  ;;  %v567_v19 = vmul.f32 0.1, %v7146_v27  ;;  %v7148_v57 = vunpack.i.l.bf16 %v7147_v12  ;;  %v2653_v20 = vmax.f32 %v2621_v31, %v2637_v56  ;;  %v7153_v8 = vld [vmem:[#allocation53_spill] sm:$0xff]  ;;  %v7156_v56 = vld [vmem:[#allocation55_spill] sm:$0xff] }
 0x1bb   :  { %v6448_v9 = vmul.f32 %v7145_v43, %v2802_v61  ;;  %v2346_v32 = vrot.slane %v2345_v62, 1  ;;  %v568_v41 = vmul.f32 0.1, %v7149_v58  ;;  %v569_v29 = vmul.f32 0.1, %v7150_v38  ;;  %v7151_v61 = vld [vmem:[#allocation52_spill] sm:$0xff] }
 0x1bc   :  { %v2817_v2 = vadd.f32 %v2767_v47, %v2766_v3  ;;  %v6455_v11 = vmul.f32 %v7148_v57, %v2197_v52  ;;  %v570_v23 = vmul.f32 0.1, %v7151_v61  ;;  %v7152_v16 = vunpack.i.h.bf16 %v7140_v26  ;;  %v7154_v47 = vld [vmem:[#allocation54_spill] sm:$0xff] }
 0x1bd   :  { %v2347_v46 = vadd.f32 %v2346_v32, %v2345_v62  ;;  %v571_v3 = vmul.f32 0.1, %v7153_v8  ;;  %v574_v43 = vmul.f32 0.1, %v7154_v47  ;;  %v7155_v52 = vrot.slane %v7111_v17, 4  ;;  %v7158_v62 = vld [vmem:[#allocation45_spill] sm:$0xff] }
 0x1be   :  { %v2818_v51 = vrot.slane %v2817_v2, 4  ;;  %v2765_v48 = vmul.f32 %v7152_v16, %v2653_v20  ;;  %v577_v57 = vmul.f32 0.1, %v7156_v56  ;;  %v590_v32 = vmax.f32 %v7158_v62, %v7157_v7  ;;  %v6475_v16 = vpop.f32.mrb[48].mxu0 }
 0x1bf   :  { %v6467_v31 = vmul.f32 %v7155_v52, %v2347_v46  ;;  %v591_v6 = vmax.f32 %v7146_v27, %v567_v19  ;;  %v592_v26 = vmax.f32 %v7149_v58, %v568_v41  ;;  %v593_v20 = vmax.f32 %v7150_v38, %v569_v29  ;;  %v6481_v4 = vpop.f32.mrb[49].mxu0  ;;  %v7159_v19 = vld [vmem:[#allocation10_spill] sm:$0xff]  ;;  %v7161_v38 = vld [vmem:[#allocation11_spill] sm:$0xff] }
 0x1c0   :  { %v2819_v18 = vadd.f32 %v2818_v51, %v2817_v2  ;;  %v2810_v24 = vadd.f32 %v2765_v48, %v2764_v30  ;;  %v594_v46 = vmax.f32 %v7151_v61, %v570_v23  ;;  %v595_v52 = vmax.f32 %v7153_v8, %v571_v3  ;;  %v3011_v41 = vpop.f32.mrb[50].mxu0  ;;  %v7163_v48 = vld [vmem:[#allocation14_spill] sm:$0xff]  ;;  %v7165_v23 = vld [vmem:[#allocation12_spill] sm:$0xff] }
 0x1c1   :  { %v598_v35 = vmax.f32 %v7154_v47, %v574_v43  ;;  %v601_v30 = vmax.f32 %v7156_v56, %v577_v57  ;;  %v7160_v2 = vunpack.i.h.bf16 %v7159_v19  ;;  %v7162_v29 = vunpack.i.l.bf16 %v7161_v38  ;;  %v7167_v47 = vld [vmem:[#allocation13_spill] sm:$0xff]  ;;  %v3012_v44 = vpop.f32.mrb[51].mxu0  ;;  %v7169_v57 = vld [vmem:[#allocation15_spill] sm:$0xff] }
 0x1c2   :  { %v2820_v7 = vrot.slane %v2819_v18, 2  ;;  %v2811_v27 = vrot.slane %v2810_v24, 4  ;;  %v7164_v62 = vunpack.i.h.bf16 %v7163_v48  ;;  %v7166_v8 = vunpack.i.h.bf16 %v7165_v23 }
 0x1c3   :  { %v758_v58 = vmul.f32 %v7160_v2, %v590_v32  ;;  %v759_v51 = vmul.f32 %v7162_v29, %v591_v6  ;;  %v7168_v43 = vunpack.i.l.bf16 %v7167_v47  ;;  %v7170_v19 = vunpack.i.l.bf16 %v7169_v57  ;;  %v7171_v2 = vld [vmem:[#allocation17_spill] sm:$0xff]  ;;  %v7173_v6 = vld [vmem:[#allocation19_spill] sm:$0xff] }
 0x1c4   :  { %v760_v61 = vmul.f32 %v7164_v62, %v592_v26  ;;  %v761_v3 = vmul.f32 %v7166_v8, %v593_v20  ;;  %v6494_v22 = vadd.f32 %v2820_v7, %v2819_v18  ;;  %v2812_v56 = vadd.f32 %v2811_v27, %v2810_v24  ;;  %v7176_v7 = vld [vmem:[#allocation50_spill] sm:$0xff] }
 0x1c5   :  { %v762_v21 = vmul.f32 %v7168_v43, %v594_v46  ;;  %v763_v32 = vmul.f32 %v7170_v19, %v595_v52  ;;  %v7172_v41 = vunpack.i.l.bf16 %v7171_v2  ;;  %v7174_v29 = vunpack.i.l.bf16 %v7173_v6  ;;  %v7175_v46 = vld [vmem:[#allocation49_spill] sm:$0xff] }
 0x1c6   :  { %v797_v26 = vadd.f32 %v759_v51, %v758_v58  ;;  %v2822_v20 = vrot.slane %v6494_v22, 1  ;;  %v2813_v23 = vrot.slane %v2812_v56, 2  ;;  %v7179_v47 = vrot.slane %v6252_v53, 3 }
 0x1c7   :  { %v766_v38 = vmul.f32 %v7172_v41, %v598_v35  ;;  %v769_v48 = vmul.f32 %v7174_v29, %v601_v30  ;;  %v805_v62 = vadd.f32 %v762_v21, %v761_v3  ;;  %v7177_v35 = vld [vmem:[#allocation61_spill] sm:$0xff]  ;;  %v7178_v30 = vrot.slane %v6201_v37, 4 }
 0x1c8   :  { %v798_v18 = vadd.f32 %v797_v26, %v760_v61  ;;  %v2814_v52 = vadd.f32 %v2813_v23, %v2812_v56  ;;  %v7180_v19 = vrot.slane %v6285_v45, 2  ;;  %v7182_v6 = vrot.slane %v6319_v39, 1 }
 0x1c9   :  { %v814_v44 = vadd.f32 %v7175_v46, %v766_v38  ;;  %v806_v24 = vadd.f32 %v805_v62, %v763_v32  ;;  %v822_v27 = vadd.f32 %v7176_v7, %v769_v48  ;;  %v1502_v21 = vsel %vm883_vm8, %v7178_v30, %v7177_v35  ;;  %v7181_v32 = vld [vmem:[#allocation27_spill] sm:$0xff]  ;;  %v7183_v62 = vld [vmem:[#allocation64_spill] sm:$0xff] }
 0x1ca   :  { %v799_v58 = vrot.slane %v798_v18, 4  ;;  %v1504_v43 = vsel %vm886_vm9, %v7179_v47, %v1502_v21  ;;  %v2815_v61 = vrot.slane %v2814_v52, 1  ;;  %v2168_v2 = vadd.f32 %v7181_v32, %v5928_v60 }
 0x1cb   :  { %v815_v8 = vrot.slane %v814_v44, 4  ;;  %v807_v51 = vrot.slane %v806_v24, 4  ;;  %v823_v3 = vrot.slane %v822_v27, 4  ;;  %v1506_v56 = vsel %vm889_vm10, %v7180_v19, %v1504_v43 }
 0x1cc   :  { %v800_v41 = vadd.f32 %v799_v58, %v798_v18  ;;  %v6520_v29 = vsel %vm892_vm11, %v7182_v6, %v1506_v56  ;;  %v6522_v53 = vadd.f32 %v2815_v61, %v2814_v52  ;;  %v2184_v26 = vmul.f32 0.1, %v2168_v2 }
 0x1cd   :  { %v816_v57 = vadd.f32 %v815_v8, %v814_v44  ;;  %v808_v37 = vadd.f32 %v807_v51, %v806_v24  ;;  %v824_v38 = vadd.f32 %v823_v3, %v822_v27  ;;  %v2166_v45 = vadd.f32 %v7183_v62, %v5928_v60 }
 0x1ce   :  { %v801_v23 = vrot.slane %v800_v41, 2  ;;  %v7184_v18 = vrot.slane %v6301_v10, 1  ;;  %v2200_v27 = vmax.f32 %v2168_v2, %v2184_v26  ;;  %v1923_v8 = vrot.slane %v7047_v33, 5 }
 0x1cf   :  { %v817_v48 = vrot.slane %v816_v57, 2  ;;  %v809_v46 = vrot.slane %v808_v37, 2  ;;  %v825_v44 = vrot.slane %v824_v38, 2  ;;  %v2182_v39 = vmul.f32 0.1, %v2166_v45 }
 0x1d0   :  { %v1913_v24 = vadd.f32 %v7184_v18, %v6301_v10  ;;  %v802_v35 = vadd.f32 %v801_v23, %v800_v41  ;;  %v1924_v21 = vrot.slane %v7047_v33, 6  ;;  %v7185_v60 = vunpack.i.h.bf16 %v7142_v59  ;;  %v7189_v23 = vld [vmem:[#allocation56_spill] sm:$0xff] }
 0x1d1   :  { %v818_v7 = vadd.f32 %v817_v48, %v816_v57  ;;  %v810_v52 = vadd.f32 %v809_v46, %v808_v37  ;;  %v826_v30 = vadd.f32 %v825_v44, %v824_v38  ;;  %v2198_v3 = vmax.f32 %v2166_v45, %v2182_v39  ;;  %v7187_v48 = vld [vmem:[#allocation21_spill] sm:$0xff] }
 0x1d2   :  { %v2312_v51 = vmul.f32 %v7185_v60, %v2200_v27  ;;  %v1925_v47 = vrot.slane %v7047_v33, 7  ;;  %v803_v43 = vrot.slane %v802_v35, 1  ;;  %v1939_v57 = vmul.f32 %v1923_v8, %v6269_v34  ;;  %v7190_v34 = vld [vmem:[#allocation42_spill] sm:$0xff] }
 0x1d3   :  { %v819_v58 = vrot.slane %v818_v7, 1  ;;  %v811_v61 = vrot.slane %v810_v52, 1  ;;  %v827_v10 = vrot.slane %v826_v30, 1  ;;  %v7186_v32 = vunpack.i.h.bf16 %v7147_v12 }
 0x1d4   :  { %v2362_v56 = vadd.f32 %v2312_v51, %v6442_v25  ;;  %v1940_v41 = vmul.f32 %v1924_v21, %v6333_v40  ;;  %v804_v37 = vadd.f32 %v803_v43, %v802_v35  ;;  %v1941_v6 = vmul.f32 %v1925_v47, %v1913_v24 }
 0x1d5   :  { %v820_v19 = vadd.f32 %v819_v58, %v818_v7  ;;  %v2310_v2 = vmul.f32 %v7186_v32, %v2198_v3  ;;  %v812_v38 = vadd.f32 %v811_v61, %v810_v52  ;;  %v828_v59 = vadd.f32 %v827_v10, %v826_v30  ;;  %v7198_v10 = vld [vmem:[#allocation58_spill] sm:$0xff] }
 0x1d6   :  { %v7188_v26 = vrot.slane %v7187_v48, 5  ;;  %v2363_v62 = vrot.slane %v2362_v56, 4  ;;  %v7191_v46 = vrot.slane %v7190_v34, 7  ;;  %v7192_v12 = vrot.slane %v7187_v48, 3 }
 0x1d7   :  { %v2355_v45 = vadd.f32 %v2310_v2, %v6455_v11  ;;  %v7193_v40 = vrot.slane %v7187_v48, 4  ;;  %v7194_v7 = vrot.slane %v7187_v48, 6  ;;  %v7195_v27 = vrot.slane %v6236_v1, 6 }
 0x1d8   :  { %v862_v33 = vmul.f32 %v7188_v26, %v820_v19  ;;  %v1951_v25 = vsel %vm874_vm4, %v7191_v46, %v7189_v23  ;;  %v860_v44 = vmul.f32 %v7192_v12, %v804_v37  ;;  %v2364_v11 = vadd.f32 %v2363_v62, %v2362_v56  ;;  %v4659_v46 = vld [vmem:[%s6828_s14] sm:$0xff]  }
 0x1d9   :  { %v861_v18 = vmul.f32 %v7193_v40, %v812_v38  ;;  %v863_v24 = vmul.f32 %v7194_v7, %v828_v59  ;;  %v1953_v39 = vsel %vm877_vm5, %v7195_v27, %v1951_v25  ;;  %v2356_v35 = vrot.slane %v2355_v45, 4 }
 0x1da   :  { %v885_v8 = vrot.slane %v862_v33, 3  ;;  %v7196_v52 = vrot.slane %v6205_v36, 5  ;;  %v879_v21 = vrot.slane %v860_v44, 5  ;;  %v7197_v51 = vrot.slane %v6273_v15, 4 }
 0x1db   :  { %v882_v58 = vrot.slane %v861_v18, 4  ;;  %v888_v60 = vrot.slane %v863_v24, 2  ;;  %v2365_v47 = vrot.slane %v2364_v11, 2  ;;  %v2357_v43 = vadd.f32 %v2356_v35, %v2355_v45  ;;  %v7199_v45 = vld [vmem:[#allocation59_spill] sm:$0xff] }
 0x1dc   :  { %v1955_v30 = vsel %vm880_vm6, %v7196_v52, %v1953_v39  ;;  %v1958_v61 = vrot.slane %v1939_v57, 3  ;;  %v1960_v1 = vrot.slane %v1940_v41, 2  ;;  %v881_v19 = vsel %vm880_vm6, %v879_v21, %v7198_v10 }
 0x1dd   :  { %v1957_v3 = vsel %vm883_vm8, %v7197_v51, %v1955_v30  ;;  %v1962_v56 = vrot.slane %v1941_v6, 1  ;;  %v2378_v32 = vrot.slane %v7111_v17, 5  ;;  %v2379_v36 = vrot.slane %v7111_v17, 6 }
 0x1de   :  { %v884_v2 = vsel %vm883_vm8, %v882_v58, %v881_v19  ;;  %v2366_v37 = vadd.f32 %v2365_v47, %v2364_v11  ;;  %v2358_v38 = vrot.slane %v2357_v43, 2  ;;  %v1959_v15 = vsel %vm886_vm9, %v1958_v61, %v1957_v3 }
 0x1df   :  { %v887_v59 = vsel %vm886_vm9, %v885_v8, %v884_v2  ;;  %v1961_v48 = vsel %vm889_vm10, %v1960_v1, %v1959_v15  ;;  %v2380_v57 = vrot.slane %v7111_v17, 7  ;;  %v2394_v41 = vmul.f32 %v2378_v32, %v6450_v63  ;;  %v4663_v2 = vld [vmem:[%s6828_s14 + $0x20] sm:$0xff]   ;;  %v4664_v15 = vld [vmem:[%s6828_s14 + $0x28] sm:$0xff]  }
 0x1e0   :  { %v890_v6 = vsel %vm889_vm10, %v888_v60, %v887_v59  ;;  %v2367_v26 = vrot.slane %v2366_v37, 1  ;;  %v2359_v33 = vadd.f32 %v2358_v38, %v2357_v43  ;;  %v1963_v62 = vsel %vm892_vm11, %v1962_v56, %v1961_v48  ;;  %v4665_v59 = vld [vmem:[%s6828_s14 + $0x30] sm:$0xff]  }
 0x1e1   :  { %v7200_v23 = vrot.slane %v7199_v45, 1  ;;  %v7201_v25 = vrot.slane %v6358_v54, 7  ;;  %v2413_v63 = vrot.slane %v2394_v41, 3  ;;  %v2823_v12 = vadd.f32 %v2822_v20, %v6494_v22  ;;  %v4655_v41 = vld [vmem:[%s6828_s14 + $0x40] ss:$0 sps:$4 sm:$0x77]  }
 0x1e2   :  { %v2360_v40 = vrot.slane %v2359_v33, 1  ;;  %v2368_v18 = vadd.f32 %v2367_v26, %v2366_v37  ;;  %v7202_v7 = vrot.slane %v6415_v14, 6  ;;  %v7203_v27 = vrot.slane %v6401_v49, 5  ;;  %v4669_v37 = vld [vmem:[%s7210_s10 + $0x4] ss:$8 sps:$4 sm:$0xff]  }
 0x1e3   :  { %v893_v34 = vsel %vm892_vm11, %v7200_v23, %v890_v6  ;;  %v2406_v17 = vsel %vm874_vm4, %v7201_v25, %v6371_v42  ;;  %v2834_v54 = vrot.slane %v7107_v5, 6  ;;  %v2835_v42 = vrot.slane %v7107_v5, 7  ;;  %v4666_v6 = vld [vmem:[%s6828_s14 + $0x38] sm:$0xff]   ;;  %v4667_v45 = vld [vmem:[%s7210_s10] ss:$8 sps:$4 sm:$0xff]  }
 0x1e4   :  { %v3019_v44 = vpack.c.bf16 %v6520_v29, %v893_v34  ;;  %v2408_v24 = vsel %vm877_vm5, %v7202_v7, %v2406_v17  ;;  %v7204_v8 = vrot.slane %v7107_v5, 5  ;;  %v2361_v20 = vadd.f32 %v2360_v40, %v2359_v33  ;;  %v4660_v5 = vld [vmem:[%s6828_s14 + $0x8] sm:$0xff]   ;;  %v4673_v25 = vld [vmem:[%s6834_s20 + $0x40] sm:$0xff]   ;;  %v4679_v40 = vld [vmem:[%s6834_s20 + $0x50] sm:$0xff]  }
 0x1e5   :  { %v2410_v39 = vsel %vm880_vm6, %v7203_v27, %v2408_v24  ;;  %v2396_v29 = vmul.f32 %v2380_v57, %v2368_v18  ;;  %v7205_v11 = vrot.slane %v6467_v31, 4  ;;  %v7206_v49 = vrot.slane %v6343_v55, 7  ;;  %v4674_v17 = vld [vmem:[%s6834_s20] sm:$0xff]   ;;  %4138 = vmatprep.subr.bf16.mxu0 %v4673_v25  ;;  %v4678_v18 = vld [vmem:[%s6833_s19 + $0x10] sm:$0xff]   ;;  %v4682_v24 = vld [vmem:[%s6834_s20 + $0x58] sm:$0xff]  }
 0x1e6   :  { %v2849_v22 = vmul.f32 %v7204_v8, %v6425_v0  ;;  %3151 = vmatmul.mubr.bf16.vlgmr.msra.gmra.mrb[60].mxu1 %v3019_v44  ;;  %v2864_v52 = vrot.slane %v6409_v50, 5  ;;  %v7207_v0 = vmov 0   ;;  %v2850_v31 = vmul.f32 %v2834_v54, %v6522_v53  ;;  %v4661_v53 = vld [vmem:[%s6828_s14 + $0x10] sm:$0xff]   ;;  %4139 = vmatpush3.bf16.msra.mxu0 %v4674_v17  ;;  %v4677_v44 = vld [vmem:[%s6834_s20 + $0x8] sm:$0xff]   ;;  %v4681_v27 = vld [vmem:[%s6833_s19 + $0x18] sm:$0xff]  }
 0x1e7   :  { %v2412_v14 = vsel %vm883_vm8, %v7205_v11, %v2410_v39  ;;  %v2861_v35 = vsel %vm874_vm4, %v7206_v49, %v6352_v28  ;;  %3421 = vmatpush1.bf16.msra.mxu1 %v4659_v46  ;;  %3158 = vmatprep.mubr.bf16.mxu1 %v7207_v0  ;;  %v2851_v21 = vmul.f32 %v2835_v42, %v2823_v12  ;;  %v7208_v55 = vrot.slane %v6395_v13, 6  ;;  %v4672_v46 = vld [vmem:[%s6833_s19] sm:$0xff]   ;;  %v4676_v12 = vld [vmem:[%s6834_s20 + $0x48] sm:$0xff]   ;;  %v4680_v7 = vld [vmem:[%s6834_s20 + $0x10] sm:$0xff]  }
 0x1e8   :  { %v2414_v30 = vsel %vm886_vm9, %v2413_v63, %v2412_v14  ;;  %3422 = vmatprep.subr.bf16.mxu1 %v7207_v0  ;;  %v2395_v58 = vmul.f32 %v2379_v36, %v2361_v20  ;;  %v2868_v60 = vrot.slane %v2849_v22, 3  ;;  %v2870_v51 = vrot.slane %v2850_v31, 2  ;;  %v4662_v36 = vld [vmem:[%s6828_s14 + $0x18] sm:$0xff]   ;;  %v4675_v63 = vld [vmem:[%s6833_s19 + $0x8] sm:$0xff]   ;;  %4140 = vmatprep.subr.bf16.mxu0 %v4676_v12  ;;  %v4685_v8 = vld [vmem:[%s6834_s20 + $0x60] sm:$0xff]  }
 0x1e9   :  { %v2863_v28 = vsel %vm877_vm5, %v7208_v55, %v2861_v35  ;;  %v7209_v47 = vrot.slane %v6448_v9, 4  ;;  %v2417_v61 = vrot.slane %v2396_v29, 1  ;;  %v2872_v13 = vrot.slane %v2851_v21, 1  ;;  %v4683_v42 = vld [vmem:[%s6834_s20 + $0x18] sm:$0xff]   ;;  %v4684_v20 = vld [vmem:[%s6833_s19 + $0x20] sm:$0xff]   ;;  %v4688_v14 = vld [vmem:[%s6834_s20 + $0x68] sm:$0xff]  }
 0x1ea   :  { %v2865_v50 = vsel %vm880_vm6, %v2864_v52, %v2863_v28  ;;  %v2415_v3 = vrot.slane %v2395_v58, 2  ;;  %v7211_v48 = vmov 65535   ;;  %4141 = vmatpush3.bf16.msra.mxu0 %v4677_v44  ;;  %v4817_v39 = vmov 1966171168   ;;  %v4686_v11 = vld [vmem:[%s6834_s20 + $0x20] sm:$0xff]   ;;  %v4687_v52 = vld [vmem:[%s6833_s19 + $0x28] sm:$0xff]  }
 0x1eb   :  { %v2867_v43 = vsel %vm883_vm8, %v7209_v47, %v2865_v50  ;;  %3423 = vmatpush1.bf16.msra.mxu1 %v4660_v5  ;;  %v3415_v57 = vsel %vm3414_vm13, 4294967295, %v7211_v48  ;;  %4142 = vmatprep.subr.bf16.mxu0 %v4679_v40  ;;  %v3708_v54 = vunpack.c.l.s4 %v4817_v39  ;;  %v3302_v22 = vlaneseq  ;;  %v4074_v35 = vld.sshfl [vmem:[%s7212_s2] sm:$0x11 pattern:$0x75316420]  ;;  %v4691_v31 = vld [vmem:[%s6834_s20 + $0x70] sm:$0xff]  }
 0x1ec   :  { %v2869_v1 = vsel %vm886_vm9, %v2868_v60, %v2867_v43  ;;  %3424 = vmatprep.subr.bf16.mxu1 %v7207_v0  ;;  %v2416_v10 = vsel %vm889_vm10, %v2415_v3, %v2414_v30  ;;  %v3416_v26 = vsel %vm3257_vm3, %v3415_v57, 0  ;;  %v4689_v30 = vld [vmem:[%s6834_s20 + $0x28] sm:$0xff]   ;;  %v3706_v21 = vcombine.high %v4074_v35, %v4074_v35  ;;  %v4690_v58 = vld [vmem:[%s6833_s19 + $0x30] sm:$0xff]   ;;  %v4694_v50 = vld [vmem:[%s6834_s20 + $0x78] sm:$0xff]  }
 0x1ed   :  { %v2871_v19 = vsel %vm889_vm10, %v2870_v51, %v2869_v1  ;;  %v2418_v56 = vsel %vm892_vm11, %v2417_v61, %v2416_v10  ;;  %v3418_v33 = vand.u32 %v4655_v41, %v3416_v26  ;;  %v3709_v29 = vunpack.c.0.s8 %v3708_v54  ;;  %v4692_v55 = vld [vmem:[%s6834_s20 + $0x30] sm:$0xff]   ;;  %v4693_v60 = vld [vmem:[%s6833_s19 + $0x38] sm:$0xff]   ;;  %v4696_v3 = vld [vmem:[%s6833_s19 + $0x40] ss:$0 sps:$4 sm:$0x33]  }
 0x1ee   :  { %v2873_v9 = vsel %vm892_vm11, %v2872_v13, %v2871_v19  ;;  %v3020_v32 = vpack.c.bf16 %v2418_v56, %v1963_v62  ;;  %v3323_v62 = vld [vmem:[%s7210_s10 + $0x10] sm:$0xff]  ;;  %4143 = vmatpush3.bf16.msra.mxu0 %v4680_v7  ;;  %v6721_v49 = vshrl.u32 %v3302_v22, 7  ;;  %v4695_v51 = vld [vmem:[%s6834_s20 + $0x38] sm:$0xff]   ;;  %v3778_v47 = vsel %vm3414_vm13, %v4696_v3, 0  ;;  %s3835_s10 = sshll.u32 %s4819_s6, 4  ;;  %s6768_s10 = int_to_ptr.vmem [resolvable:$true] %s3835_s10 }
 0x1ef   :  { %3425 = vmatpush1.bf16.msra.mxu1 %v4661_v53  ;;  %v3021_v38 = vpack.c.bf16 %v2873_v9, %v2873_v9  ;;  %v4045_v23 = vcombine.high %v3323_v62, %v3323_v62  ;;  %v4044_v34 = vcombine.low %v3323_v62, %v3323_v62  ;;  %4144 = vmatprep.subr.bf16.mxu0 %v4682_v24 }
 0x1f0   :  { %3426 = vmatprep.subr.bf16.mxu1 %v7207_v0  ;;  %3159 = vmatmul.mubr.bf16.gmra.mrb[64].mxu1 %v3020_v32  ;;  %v3712_v5 = vsub.s32 %v3709_v29, %v6721_v49  ;;  %v3304_v10 = vsub.s32 0, %v6721_v49 }
 0x1f1   :  { %3166 = vmatprep.mubr.bf16.mxu1 %v7207_v0 }
 0x1f2   :  { %4145 = vmatpush3.bf16.msra.mxu0 %v4683_v42  ;;  %v3720_v28 = vrot.slane %v3706_v21, %v3712_v5  ;;  %v3713_v43 = vrot.slane %v4074_v35, %v3712_v5  ;;  %v3305_v19 = vrot.slane %v6475_v16, %v3304_v10  ;;  %v3471_v12 = vrot.slane %v6481_v4, %v3304_v10 }
 0x1f3   :  { %3427 = vmatpush1.bf16.msra.mxu1 %v4662_v36  ;;  %4146 = vmatprep.subr.bf16.mxu0 %v4685_v8 }
 0x1f4   :  { %3428 = vmatprep.subr.bf16.mxu1 %v7207_v0 }
 0x1f6   :  { %4147 = vmatpush3.bf16.msra.mxu0 %v4686_v11 }
 0x1f7   :  { %3429 = vmatpush1.bf16.msra.mxu1 %v4663_v2  ;;  %4148 = vmatprep.subr.bf16.mxu0 %v4688_v14 }
 0x1f8   :  { %3430 = vmatprep.subr.bf16.mxu1 %v7207_v0  ;;  %3167 = vmatmul.mubr.bf16.gmra.mrb[68].mxu1 %v3021_v38 }
 0x1f9   :  { %4055 = vmatprep.mubr.msk.bf16.mxu1 %vm3407_vm12, %v4669_v37 }
 0x1fa   :  { %4149 = vmatpush3.bf16.msra.mxu0 %v4689_v30 }
 0x1fb   :  { %3431 = vmatpush1.bf16.msra.mxu1 %v4664_v15  ;;  %4150 = vmatprep.subr.bf16.mxu0 %v4691_v31 }
 0x1fc   :  { %3432 = vmatprep.subr.bf16.mxu1 %v7207_v0 }
 0x1fe   :  { %4151 = vmatpush3.bf16.msra.mxu0 %v4692_v55 }
 0x1ff   :  { %3433 = vmatpush1.bf16.msra.mxu1 %v4665_v59  ;;  %4152 = vmatprep.subr.bf16.mxu0 %v4694_v50 }
 0x200   :  { %3434 = vmatprep.subr.bf16.mxu1 %v7207_v0 }
 0x202   :  { %4153 = vmatpush3.bf16.msra.mxu0 %v4695_v51 }
 0x203   :  { %3435 = vmatpush1.bf16.msra.mxu1 %v4666_v6 }
 0x204   :  { %3436 = vmatprep.subr.bf16.mxu1 %v7207_v0 }
 0x207   :  { %3437 = vmatpush1.bf16.msra.mxu1 %v3418_v33 }
 0x208   :  { %3780 = vmatprep.subr.bf16.mxu1 %v7207_v0 }
 0x20a   :  { %3453 = vmatmul.mubr.bf16.vlgmr.msra.gmra.mrb[72].mxu1 %v4667_v45 }
 0x20b   :  { %4056 = vmatprep.mubr.msk.bf16.mxu1 %vm3407_vm12, %v4045_v23  ;;  %3781 = vmatpush1.bf16.msra.mxu1 %v4672_v46 }
 0x20c   :  { %3782 = vmatprep.subr.bf16.mxu1 %v7207_v0 }
 0x20f   :  { %3783 = vmatpush1.bf16.msra.mxu1 %v4675_v63 }
 0x210   :  { %3784 = vmatprep.subr.bf16.mxu1 %v7207_v0 }
 0x212   :  { %3461 = vmatmul.mubr.bf16.gmra.mrb[76].mxu1 %v4044_v34 }
 0x213   :  { %3785 = vmatpush1.bf16.msra.mxu1 %v4678_v18  ;;  %4084 = vmatprep.mubr.msk.bf16.mxu1 %vm3773_vm14, %v3720_v28  ;;  %v4057_v18 = vld [vmem:[%s6832_s18] ss:$0 sm:$0xff]  ;;  %s4818_s18 = smov [#allocation5]  }
 0x214   :  { %3786 = vmatprep.subr.bf16.mxu1 %v7207_v0  ;;  %s3847_s29 = sshll.u32 %s4818_s18, 4  ;;  %s3848_s29 = int_to_ptr.vmem [resolvable:$true] %s3847_s29 }
 0x215   :  { %s4745_s2 = scalar_lea.vmem %s3848_s29, 384  ;;  %p4750_p1 = scmp.lt.s32.totalorder %s3848_s29, %s3848_s29 }
 0x216   :  { %p4746_p0 = scmp.ne.s32.totalorder %s3848_s29, %s4745_s2  ;;  %p4751_p2 = scmp.lt.s32.totalorder %s4745_s2, %s4745_s2 }
 0x217   :  { %3787 = vmatpush1.bf16.msra.mxu1 %v4681_v27 }
 0x218   :  { %3788 = vmatprep.subr.bf16.mxu1 %v7207_v0  ;;  %p4752_p3 = por %p4751_p2, %p4750_p1 }
 0x21a   :  { %p4753_p4 = pnand %p4752_p3, %p4746_p0 }
 0x21b   :  { %3789 = vmatpush1.bf16.msra.mxu1 %v4684_v20 }
 0x21c   :  { %3790 = vmatprep.subr.bf16.mxu1 %v7207_v0 }
 0x21f   :  { %3791 = vmatpush1.bf16.msra.mxu1 %v4687_v52 }
 0x220   :  { %3792 = vmatprep.subr.bf16.mxu1 %v7207_v0 }
 0x223   :  { %3793 = vmatpush1.bf16.msra.mxu1 %v4690_v58 }
 0x224   :  { %3794 = vmatprep.subr.bf16.mxu1 %v7207_v0 }
 0x227   :  { %3795 = vmatpush1.bf16.msra.mxu1 %v4693_v60 }
 0x228   :  { %3796 = vmatprep.subr.bf16.mxu1 %v7207_v0  ;;  %v4041_v0 = vld [vmem:[%s6831_s17] ss:$0 sm:$0xff] }
 0x22b   :  { %3797 = vmatpush1.bf16.msra.mxu1 %v3778_v47 }
 0x22e   :  { %3813 = vmatmul.mubr.bf16.vlgmr.msra.gmra.mrb[80].mxu1 %v3713_v43 }
 0x283   :  { %v3295_v53 = vpop.f32.mrb[52].mxu0 }
 0x284   :  { %v3297_v61 = vpop.f32.mrb[53].mxu0 }
 0x285   :  { %v3298_v1 = vpop.f32.mrb[54].mxu0 }
 0x286   :  { %v3300_v13 = vpop.f32.mrb[55].mxu0 }
 0x2b9   :  { %v3152_v56 = vpop.f32.mrb[60].mxu1 }
 0x2ba   :  { %v3296_v9 = vadd.f32 %v3295_v53, %v3152_v56  ;;  %v3154_v32 = vpop.f32.mrb[61].mxu1 }
 0x2bb   :  { %v3155_v36 = vpop.f32.mrb[62].mxu1 }
 0x2bc   :  { %v3306_v2 = vadd.f32 %v3305_v19, %v3296_v9  ;;  %v3299_v37 = vadd.f32 %v3298_v1, %v3155_v36  ;;  %v3157_v38 = vpop.f32.mrb[63].mxu1 }
 0x2be   :  { %v3315_v15 = vadd.f32 %v4041_v0, %v3306_v2  ;;  %v3307_v59 = vadd.f32 %v3305_v19, %v3299_v37 }
 0x2c0   :  { %v3317_v48 = vmul.f32 0.1, %v3315_v15  ;;  %v3316_v57 = vadd.f32 %v4041_v0, %v3307_v59 }
 0x2c2   :  { %v3319_v41 = vmax.f32 %v3315_v15, %v3317_v48  ;;  %v3318_v6 = vmul.f32 0.1, %v3316_v57 }
 0x2c3   :  { %v3160_v26 = vpop.f32.mrb[64].mxu1 }
 0x2c4   :  { %3824 = vst [vmem:[#allocation3] sm:$0xff] %v3319_v41  ;;  %v3320_v16 = vmax.f32 %v3316_v57, %v3318_v6  ;;  %v3161_v33 = vpop.f32.mrb[65].mxu1 }
 0x2c5   :  { %v3163_v62 = vpop.f32.mrb[66].mxu1 }
 0x2c6   :  { %v3491_v45 = vadd.f32 %v3320_v16, %v3319_v41  ;;  %3825 = vst [vmem:[#allocation3 + $0x8] sm:$0xff] %v3320_v16  ;;  %v3164_v23 = vpop.f32.mrb[67].mxu1 }
 0x2c8   :  { %v3492_v20 = vrot.slane %v3491_v45, 4 }
 0x2ca   :  { %v3493_v31 = vadd.f32 %v3492_v20, %v3491_v45 }
 0x2cb   :  { %v3168_v34 = vpop.f32.mrb[68].mxu1 }
 0x2cc   :  { %v3169_v46 = vpop.f32.mrb[69].mxu1  ;;  %v3494_v28 = vrot.slane %v3493_v31, 2 }
 0x2cd   :  { %v3171_v25 = vpop.f32.mrb[70].mxu1 }
 0x2ce   :  { %v3172_v17 = vpop.f32.mrb[71].mxu1  ;;  %v3495_v51 = vadd.f32 %v3494_v28, %v3493_v31 }
 0x2d0   :  { %v3496_v43 = vrot.slane %v3495_v51, 1 }
 0x2d2   :  { %v3497_v1 = vadd.f32 %v3496_v43, %v3495_v51 }
 0x2d4   :  { %v3499_v19 = vmul.f32 0.0625, %v3497_v1 }
 0x2d6   :  { %v3510_v32 = vpack.c.bf16 %v3499_v19, %v3499_v19 }
 0x2dd   :  { %v3454_v63 = vpop.f32.mrb[72].mxu1 }
 0x2de   :  { %v3455_v44 = vadd.f32 %v3454_v63, %v3161_v33  ;;  %v3456_v40 = vpop.f32.mrb[73].mxu1 }
 0x2df   :  { %v3457_v7 = vpop.f32.mrb[74].mxu1 }
 0x2e0   :  { %v3472_v24 = vadd.f32 %v3471_v12, %v3455_v44  ;;  %v3458_v27 = vadd.f32 %v3457_v7, %v3164_v23  ;;  %v3459_v39 = vpop.f32.mrb[75].mxu1 }
 0x2e2   :  { %v3482_v54 = vadd.f32 %v4057_v18, %v3472_v24  ;;  %v3473_v42 = vadd.f32 %v3471_v12, %v3458_v27 }
 0x2e4   :  { %v3485_v8 = vmul.f32 0.1, %v3482_v54  ;;  %v3483_v22 = vadd.f32 %v4057_v18, %v3473_v42 }
 0x2e5   :  { %v3462_v29 = vpop.f32.mrb[76].mxu1 }
 0x2e6   :  { %v3488_v11 = vmax.f32 %v3482_v54, %v3485_v8  ;;  %v3486_v14 = vmul.f32 0.1, %v3483_v22  ;;  %v3463_v49 = vadd.f32 %v3462_v29, %v3169_v46  ;;  %v3464_v4 = vpop.f32.mrb[77].mxu1 }
 0x2e7   :  { %v3465_v35 = vpop.f32.mrb[78].mxu1 }
 0x2e8   :  { %3826 = vst [vmem:[#allocation5] sm:$0xff] %v3488_v11  ;;  %v3489_v52 = vmax.f32 %v3483_v22, %v3486_v14  ;;  %v3474_v5 = vadd.f32 %v3471_v12, %v3463_v49  ;;  %v3466_v30 = vpop.f32.mrb[79].mxu1 }
 0x2ea   :  { %v3500_v21 = vadd.f32 %v3489_v52, %v3488_v11  ;;  %3827 = vst [vmem:[#allocation5 + $0x8] sm:$0xff] %v3489_v52  ;;  %v3484_v58 = vadd.f32 %v4057_v18, %v3474_v5 }
 0x2ec   :  { %v3487_v55 = vmul.f32 0.1, %v3484_v58 }
 0x2ee   :  { %v3490_v50 = vmax.f32 %v3484_v58, %v3487_v55 }
 0x2f0   :  { %v3501_v60 = vadd.f32 %v3500_v21, %v3490_v50  ;;  %3828 = vst [vmem:[#allocation5 + $0x10] sm:$0xff] %v3490_v50 }
 0x2f2   :  { %v3502_v3 = vrot.slane %v3501_v60, 4 }
 0x2f4   :  { %v3503_v47 = vadd.f32 %v3502_v3, %v3501_v60 }
 0x2f6   :  { %v3504_v53 = vrot.slane %v3503_v47, 2 }
 0x2f8   :  { %v3505_v61 = vadd.f32 %v3504_v53, %v3503_v47 }
 0x2fa   :  { %v3506_v13 = vrot.slane %v3505_v61, 1 }
 0x2fc   :  { %v3507_v10 = vadd.f32 %v3506_v13, %v3505_v61 }
 0x2fe   :  { %v3509_v56 = vmul.f32 0.041666668, %v3507_v10 }
 0x300   :  { %v3511_v9 = vpack.c.bf16 %v3509_v56, %v3509_v56 }
 0x302   :  { %3690 = vmatprep.mubr.bf16.mxu0 %v3511_v9 }
 0x303   :  { %3691 = vmatmul.mubr.bf16.vlgmr.msra.gmra.mrb[56].mxu0 %v3510_v32 }
 0x304   :  { %4756 = shalt.err (!%p4753_p4)
}
 0x305   :  { %s4757_s11 = scalar_lea.hbm %s6837_s23, 384 }
 0x306   :  { %p4758_p5 = scmp.ne.s32.totalorder %s6837_s23, %s4757_s11  ;;  %p4761_p6 = scmp.lt.u32.totalorder %s4757_s11, %s6837_s23 }
 0x308   :  { %p4763_p7 = pnand %p4761_p6, %p4758_p5 }
 0x30a   :  { %4766 = shalt.err (!%p4763_p7)
}
 0x30b   :  { %s4820_s25 = smov 128   ;;  %s4821_s16 = smov 8  }
 0x30c   :  { %3853 = dma.vmem_to_hbm [thread:$0]  %s3848_s29, 384, %s6837_s23, [#allocation6], %s4820_s25, %s4820_s25, %s4821_s16  }
 0x30d   :  { %s4767_s14 = scalar_lea.vmem %s6768_s10, 256  ;;  %p4772_p9 = scmp.lt.s32.totalorder %s6768_s10, %s6768_s10 }
 0x30e   :  { %p4768_p8 = scmp.ne.s32.totalorder %s6768_s10, %s4767_s14  ;;  %p4773_p10 = scmp.lt.s32.totalorder %s4767_s14, %s4767_s14 }
 0x310   :  { %p4774_p11 = por %p4773_p10, %p4772_p9 }
 0x312   :  { %p4775_p12 = pnand %p4774_p11, %p4768_p8 }
 0x314   :  { %4778 = shalt.err (!%p4775_p12)
}
 0x315   :  { %s4779_s5 = scalar_lea.hbm %s6836_s22, 256 }
 0x316   :  { %p4780_p13 = scmp.ne.s32.totalorder %s6836_s22, %s4779_s5  ;;  %p4783_p0 = scmp.lt.u32.totalorder %s4779_s5, %s6836_s22 }
 0x318   :  { %p4785_p1 = pnand %p4783_p0, %p4780_p13 }
 0x31a   :  { %4788 = shalt.err (!%p4785_p1)
}
 0x31b   :  { %3841 = dma.vmem_to_hbm [thread:$0]  %s6768_s10, 256, %s6836_s22, [#allocation4], %s4820_s25, %s4820_s25, %s4821_s16   ;;  %v3814_v0 = vpop.f32.mrb[80].mxu1 }
 0x31c   :  { %v3816_v36 = vpop.f32.mrb[81].mxu1  ;;  %v3820_v57 = vld [vmem:[%s6835_s21] sm:$0x1]  ;;  %s4822_s18 = smov [#allocation7]  }
 0x31d   :  { %v3817_v2 = vpop.f32.mrb[82].mxu1  ;;  %s3860_s29 = sshll.u32 %s4822_s18, 4  ;;  %s3861_s29 = int_to_ptr.vmem [resolvable:$true] %s3860_s29 }
 0x31e   :  { %v3818_v37 = vpop.f32.mrb[83].mxu1  ;;  %s4789_s22 = scalar_lea.vmem %s3861_s29, 16  ;;  %s4793_s6 = scalar_lea.vmem %s3861_s29, 32 }
 0x31f   :  { %p4790_p2 = scmp.ne.s32.totalorder %s3861_s29, %s4789_s22  ;;  %p4794_p3 = scmp.lt.s32.totalorder %s3861_s29, %s3861_s29 }
 0x320   :  { %p4795_p4 = scmp.lt.s32.totalorder %s4793_s6, %s4789_s22 }
 0x322   :  { %p4796_p5 = por %p4795_p4, %p4794_p3 }
 0x324   :  { %p4797_p6 = pnand %p4796_p5, %p4790_p2 }
 0x3d6   :  { %v4154_v38 = vpop.f32.mrb[56].mxu0 }
 0x3d7   :  { %v4155_v15 = vpop.f32.mrb[57].mxu0 }
 0x3d8   :  { %v4156_v59 = vadd.f32 %v4155_v15, %v4154_v38  ;;  %v4157_v48 = vpop.f32.mrb[58].mxu0 }
 0x3d9   :  { %v4158_v41 = vpop.f32.mrb[59].mxu0 }
 0x3da   :  { %v3815_v6 = vadd.f32 %v4156_v59, %v3814_v0 }
 0x3dc   :  { %v3821_v26 = vadd.f32 %v3820_v57, %v3815_v6 }
 0x3de   :  { %v3822_v16 = vmul.f32 0.1, %v3821_v26 }
 0x3e0   :  { %v3823_v33 = vmax.f32 %v3821_v26, %v3822_v16 }
 0x3e2   :  { %3829 = vst [vmem:[#allocation7] sm:$0x1] %v3823_v33 }
 0x3e3   :  { %4800 = shalt.err (!%p4797_p6)
}
 0x3e4   :  { %s4801_s21 = scalar_lea.hbm %s6838_s24, 16 }
 0x3e5   :  { %p4802_p7 = scmp.ne.s32.totalorder %s6838_s24, %s4801_s21  ;;  %p4805_p8 = scmp.lt.u32.totalorder %s4801_s21, %s6838_s24 }
 0x3e7   :  { %p4807_p9 = pnand %p4805_p8, %p4802_p7 }
 0x3e9   :  { %4810 = shalt.err (!%p4807_p9)
}
 0x3ea   :  { %3863 = dma.vmem_to_hbm [thread:$0]  %s3861_s29, 16, %s6838_s24, [#allocation6]  }
 0x3eb   :  { %4811 = dma.done.wait [#allocation4], 256  }
 0x3ec   :  { %4812 = vsyncadd [#allocation4], 4294967040 }
 0x3ed   :  { %4813 = dma.done.wait [#allocation6], 400  }
 0x3ee   :  { %4814 = vsyncadd [#allocation6], 4294966896 }
 0x3ef   :  { %3873 = vsyncpa [#allocation4], 1 }
 0x3f0   :  { %3874 = vsyncpa [#allocation6], 1 }

</bundles_post_ra>
